<compile_context>
chip_gen: v7x
topology: tpu7x:2x2x1
jax: 0.10.0
libtpu: 0.0.40
codegen_flags: <defaults>
</compile_context>

<pallas_src>
import functools

import jax
import jax.numpy as jnp
import numpy as np
from jax.experimental import pallas as pl
from jax.experimental.pallas import tpu as pltpu


# ---------------------------------------------------------------------------
# Kernel: one batch tile, full fused network.
# ---------------------------------------------------------------------------
def _fingernet_kernel(
    x_ref,        # (TN, D)               raw input tile (normalization folded into w0g/b0g)
    w0g_ref,      # (NG, D, GF)   f32     fused normalize + finger layer-0, per group
    b0g_ref,      # (NG, 1, GF)   f32
    wgd_ref,      # (Lf-1, NG, GF, GF) bf16  grouped block-diagonal finger hidden weights (W^T)
    bgd_ref,      # (Lf-1, NG, 1, GF)  f32
    w_in_ref,     # (NG, GF, F)   bf16    trunk input weight split per group (W^T)
    b_in_ref,     # (1, F)        f32
    wh_ref,       # (Lt-1, F, F)  bf16    trunk hidden weights (W^T)
    bh_ref,       # (Lt-1, 1, F)  f32
    w_out_ref,    # (F, O_pad)    bf16    output weight, scaling folded, 128-lane padded
    b_out_ref,    # (1, O_pad)    f32
    o_ref,        # (TN, O_pad)   f32     lane-dense output tile
    *,
    num_groups,
    num_finger_hidden,
    num_trunk_hidden,
):
    x = x_ref[...]                                                  # (TN, D) f32

    # --- Finger layer 0 (normalization fused in), per group, f32 (K=D is tiny) ------
    hs = []
    for g in range(num_groups):
        hg = jnp.dot(x, w0g_ref[g], preferred_element_type=jnp.float32) + b0g_ref[g]
        hs.append(jnp.maximum(hg, 0.0))                             # (TN, GF) f32

    # --- Finger hidden layers: per-group block-diag matmuls on the MXU (bf16) -------
    for l in range(num_finger_hidden):
        for g in range(num_groups):
            hg = jnp.dot(hs[g].astype(jnp.bfloat16), wgd_ref[l, g],
                         preferred_element_type=jnp.float32) + bgd_ref[l, g]
            hs[g] = jnp.maximum(hg, 0.0)

    # --- Trunk input layer: sum of per-group partial products (no concatenate) ------
    acc = b_in_ref[...]                                             # (1, F) f32
    for g in range(num_groups):
        acc = acc + jnp.dot(hs[g].astype(jnp.bfloat16), w_in_ref[g],
                            preferred_element_type=jnp.float32)
    h = jnp.maximum(acc, 0.0)                                       # (TN, F) f32

    # --- Trunk hidden layers ---------------------------------------------------------
    for l in range(num_trunk_hidden):
        h = jnp.dot(h.astype(jnp.bfloat16), wh_ref[l],
                    preferred_element_type=jnp.float32) + bh_ref[l]
        h = jnp.maximum(h, 0.0)

    # --- Output layer (scaling folded, lane-dense store) ------------------------------
    out = jnp.dot(h.astype(jnp.bfloat16), w_out_ref[...],
                  preferred_element_type=jnp.float32) + b_out_ref[...]
    o_ref[...] = out.astype(o_ref.dtype)


# ---------------------------------------------------------------------------
# Host-side helpers
# ---------------------------------------------------------------------------
def _default_finger_group(input_size, num_features):
    """Pick a finger group size so one group's block fills the MXU tile."""
    try:
        kind = jax.devices()[0].device_kind.lower()
    except Exception:  # pragma: no cover
        kind = ""
    mxu = 128 if ("v5" in kind or "v4" in kind or "v3" in kind) else 256  # v6e/v7x: 256^2
    g = max(1, mxu // max(1, num_features))
    g = min(g, input_size)
    while input_size % g != 0:
        g -= 1
    return max(1, g)


def _nbytes(a):
    return int(np.prod(a.shape)) * jnp.dtype(a.dtype).itemsize


def prepare_fused_params(params, *, scaling=1.0, normalize=True, finger_group=None):
    """Fold normalization / layer-0 / grouped block-diag / scaling / lane padding
    into weights; cast the big matmul weights to bf16 (biases stay f32)."""
    (lb, ub, fw0, fb0, fw, fb, w_in, b_in, wh, bh, w_out, b_out) = params
    D, F = fw0.shape
    Lf_1 = fw.shape[1]     # finger hidden layers
    Lt_1 = wh.shape[0]     # trunk hidden layers (beyond the trunk input layer)
    O = w_out.shape[1]
    O_pad = max(128, ((O + 127) // 128) * 128)

    G = finger_group if finger_group is not None else _default_finger_group(D, F)
    assert D % G == 0, "finger group size must divide input_size"
    NG = D // G
    GF = G * F

    lb_np = np.asarray(lb, np.float32).reshape(D)
    ub_np = np.asarray(ub, np.float32).reshape(D)
    if normalize:
        a = 2.0 / (ub_np - lb_np)                    # x_norm = a*x + c, per column
        c = -2.0 * lb_np / (ub_np - lb_np) - 1.0
    else:
        a = np.ones((D,), np.float32)
        c = np.zeros((D,), np.float32)

    fw0_np = np.asarray(fw0, np.float32)
    fb0_np = np.asarray(fb0, np.float32)
    fw_np = np.asarray(fw, np.float32)
    fb_np = np.asarray(fb, np.float32)

    # Fused (normalize + finger layer-0), per group:
    #   h_g[:, j*F:(j+1)*F] = x[:, d] * (a[d]*fw0[d]) + (c[d]*fw0[d] + fb0[d]),  d = g*G + j
    w0g = np.zeros((NG, D, GF), np.float32)
    b0g = np.zeros((NG, 1, GF), np.float32)
    for g in range(NG):
        for j in range(G):
            d = g * G + j
            w0g[g, d, j * F:(j + 1) * F] = a[d] * fw0_np[d]
            b0g[g, 0, j * F:(j + 1) * F] = c[d] * fw0_np[d] + fb0_np[d]

    # Grouped block-diagonal finger hidden layers (stored as W^T), bf16.
    wgd = np.zeros((Lf_1, NG, GF, GF), np.float32)
    bgd = np.zeros((Lf_1, NG, 1, GF), np.float32)
    for l in range(Lf_1):
        for g in range(NG):
            for j in range(G):
                d = g * G + j
                wgd[l, g, j * F:(j + 1) * F, j * F:(j + 1) * F] = fw_np[d, l]
                bgd[l, g, 0, j * F:(j + 1) * F] = fb_np[d, l]

    # Trunk input weight split per group (concat order == finger order == group order).
    w_in_g = np.asarray(w_in, np.float32).reshape(NG, GF, F)

    # Output layer: fold scaling, pad to lane-dense width.
    w_out_p = np.zeros((F, O_pad), np.float32)
    w_out_p[:, :O] = scaling * np.asarray(w_out, np.float32)
    b_out_p = np.zeros((1, O_pad), np.float32)
    b_out_p[0, :O] = scaling * np.asarray(b_out, np.float32).reshape(O)

    return (
        jnp.asarray(w0g, jnp.float32),
        jnp.asarray(b0g, jnp.float32),
        jnp.asarray(wgd, jnp.bfloat16),
        jnp.asarray(bgd, jnp.float32),
        jnp.asarray(w_in_g, jnp.bfloat16),
        jnp.asarray(np.asarray(b_in, np.float32).reshape(1, F), jnp.float32),
        jnp.asarray(np.asarray(wh, np.float32), jnp.bfloat16),
        jnp.asarray(np.asarray(bh, np.float32).reshape(Lt_1, 1, F), jnp.float32),
        jnp.asarray(w_out_p, jnp.bfloat16),
        jnp.asarray(b_out_p, jnp.float32),
        O,
    )


# ---------------------------------------------------------------------------
# Wrapper: batch-tiled pallas_call with VMEM-resident weights.
# ---------------------------------------------------------------------------
def fingernet_forward(x, fused_params, *, tile_n=512, trim=True):
    (w0g, b0g, wgd, bgd, w_in_g, b_in, wh, bh, w_out_p, b_out_p, out_size) = fused_params
    n_batch, D = x.shape
    NG, _, GF = w0g.shape
    F = w_in_g.shape[2]
    O_pad = w_out_p.shape[1]
    Lf_1 = wgd.shape[0]
    Lt_1 = wh.shape[0]

    # Tile sizing: multiple of 8 (sublane); for small batches shrink so the
    # "parallel" grid has >= 2 steps (v7x has 2 TensorCores).  Sweep 512-1024 for
    # large batches.
    tile_n = max(8, (int(tile_n) // 8) * 8)
    if n_batch <= tile_n:
        half = ((pl.cdiv(n_batch, 2) + 7) // 8) * 8
        tile_n = max(8, min(tile_n, half))
    n_pad = pl.cdiv(n_batch, tile_n) * tile_n
    if n_pad != n_batch:
        x = jnp.pad(x, ((0, n_pad - n_batch), (0, 0)))

    def resident(arr):
        nd = arr.ndim
        return pl.BlockSpec(arr.shape, lambda i, _nd=nd: (0,) * _nd)

    kernel = functools.partial(
        _fingernet_kernel,
        num_groups=NG,
        num_finger_hidden=Lf_1,
        num_trunk_hidden=Lt_1,
    )

    operands = (x, w0g, b0g, wgd, bgd, w_in_g, b_in, wh, bh, w_out_p, b_out_p)
    in_specs = [pl.BlockSpec((tile_n, D), lambda i: (i, 0))] + [
        resident(a) for a in operands[1:]
    ]

    # Advisory cost estimate (real FLOPs after removing the block-diag redundancy).
    per_row_flops = (
        2 * D * (NG * GF)               # fused layer 0
        + Lf_1 * NG * 2 * GF * GF       # finger hidden layers
        + NG * 2 * GF * F               # trunk input layer
        + Lt_1 * 2 * F * F              # trunk hidden layers
        + 2 * F * O_pad                 # output layer
    )
    weight_bytes = sum(_nbytes(a) for a in operands[1:])
    cost = pl.CostEstimate(
        flops=int(per_row_flops) * int(n_pad),
        transcendentals=0,
        bytes_accessed=int(n_pad * D * 4 + n_pad * O_pad * 4 + weight_bytes),
    )

    # Explicit VMEM budgeting: only raise the scoped limit when the estimate needs it
    # (weights are double-buffered by the pipeline; activations are per-tile temporaries).
    vmem_est = (
        2 * weight_bytes
        + 2 * tile_n * (D + O_pad) * 4
        + 2 * tile_n * (NG * GF + F + O_pad) * 4
        + (4 << 20)
    )
    cp_kwargs = dict(dimension_semantics=("parallel",))
    if vmem_est > (24 << 20):
        cp_kwargs["vmem_limit_bytes"] = int(min(vmem_est, 112 << 20))

    out = pl.pallas_call(
        kernel,
        out_shape=jax.ShapeDtypeStruct((n_pad, O_pad), jnp.float32),
        grid=(n_pad // tile_n,),
        in_specs=in_specs,
        out_specs=pl.BlockSpec((tile_n, O_pad), lambda i: (i, 0)),
        compiler_params=pltpu.CompilerParams(**cp_kwargs),
        cost_estimate=cost,
    )(*operands)

    if not trim:
        # Consumers that can take the padded (n_pad, O_pad) slab avoid an extra XLA copy.
        return out
    return out[:n_batch, :out_size]


# ---------------------------------------------------------------------------
# Deterministic raw parameter construction (xavier-uniform weights, like __init__)
# ---------------------------------------------------------------------------
def make_params(key, input_size, num_features, num_finger_layers, num_layers,
                output_size, lb, ub):
    def xavier(k, fan_in, fan_out, shape):
        bound = float(np.sqrt(6.0 / (fan_in + fan_out)))
        return jax.random.uniform(k, shape, jnp.float32, -bound, bound)

    def torch_bias(k, fan_in, shape):
        bound = 1.0 / float(np.sqrt(fan_in))
        return jax.random.uniform(k, shape, jnp.float32, -bound, bound)

    keys = iter(jax.random.split(
        key, 4 * input_size * num_finger_layers + 4 * num_layers + 16))

    # Finger nets (biases keep the default torch init; only trunk biases are zeroed).
    fw0 = jnp.stack([xavier(next(keys), 1, num_features, (num_features,))
                     for _ in range(input_size)])                       # (D, F)
    fb0 = jnp.stack([torch_bias(next(keys), 1, (num_features,))
                     for _ in range(input_size)])                       # (D, F)
    fw = jnp.stack([
        jnp.stack([xavier(next(keys), num_features, num_features,
                          (num_features, num_features))                 # stored as W^T
                   for _ in range(num_finger_layers - 1)])
        for _ in range(input_size)])                                    # (D, Lf-1, F, F)
    fb = jnp.stack([
        jnp.stack([torch_bias(next(keys), num_features, (num_features,))
                   for _ in range(num_finger_layers - 1)])
        for _ in range(input_size)])                                    # (D, Lf-1, F)

    # Trunk: input layer, hidden layers, output layer (biases zero, like init_layers).
    w_in = xavier(next(keys), input_size * num_features, num_features,
                  (input_size * num_features, num_features))            # (D*F, F)  (W^T)
    b_in = jnp.zeros((1, num_features), jnp.float32)
    wh = jnp.stack([xavier(next(keys), num_features, num_features,
                           (num_features, num_features))
                    for _ in range(num_layers - 1)])                    # (Lt-1, F, F)
    bh = jnp.zeros((num_layers - 1, num_features), jnp.float32)
    w_out = xavier(next(keys), num_features, output_size,
                   (num_features, output_size))                         # (F, O)
    b_out = jnp.zeros((1, output_size), jnp.float32)

    lb = jnp.asarray(lb, jnp.float32).reshape(1, input_size)
    ub = jnp.asarray(ub, jnp.float32).reshape(1, input_size)
    return (lb, ub, fw0, fb0, fw, fb, w_in, b_in, wh, bh, w_out, b_out)


# ---------------------------------------------------------------------------
# Pure-JAX reference (mirrors the PyTorch forward, unfused, f32) for verification
# ---------------------------------------------------------------------------
def fingernet_reference(x, params, *, scaling=1.0, normalize=True):
    (lb, ub, fw0, fb0, fw, fb, w_in, b_in, wh, bh, w_out, b_out) = params
    if normalize:
        x = 2.0 * (x - lb) / (ub - lb) - 1.0
    outs = []
    D = x.shape[1]
    for d in range(D):
        y = x[:, d:d + 1] * fw0[d] + fb0[d]
        y = jnp.maximum(y, 0.0)
        for l in range(fw.shape[1]):
            y = jnp.maximum(y @ fw[d, l] + fb[d, l], 0.0)
        outs.append(y)
    h = jnp.concatenate(outs, axis=1)
    h = jnp.maximum(h @ w_in + b_in, 0.0)
    for l in range(wh.shape[0]):
        h = jnp.maximum(h @ wh[l] + bh[l], 0.0)
    return scaling * (h @ w_out + b_out)


# ---------------------------------------------------------------------------
if __name__ == "__main__":
    # Small, TPU-friendly shapes consistent with the module's forward:
    #   batch=200 (exercises tail padding + a 2-step grid), input_size=4,
    #   numFeatures=128, num_finger_layers=3, numLayers=4, outputSize=2, scaling=1.5.
    batch = 200
    input_size = 4
    num_features = 128
    num_finger_layers = 3
    num_layers = 4
    output_size = 2
    scaling = 1.5
    normalize = True

    key = jax.random.PRNGKey(0)
    k_params, k_x = jax.random.split(key)

    lb = -1.0 * np.ones((input_size,), np.float32)
    ub = 2.0 * np.ones((input_size,), np.float32)

    raw_params = make_params(k_params, input_size, num_features, num_finger_layers,
                             num_layers, output_size, lb, ub)
    fused_params = prepare_fused_params(raw_params, scaling=scaling, normalize=normalize)

    x = jax.random.uniform(k_x, (batch, input_size), jnp.float32,
                           minval=-1.0, maxval=2.0)

    out = fingernet_forward(x, fused_params)          # tile_n auto-shrinks -> 2 grid steps
    out = jax.block_until_ready(out)

    ref = fingernet_reference(x, raw_params, scaling=scaling, normalize=normalize)
    out_np = np.asarray(out)
    ref_np = np.asarray(ref)
    assert out_np.shape == ref_np.shape
    # bf16 MXU operands (f32 accumulation) -> looser tolerance than the pure-f32 path.
    rel_err = np.max(np.abs(out_np - ref_np)) / max(float(np.max(np.abs(ref_np))), 1e-6)
    assert np.isfinite(out_np).all()
    assert rel_err < 5e-2, f"max relative error {rel_err}"

    print("KERNEL_OK")
</pallas_src>

<mosaic_0001>
module attributes {stable_mosaic.version = 11 : i64} {
  func.func @_fingernet_kernel(%arg0: i32, %arg1: memref<104x4xf32, #tpu.memory_space<vmem>>, %arg2: memref<2x4x256xf32, #tpu.memory_space<vmem>>, %arg3: memref<2x1x256xf32, #tpu.memory_space<vmem>>, %arg4: memref<2x2x256x256xbf16, #tpu.memory_space<vmem>>, %arg5: memref<2x2x1x256xf32, #tpu.memory_space<vmem>>, %arg6: memref<2x256x128xbf16, #tpu.memory_space<vmem>>, %arg7: memref<1x128xf32, #tpu.memory_space<vmem>>, %arg8: memref<3x128x128xbf16, #tpu.memory_space<vmem>>, %arg9: memref<3x1x128xf32, #tpu.memory_space<vmem>>, %arg10: memref<128x128xbf16, #tpu.memory_space<vmem>>, %arg11: memref<1x128xf32, #tpu.memory_space<vmem>>, %arg12: memref<104x128xf32, #tpu.memory_space<vmem>>) attributes {dimension_semantics = [#tpu.dimension_semantics<parallel>], iteration_bounds = array<i64: 2>, scalar_prefetch = 0 : i64, scratch_operands = 0 : i64, tpu.core_type = #tpu.core_type<tc>, window_params = [{transform_indices = @transform_0, window_bounds = array<i64: 104, 4>}, {pipeline_mode = #tpu.pipeline_mode<synchronous>, transform_indices = @transform_1, window_bounds = array<i64: 2, 4, 256>}, {pipeline_mode = #tpu.pipeline_mode<synchronous>, transform_indices = @transform_2, window_bounds = array<i64: 2, 1, 256>}, {pipeline_mode = #tpu.pipeline_mode<synchronous>, transform_indices = @transform_3, window_bounds = array<i64: 2, 2, 256, 256>}, {pipeline_mode = #tpu.pipeline_mode<synchronous>, transform_indices = @transform_4, window_bounds = array<i64: 2, 2, 1, 256>}, {pipeline_mode = #tpu.pipeline_mode<synchronous>, transform_indices = @transform_5, window_bounds = array<i64: 2, 256, 128>}, {pipeline_mode = #tpu.pipeline_mode<synchronous>, transform_indices = @transform_6, window_bounds = array<i64: 1, 128>}, {pipeline_mode = #tpu.pipeline_mode<synchronous>, transform_indices = @transform_7, window_bounds = array<i64: 3, 128, 128>}, {pipeline_mode = #tpu.pipeline_mode<synchronous>, transform_indices = @transform_8, window_bounds = array<i64: 3, 1, 128>}, {pipeline_mode = #tpu.pipeline_mode<synchronous>, transform_indices = @transform_9, window_bounds = array<i64: 128, 128>}, {pipeline_mode = #tpu.pipeline_mode<synchronous>, transform_indices = @transform_10, window_bounds = array<i64: 1, 128>}, {transform_indices = @transform_11, window_bounds = array<i64: 104, 128>}]} {
    %c0 = arith.constant 0 : index
    %c0_0 = arith.constant 0 : index
    %0 = vector.load %arg1[%c0, %c0_0] : memref<104x4xf32, #tpu.memory_space<vmem>>, vector<104x4xf32>
    %c0_1 = arith.constant 0 : index
    %c0_2 = arith.constant 0 : index
    %c0_3 = arith.constant 0 : index
    %1 = vector.load %arg2[%c0_1, %c0_2, %c0_3] : memref<2x4x256xf32, #tpu.memory_space<vmem>>, vector<1x4x256xf32>
    %2 = vector.shape_cast %1 : vector<1x4x256xf32> to vector<4x256xf32>
    %cst = arith.constant dense<0.000000e+00> : vector<104x256xf32>
    %3 = tpu.matmul %0, %2, %cst {dimension_numbers = #tpu.dot_dimension_numbers<[1], [0], [0], [1], [0, 0, 1, 1], [], []>} : vector<104x4xf32>, vector<4x256xf32>, vector<104x256xf32> -> vector<104x256xf32>
    %c0_4 = arith.constant 0 : index
    %c0_5 = arith.constant 0 : index
    %c0_6 = arith.constant 0 : index
    %4 = vector.load %arg3[%c0_4, %c0_5, %c0_6] : memref<2x1x256xf32, #tpu.memory_space<vmem>>, vector<1x1x256xf32>
    %5 = vector.shape_cast %4 : vector<1x1x256xf32> to vector<1x256xf32>
    %6 = vector.broadcast %5 : vector<1x256xf32> to vector<104x256xf32>
    %7 = arith.addf %3, %6 : vector<104x256xf32>
    %cst_7 = arith.constant 0.000000e+00 : f32
    %8 = vector.broadcast %cst_7 : f32 to vector<104x256xf32>
    %9 = arith.maximumf %7, %8 : vector<104x256xf32>
    %c1 = arith.constant 1 : index
    %c0_8 = arith.constant 0 : index
    %c0_9 = arith.constant 0 : index
    %10 = vector.load %arg2[%c1, %c0_8, %c0_9] : memref<2x4x256xf32, #tpu.memory_space<vmem>>, vector<1x4x256xf32>
    %11 = vector.shape_cast %10 : vector<1x4x256xf32> to vector<4x256xf32>
    %cst_10 = arith.constant dense<0.000000e+00> : vector<104x256xf32>
    %12 = tpu.matmul %0, %11, %cst_10 {dimension_numbers = #tpu.dot_dimension_numbers<[1], [0], [0], [1], [0, 0, 1, 1], [], []>} : vector<104x4xf32>, vector<4x256xf32>, vector<104x256xf32> -> vector<104x256xf32>
    %c1_11 = arith.constant 1 : index
    %c0_12 = arith.constant 0 : index
    %c0_13 = arith.constant 0 : index
    %13 = vector.load %arg3[%c1_11, %c0_12, %c0_13] : memref<2x1x256xf32, #tpu.memory_space<vmem>>, vector<1x1x256xf32>
    %14 = vector.shape_cast %13 : vector<1x1x256xf32> to vector<1x256xf32>
    %15 = vector.broadcast %14 : vector<1x256xf32> to vector<104x256xf32>
    %16 = arith.addf %12, %15 : vector<104x256xf32>
    %cst_14 = arith.constant 0.000000e+00 : f32
    %17 = vector.broadcast %cst_14 : f32 to vector<104x256xf32>
    %18 = arith.maximumf %16, %17 : vector<104x256xf32>
    %19 = arith.truncf %9 : vector<104x256xf32> to vector<104x256xbf16>
    %c0_15 = arith.constant 0 : index
    %c0_16 = arith.constant 0 : index
    %c0_17 = arith.constant 0 : index
    %c0_18 = arith.constant 0 : index
    %20 = vector.load %arg4[%c0_15, %c0_16, %c0_17, %c0_18] : memref<2x2x256x256xbf16, #tpu.memory_space<vmem>>, vector<1x1x256x256xbf16>
    %21 = vector.shape_cast %20 : vector<1x1x256x256xbf16> to vector<256x256xbf16>
    %cst_19 = arith.constant dense<0.000000e+00> : vector<104x256xf32>
    %22 = tpu.matmul %19, %21, %cst_19 {dimension_numbers = #tpu.dot_dimension_numbers<[1], [0], [0], [1], [0, 0, 1, 1], [], []>} : vector<104x256xbf16>, vector<256x256xbf16>, vector<104x256xf32> -> vector<104x256xf32>
    %c0_20 = arith.constant 0 : index
    %c0_21 = arith.constant 0 : index
    %c0_22 = arith.constant 0 : index
    %c0_23 = arith.constant 0 : index
    %23 = vector.load %arg5[%c0_20, %c0_21, %c0_22, %c0_23] : memref<2x2x1x256xf32, #tpu.memory_space<vmem>>, vector<1x1x1x256xf32>
    %24 = vector.shape_cast %23 : vector<1x1x1x256xf32> to vector<1x256xf32>
    %25 = vector.broadcast %24 : vector<1x256xf32> to vector<104x256xf32>
    %26 = arith.addf %22, %25 : vector<104x256xf32>
    %cst_24 = arith.constant 0.000000e+00 : f32
    %27 = vector.broadcast %cst_24 : f32 to vector<104x256xf32>
    %28 = arith.maximumf %26, %27 : vector<104x256xf32>
    %29 = arith.truncf %18 : vector<104x256xf32> to vector<104x256xbf16>
    %c0_25 = arith.constant 0 : index
    %c1_26 = arith.constant 1 : index
    %c0_27 = arith.constant 0 : index
    %c0_28 = arith.constant 0 : index
    %30 = vector.load %arg4[%c0_25, %c1_26, %c0_27, %c0_28] : memref<2x2x256x256xbf16, #tpu.memory_space<vmem>>, vector<1x1x256x256xbf16>
    %31 = vector.shape_cast %30 : vector<1x1x256x256xbf16> to vector<256x256xbf16>
    %cst_29 = arith.constant dense<0.000000e+00> : vector<104x256xf32>
    %32 = tpu.matmul %29, %31, %cst_29 {dimension_numbers = #tpu.dot_dimension_numbers<[1], [0], [0], [1], [0, 0, 1, 1], [], []>} : vector<104x256xbf16>, vector<256x256xbf16>, vector<104x256xf32> -> vector<104x256xf32>
    %c0_30 = arith.constant 0 : index
    %c1_31 = arith.constant 1 : index
    %c0_32 = arith.constant 0 : index
    %c0_33 = arith.constant 0 : index
    %33 = vector.load %arg5[%c0_30, %c1_31, %c0_32, %c0_33] : memref<2x2x1x256xf32, #tpu.memory_space<vmem>>, vector<1x1x1x256xf32>
    %34 = vector.shape_cast %33 : vector<1x1x1x256xf32> to vector<1x256xf32>
    %35 = vector.broadcast %34 : vector<1x256xf32> to vector<104x256xf32>
    %36 = arith.addf %32, %35 : vector<104x256xf32>
    %cst_34 = arith.constant 0.000000e+00 : f32
    %37 = vector.broadcast %cst_34 : f32 to vector<104x256xf32>
    %38 = arith.maximumf %36, %37 : vector<104x256xf32>
    %39 = arith.truncf %28 : vector<104x256xf32> to vector<104x256xbf16>
    %c1_35 = arith.constant 1 : index
    %c0_36 = arith.constant 0 : index
    %c0_37 = arith.constant 0 : index
    %c0_38 = arith.constant 0 : index
    %40 = vector.load %arg4[%c1_35, %c0_36, %c0_37, %c0_38] : memref<2x2x256x256xbf16, #tpu.memory_space<vmem>>, vector<1x1x256x256xbf16>
    %41 = vector.shape_cast %40 : vector<1x1x256x256xbf16> to vector<256x256xbf16>
    %cst_39 = arith.constant dense<0.000000e+00> : vector<104x256xf32>
    %42 = tpu.matmul %39, %41, %cst_39 {dimension_numbers = #tpu.dot_dimension_numbers<[1], [0], [0], [1], [0, 0, 1, 1], [], []>} : vector<104x256xbf16>, vector<256x256xbf16>, vector<104x256xf32> -> vector<104x256xf32>
    %c1_40 = arith.constant 1 : index
    %c0_41 = arith.constant 0 : index
    %c0_42 = arith.constant 0 : index
    %c0_43 = arith.constant 0 : index
    %43 = vector.load %arg5[%c1_40, %c0_41, %c0_42, %c0_43] : memref<2x2x1x256xf32, #tpu.memory_space<vmem>>, vector<1x1x1x256xf32>
    %44 = vector.shape_cast %43 : vector<1x1x1x256xf32> to vector<1x256xf32>
    %45 = vector.broadcast %44 : vector<1x256xf32> to vector<104x256xf32>
    %46 = arith.addf %42, %45 : vector<104x256xf32>
    %cst_44 = arith.constant 0.000000e+00 : f32
    %47 = vector.broadcast %cst_44 : f32 to vector<104x256xf32>
    %48 = arith.maximumf %46, %47 : vector<104x256xf32>
    %49 = arith.truncf %38 : vector<104x256xf32> to vector<104x256xbf16>
    %c1_45 = arith.constant 1 : index
    %c1_46 = arith.constant 1 : index
    %c0_47 = arith.constant 0 : index
    %c0_48 = arith.constant 0 : index
    %50 = vector.load %arg4[%c1_45, %c1_46, %c0_47, %c0_48] : memref<2x2x256x256xbf16, #tpu.memory_space<vmem>>, vector<1x1x256x256xbf16>
    %51 = vector.shape_cast %50 : vector<1x1x256x256xbf16> to vector<256x256xbf16>
    %cst_49 = arith.constant dense<0.000000e+00> : vector<104x256xf32>
    %52 = tpu.matmul %49, %51, %cst_49 {dimension_numbers = #tpu.dot_dimension_numbers<[1], [0], [0], [1], [0, 0, 1, 1], [], []>} : vector<104x256xbf16>, vector<256x256xbf16>, vector<104x256xf32> -> vector<104x256xf32>
    %c1_50 = arith.constant 1 : index
    %c1_51 = arith.constant 1 : index
    %c0_52 = arith.constant 0 : index
    %c0_53 = arith.constant 0 : index
    %53 = vector.load %arg5[%c1_50, %c1_51, %c0_52, %c0_53] : memref<2x2x1x256xf32, #tpu.memory_space<vmem>>, vector<1x1x1x256xf32>
    %54 = vector.shape_cast %53 : vector<1x1x1x256xf32> to vector<1x256xf32>
    %55 = vector.broadcast %54 : vector<1x256xf32> to vector<104x256xf32>
    %56 = arith.addf %52, %55 : vector<104x256xf32>
    %cst_54 = arith.constant 0.000000e+00 : f32
    %57 = vector.broadcast %cst_54 : f32 to vector<104x256xf32>
    %58 = arith.maximumf %56, %57 : vector<104x256xf32>
    %c0_55 = arith.constant 0 : index
    %c0_56 = arith.constant 0 : index
    %59 = vector.load %arg7[%c0_55, %c0_56] : memref<1x128xf32, #tpu.memory_space<vmem>>, vector<1x128xf32>
    %60 = arith.truncf %48 : vector<104x256xf32> to vector<104x256xbf16>
    %c0_57 = arith.constant 0 : index
    %c0_58 = arith.constant 0 : index
    %c0_59 = arith.constant 0 : index
    %61 = vector.load %arg6[%c0_57, %c0_58, %c0_59] : memref<2x256x128xbf16, #tpu.memory_space<vmem>>, vector<1x256x128xbf16>
    %62 = vector.shape_cast %61 : vector<1x256x128xbf16> to vector<256x128xbf16>
    %cst_60 = arith.constant dense<0.000000e+00> : vector<104x128xf32>
    %63 = tpu.matmul %60, %62, %cst_60 {dimension_numbers = #tpu.dot_dimension_numbers<[1], [0], [0], [1], [0, 0, 1, 1], [], []>} : vector<104x256xbf16>, vector<256x128xbf16>, vector<104x128xf32> -> vector<104x128xf32>
    %64 = vector.broadcast %59 : vector<1x128xf32> to vector<104x128xf32>
    %65 = arith.addf %64, %63 : vector<104x128xf32>
    %66 = arith.truncf %58 : vector<104x256xf32> to vector<104x256xbf16>
    %c1_61 = arith.constant 1 : index
    %c0_62 = arith.constant 0 : index
    %c0_63 = arith.constant 0 : index
    %67 = vector.load %arg6[%c1_61, %c0_62, %c0_63] : memref<2x256x128xbf16, #tpu.memory_space<vmem>>, vector<1x256x128xbf16>
    %68 = vector.shape_cast %67 : vector<1x256x128xbf16> to vector<256x128xbf16>
    %cst_64 = arith.constant dense<0.000000e+00> : vector<104x128xf32>
    %69 = tpu.matmul %66, %68, %cst_64 {dimension_numbers = #tpu.dot_dimension_numbers<[1], [0], [0], [1], [0, 0, 1, 1], [], []>} : vector<104x256xbf16>, vector<256x128xbf16>, vector<104x128xf32> -> vector<104x128xf32>
    %70 = arith.addf %65, %69 : vector<104x128xf32>
    %cst_65 = arith.constant 0.000000e+00 : f32
    %71 = vector.broadcast %cst_65 : f32 to vector<104x128xf32>
    %72 = arith.maximumf %70, %71 : vector<104x128xf32>
    %73 = arith.truncf %72 : vector<104x128xf32> to vector<104x128xbf16>
    %c0_66 = arith.constant 0 : index
    %c0_67 = arith.constant 0 : index
    %c0_68 = arith.constant 0 : index
    %74 = vector.load %arg8[%c0_66, %c0_67, %c0_68] : memref<3x128x128xbf16, #tpu.memory_space<vmem>>, vector<1x128x128xbf16>
    %75 = vector.shape_cast %74 : vector<1x128x128xbf16> to vector<128x128xbf16>
    %cst_69 = arith.constant dense<0.000000e+00> : vector<104x128xf32>
    %76 = tpu.matmul %73, %75, %cst_69 {dimension_numbers = #tpu.dot_dimension_numbers<[1], [0], [0], [1], [0, 0, 1, 1], [], []>} : vector<104x128xbf16>, vector<128x128xbf16>, vector<104x128xf32> -> vector<104x128xf32>
    %c0_70 = arith.constant 0 : index
    %c0_71 = arith.constant 0 : index
    %c0_72 = arith.constant 0 : index
    %77 = vector.load %arg9[%c0_70, %c0_71, %c0_72] : memref<3x1x128xf32, #tpu.memory_space<vmem>>, vector<1x1x128xf32>
    %78 = vector.shape_cast %77 : vector<1x1x128xf32> to vector<1x128xf32>
    %79 = vector.broadcast %78 : vector<1x128xf32> to vector<104x128xf32>
    %80 = arith.addf %76, %79 : vector<104x128xf32>
    %cst_73 = arith.constant 0.000000e+00 : f32
    %81 = vector.broadcast %cst_73 : f32 to vector<104x128xf32>
    %82 = arith.maximumf %80, %81 : vector<104x128xf32>
    %83 = arith.truncf %82 : vector<104x128xf32> to vector<104x128xbf16>
    %c1_74 = arith.constant 1 : index
    %c0_75 = arith.constant 0 : index
    %c0_76 = arith.constant 0 : index
    %84 = vector.load %arg8[%c1_74, %c0_75, %c0_76] : memref<3x128x128xbf16, #tpu.memory_space<vmem>>, vector<1x128x128xbf16>
    %85 = vector.shape_cast %84 : vector<1x128x128xbf16> to vector<128x128xbf16>
    %cst_77 = arith.constant dense<0.000000e+00> : vector<104x128xf32>
    %86 = tpu.matmul %83, %85, %cst_77 {dimension_numbers = #tpu.dot_dimension_numbers<[1], [0], [0], [1], [0, 0, 1, 1], [], []>} : vector<104x128xbf16>, vector<128x128xbf16>, vector<104x128xf32> -> vector<104x128xf32>
    %c1_78 = arith.constant 1 : index
    %c0_79 = arith.constant 0 : index
    %c0_80 = arith.constant 0 : index
    %87 = vector.load %arg9[%c1_78, %c0_79, %c0_80] : memref<3x1x128xf32, #tpu.memory_space<vmem>>, vector<1x1x128xf32>
    %88 = vector.shape_cast %87 : vector<1x1x128xf32> to vector<1x128xf32>
    %89 = vector.broadcast %88 : vector<1x128xf32> to vector<104x128xf32>
    %90 = arith.addf %86, %89 : vector<104x128xf32>
    %cst_81 = arith.constant 0.000000e+00 : f32
    %91 = vector.broadcast %cst_81 : f32 to vector<104x128xf32>
    %92 = arith.maximumf %90, %91 : vector<104x128xf32>
    %93 = arith.truncf %92 : vector<104x128xf32> to vector<104x128xbf16>
    %c2 = arith.constant 2 : index
    %c0_82 = arith.constant 0 : index
    %c0_83 = arith.constant 0 : index
    %94 = vector.load %arg8[%c2, %c0_82, %c0_83] : memref<3x128x128xbf16, #tpu.memory_space<vmem>>, vector<1x128x128xbf16>
    %95 = vector.shape_cast %94 : vector<1x128x128xbf16> to vector<128x128xbf16>
    %cst_84 = arith.constant dense<0.000000e+00> : vector<104x128xf32>
    %96 = tpu.matmul %93, %95, %cst_84 {dimension_numbers = #tpu.dot_dimension_numbers<[1], [0], [0], [1], [0, 0, 1, 1], [], []>} : vector<104x128xbf16>, vector<128x128xbf16>, vector<104x128xf32> -> vector<104x128xf32>
    %c2_85 = arith.constant 2 : index
    %c0_86 = arith.constant 0 : index
    %c0_87 = arith.constant 0 : index
    %97 = vector.load %arg9[%c2_85, %c0_86, %c0_87] : memref<3x1x128xf32, #tpu.memory_space<vmem>>, vector<1x1x128xf32>
    %98 = vector.shape_cast %97 : vector<1x1x128xf32> to vector<1x128xf32>
    %99 = vector.broadcast %98 : vector<1x128xf32> to vector<104x128xf32>
    %100 = arith.addf %96, %99 : vector<104x128xf32>
    %cst_88 = arith.constant 0.000000e+00 : f32
    %101 = vector.broadcast %cst_88 : f32 to vector<104x128xf32>
    %102 = arith.maximumf %100, %101 : vector<104x128xf32>
    %103 = arith.truncf %102 : vector<104x128xf32> to vector<104x128xbf16>
    %c0_89 = arith.constant 0 : index
    %c0_90 = arith.constant 0 : index
    %104 = vector.load %arg10[%c0_89, %c0_90] : memref<128x128xbf16, #tpu.memory_space<vmem>>, vector<128x128xbf16>
    %cst_91 = arith.constant dense<0.000000e+00> : vector<104x128xf32>
    %105 = tpu.matmul %103, %104, %cst_91 {dimension_numbers = #tpu.dot_dimension_numbers<[1], [0], [0], [1], [0, 0, 1, 1], [], []>} : vector<104x128xbf16>, vector<128x128xbf16>, vector<104x128xf32> -> vector<104x128xf32>
    %c0_92 = arith.constant 0 : index
    %c0_93 = arith.constant 0 : index
    %106 = vector.load %arg11[%c0_92, %c0_93] : memref<1x128xf32, #tpu.memory_space<vmem>>, vector<1x128xf32>
    %107 = vector.broadcast %106 : vector<1x128xf32> to vector<104x128xf32>
    %108 = arith.addf %105, %107 : vector<104x128xf32>
    %c0_94 = arith.constant 0 : index
    %c0_95 = arith.constant 0 : index
    %109 = vector.load %arg12[%c0_94, %c0_95] : memref<104x128xf32, #tpu.memory_space<vmem>>, vector<104x128xf32>
    tpu.vector_store %arg12[%c0_94, %c0_95], %108 {strides = array<i32>} : memref<104x128xf32, #tpu.memory_space<vmem>>, vector<104x128xf32>,
    return
  }
  func.func @transform_0(%arg0: i32) -> (i32, i32) {
    %c0_i32 = arith.constant 0 : i32
    %c0_i32_0 = arith.constant 0 : i32
    return %arg0, %c0_i32 : i32, i32
  }
  func.func @transform_1(%arg0: i32) -> (i32, i32, i32) {
    %c0_i32 = arith.constant 0 : i32
    %c0_i32_0 = arith.constant 0 : i32
    %c0_i32_1 = arith.constant 0 : i32
    %c0_i32_2 = arith.constant 0 : i32
    return %c0_i32, %c0_i32_0, %c0_i32_1 : i32, i32, i32
  }
  func.func @transform_2(%arg0: i32) -> (i32, i32, i32) {
    %c0_i32 = arith.constant 0 : i32
    %c0_i32_0 = arith.constant 0 : i32
    %c0_i32_1 = arith.constant 0 : i32
    %c0_i32_2 = arith.constant 0 : i32
    return %c0_i32, %c0_i32_0, %c0_i32_1 : i32, i32, i32
  }
  func.func @transform_3(%arg0: i32) -> (i32, i32, i32, i32) {
    %c0_i32 = arith.constant 0 : i32
    %c0_i32_0 = arith.constant 0 : i32
    %c0_i32_1 = arith.constant 0 : i32
    %c0_i32_2 = arith.constant 0 : i32
    %c0_i32_3 = arith.constant 0 : i32
    return %c0_i32, %c0_i32_0, %c0_i32_1, %c0_i32_2 : i32, i32, i32, i32
  }
  func.func @transform_4(%arg0: i32) -> (i32, i32, i32, i32) {
    %c0_i32 = arith.constant 0 : i32
    %c0_i32_0 = arith.constant 0 : i32
    %c0_i32_1 = arith.constant 0 : i32
    %c0_i32_2 = arith.constant 0 : i32
    %c0_i32_3 = arith.constant 0 : i32
    return %c0_i32, %c0_i32_0, %c0_i32_1, %c0_i32_2 : i32, i32, i32, i32
  }
  func.func @transform_5(%arg0: i32) -> (i32, i32, i32) {
    %c0_i32 = arith.constant 0 : i32
    %c0_i32_0 = arith.constant 0 : i32
    %c0_i32_1 = arith.constant 0 : i32
    %c0_i32_2 = arith.constant 0 : i32
    return %c0_i32, %c0_i32_0, %c0_i32_1 : i32, i32, i32
  }
  func.func @transform_6(%arg0: i32) -> (i32, i32) {
    %c0_i32 = arith.constant 0 : i32
    %c0_i32_0 = arith.constant 0 : i32
    %c0_i32_1 = arith.constant 0 : i32
    return %c0_i32, %c0_i32_0 : i32, i32
  }
  func.func @transform_7(%arg0: i32) -> (i32, i32, i32) {
    %c0_i32 = arith.constant 0 : i32
    %c0_i32_0 = arith.constant 0 : i32
    %c0_i32_1 = arith.constant 0 : i32
    %c0_i32_2 = arith.constant 0 : i32
    return %c0_i32, %c0_i32_0, %c0_i32_1 : i32, i32, i32
  }
  func.func @transform_8(%arg0: i32) -> (i32, i32, i32) {
    %c0_i32 = arith.constant 0 : i32
    %c0_i32_0 = arith.constant 0 : i32
    %c0_i32_1 = arith.constant 0 : i32
    %c0_i32_2 = arith.constant 0 : i32
    return %c0_i32, %c0_i32_0, %c0_i32_1 : i32, i32, i32
  }
  func.func @transform_9(%arg0: i32) -> (i32, i32) {
    %c0_i32 = arith.constant 0 : i32
    %c0_i32_0 = arith.constant 0 : i32
    %c0_i32_1 = arith.constant 0 : i32
    return %c0_i32, %c0_i32_0 : i32, i32
  }
  func.func @transform_10(%arg0: i32) -> (i32, i32) {
    %c0_i32 = arith.constant 0 : i32
    %c0_i32_0 = arith.constant 0 : i32
    %c0_i32_1 = arith.constant 0 : i32
    return %c0_i32, %c0_i32_0 : i32, i32
  }
  func.func @transform_11(%arg0: i32) -> (i32, i32) {
    %c0_i32 = arith.constant 0 : i32
    %c0_i32_0 = arith.constant 0 : i32
    return %arg0, %c0_i32 : i32, i32
  }
}

</mosaic_0001>

<bundles_post_ra>
// kernel: tpu_custom_call.1
= control target key start
LH: loop header
LB: loop body
LE: loop exit
PB: predicated region body
PF: predicated region fallthrough
CT: control target
= control target key end

     0   :  { %s5523_s0 = inlined_call_operand.vmem [shape: f32[208,4], index: 0, kind: input, shape index: {}]   ;;  %s5524_s1 = inlined_call_operand.vmem [shape: f32[2,4,256], index: 1, kind: input, shape index: {}]   ;;  %s5525_s2 = inlined_call_operand.vmem [shape: f32[2,1,256], index: 2, kind: input, shape index: {}]   ;;  %s5526_s3 = inlined_call_operand.hbm [shape: bf16[2,2,256,256], index: 3, kind: input, shape index: {}]   ;;  %s5527_s4 = inlined_call_operand.vmem [shape: f32[2,2,1,256], index: 4, kind: input, shape index: {}]   ;;  %s5528_s5 = inlined_call_operand.hbm [shape: bf16[2,256,128], index: 5, kind: input, shape index: {}]   ;;  %s5529_s6 = inlined_call_operand.vmem [shape: f32[1,128], index: 6, kind: input, shape index: {}]   ;;  %s5530_s7 = inlined_call_operand.vmem [shape: bf16[3,128,128], index: 7, kind: input, shape index: {}]   ;;  %s5531_s8 = inlined_call_operand.vmem [shape: f32[3,1,128], index: 8, kind: input, shape index: {}]   ;;  %s5532_s9 = inlined_call_operand.hbm [shape: bf16[128,128], index: 9, kind: input, shape index: {}]   ;;  %s5533_s10 = inlined_call_operand.vmem [shape: f32[1,128], index: 10, kind: input, shape index: {}]   ;;  %s5534_s11 = inlined_call_operand.hbm [shape: f32[208,128], index: 11, kind: output, shape index: {}]  }
   0x1   :  { %5546 = sst [smem:[#allocation18_spill]] %s5528_s5 }
   0x2   :  { %16 = vsyncpa [#allocation3], 0 }
   0x3   :  { %17 = vsyncpa [#allocation6], 0 }
   0x4   :  { %18 = vsyncpa [#allocation4], 0 }
   0x5   :  { %20 = vsyncpa [#allocation4 + $0x1], 0  ;;  %s4783_s17 = smov 0   ;;  %s4785_s18 = smov 0  }
   0x6   :  { %s4787_s19 = smov 0   ;;  %s4789_s20 = smov 0  }
   0x7 LB: > { %5547 = sst [smem:[#allocation12_spill]] %s4697_s17  ;;  %s4804_s21 = sadd.s32 4294967295, %s4709_s20   ;;  %s4709_s20 = sphi %s4789_s20, %s5571_s20   ;;  %s4705_s19 = sphi %s4787_s19, %s5573_s19   ;;  %s4701_s18 = sphi %s4785_s18, %s5575_s18   ;;  %s4697_s17 = sphi %s4783_s17, %s5574_s17  }
   0x8   : > { %5548 = sst [smem:[#allocation13_spill]] %s4705_s19  ;;  %s3585_s22 = sadd.s32 4294967294, %s4709_s20  }
   0x9   : > { %5549 = sst [smem:[#allocation14_spill]] %s4709_s20  ;;  %s4808_s23 = sadd.s32 1, %s4709_s20  }
   0xa   : > { %5550 = sst [smem:[#allocation15_spill]] %s4808_s23  ;;  %s269_s24 = sadd.s32 1, %s4705_s19 }
   0xb   : > { %s266_s25 = ssub.s32 %s4709_s20, %s4808_s23  ;;  %p279_p0 = scmp.ne.s32.totalorder %s4705_s19, %s4701_s18 }
   0xc   : > { %p267_p1 = scmp.eq.s32.totalorder %s266_s25, 0  ;;  %p280_p2 = scmp.eq.s32.totalorder %s4804_s21, 1 }
   0xd   : > { %p285_p3 = scmp.ne.s32.totalorder %s4701_s18, %s4697_s17  ;;  %p286_p4 = scmp.eq.s32.totalorder %s3585_s22, 1 }
   0xe   : > { %s4819_s26 = scalar_select %p267_p1, %s4705_s19, %s269_s24  }
   0xf   : > { %p4821_p5 = por %p280_p2, %p279_p0  ;;  %p4825_p6 = por %p286_p4, %p285_p3 }
  0x10   : > { %5551 = sst [smem:[#allocation16_spill]] %s4819_s26  ;;  %p3586_p7 = scmp.ge.s32.totalorder %s4709_s20, 1 }
  0x11   : > { %s5552_s27 = scalar_select %p4821_p5, 1, 0 }
  0x12   : > { %s5553_s28 = scalar_select %p4825_p6, 1, 0 }
  0x13   : > { %p293_p8 = scmp.lt.s32.totalorder %s4709_s20, 3  ;;  %p5536_p9 = scmp.eq.s32.totalorder %s4804_s21, 0 }
  0x14   : > { %5554 = sst [smem:[#allocation17_spill]] %s5553_s28  ;;  %s4711_s30 = smov [#allocation5]  }
  0x15   : > { %p4832_p10 = pnand %p3586_p7, %p293_p8  ;;  %s327_s12 = sshll.u32 %s4711_s30, 4  ;;  %s328_s12 = int_to_ptr.vmem [resolvable:$true] %s327_s12 }
  0x16   : > { %s4712_s14 = smov [#allocation2]   ;;  %s5557_s5 = sld [smem:[#allocation18_spill]] }
  0x17   : > { %s5555_s29 = scalar_select %p4832_p10, 1, 0 }
  0x18   : > { %p4233_p11 = pneg %p4832_p10  ;;  %s311_s15 = sshll.u32 %s4712_s14, 4  ;;  %s4844_s15 = int_to_ptr.vmem [resolvable:$true] %s311_s15 }
  0x1a   : > { %p4840_p12 = pnand %p5536_p9, %p4233_p11 }
  0x1c   : > { %s4555_s24 = scalar_lea.hbm %s5557_s5, 4096  ;;  %p4854_p0 = pneg %p4840_p12 }
  0x1d   : > { %p4556_p13 = scmp.ne.s32.totalorder %s5557_s5, %s4555_s24  ;;  %p4562_p3 = scmp.lt.u32.totalorder %s4555_s24, %s5557_s5 }
  0x1f   : > { %p4558_p1 = pnand %p4854_p0, %p4556_p13 }
  0x21   : > { %p4559_p2 = pneg %p4558_p1 }
  0x23   : > { %p4564_p4 = pnand %p4562_p3, %p4559_p2 }
  0x25   : > { %4567 = shalt.err (!%p4564_p4)
}
  0x26   : > { %s4568_s16 = scalar_lea.vmem %s328_s12, 4096  ;;  %p4576_p9 = scmp.lt.s32.totalorder %s328_s12, %s328_s12 }
  0x27   : > { %p4569_p7 = scmp.ne.s32.totalorder %s328_s12, %s4568_s16  ;;  %p4577_p6 = scmp.lt.s32.totalorder %s4568_s16, %s4568_s16 }
  0x29   : > { %p4571_p8 = pnand %p4569_p7, %p4854_p0  ;;  %p4578_p5 = por %p4577_p6, %p4576_p9 }
  0x2b   : > { %p4572_p11 = pneg %p4571_p8 }
  0x2d   : > { %p4579_p10 = pnand %p4578_p5, %p4572_p11 }
  0x2f   : > { %4582 = shalt.err (!%p4579_p10)
}
  0x30   : > { %s5544_s26 = smov 64   ;;  %s5545_s22 = smov 4  }
  0x31   : > { %4239 = dma.hbm_to_vmem [thread:$0]  (!%p4840_p12), %s5557_s5, 4096, %s328_s12, [#allocation6], %s5544_s26, %s5544_s26, %s5545_s22  }
  0x32   : > { %s4583_s23 = scalar_lea.hbm %s5526_s3, 16384 }
  0x33   : > { %p4584_p5 = scmp.ne.s32.totalorder %s5526_s3, %s4583_s23  ;;  %p4590_p10 = scmp.lt.u32.totalorder %s4583_s23, %s5526_s3 }
  0x35   : > { %p4586_p6 = pnand %p4584_p5, %p4854_p0 }
  0x37   : > { %p4587_p9 = pneg %p4586_p6 }
  0x39   : > { %p4592_p13 = pnand %p4590_p10, %p4587_p9 }
  0x3b   : > { %4595 = shalt.err (!%p4592_p13)
}
  0x3c   : > { %s4596_s12 = scalar_lea.vmem %s4844_s15, 16384  ;;  %p4604_p4 = scmp.lt.s32.totalorder %s4844_s15, %s4844_s15 }
  0x3d   : > { %p4597_p1 = scmp.ne.s32.totalorder %s4844_s15, %s4596_s12  ;;  %p4605_p7 = scmp.lt.s32.totalorder %s4596_s12, %s4596_s12 }
  0x3f   : > { %p4599_p2 = pnand %p4597_p1, %p4854_p0  ;;  %p4606_p8 = por %p4605_p7, %p4604_p4 }
  0x41   : > { %p4600_p3 = pneg %p4599_p2 }
  0x43   : > { %p4607_p11 = pnand %p4606_p8, %p4600_p3 }
  0x45   : > { %4610 = shalt.err (!%p4607_p11)
}
  0x46   : > { %s4715_s28 = smov 128   ;;  %s4716_s17 = smov 8  }
  0x47   : > { %4236 = dma.hbm_to_vmem [thread:$0]  (!%p4840_p12), %s5526_s3, 16384, %s4844_s15, [#allocation3], %s4715_s28, %s4715_s28, %s4716_s17  }
  0x48   : > { %s4717_s19 = smov [#allocation7]   ;;  %s4611_s16 = scalar_lea.hbm %s5532_s9, 1024 }
  0x49   : > { %s349_s24 = sshll.u32 %s4717_s19, 4  ;;  %p4612_p5 = scmp.ne.s32.totalorder %s5532_s9, %s4611_s16  ;;  %s350_s24 = int_to_ptr.vmem [resolvable:$true] %s349_s24 }
  0x4a   : > { %p4618_p10 = scmp.lt.u32.totalorder %s4611_s16, %s5532_s9 }
  0x4b   : > { %p4614_p6 = pnand %p4612_p5, %p4854_p0 }
  0x4d   : > { %p4615_p9 = pneg %p4614_p6 }
  0x4f   : > { %p4620_p13 = pnand %p4618_p10, %p4615_p9 }
  0x51   : > { %4623 = shalt.err (!%p4620_p13)
}
  0x52   : > { %s4624_s15 = scalar_lea.vmem %s350_s24, 1024  ;;  %p4632_p4 = scmp.lt.s32.totalorder %s350_s24, %s350_s24 }
  0x53   : > { %p4625_p1 = scmp.ne.s32.totalorder %s350_s24, %s4624_s15  ;;  %p4633_p7 = scmp.lt.s32.totalorder %s4624_s15, %s4624_s15 }
  0x55   : > { %p4627_p2 = pnand %p4625_p1, %p4854_p0  ;;  %p4634_p8 = por %p4633_p7, %p4632_p4 }
  0x57   : > { %p4628_p3 = pneg %p4627_p2 }
  0x59   : > { %p4635_p11 = pnand %p4634_p8, %p4628_p3 }
  0x5b   : > { %4638 = shalt.err (!%p4635_p11)
}
  0x5c   : > { %s5559_s26 = smov 4   ;;  %s5560_s28 = smov 64  }
  0x5d   : > { %4242 = dma.hbm_to_vmem [thread:$0]  (!%p4840_p12), %s5532_s9, 1024, %s350_s24, [#allocation6], %s5560_s28, %s5560_s28, %s5559_s26  }
  0x5e   : > { %p5561_p5 = scmp.ne.s32.totalorder %s5555_s29, 0 }
  0x5f   : > { %p5562_p0 = scmp.eq.s32.totalorder (!%p5561_p5), %s4804_s21, 0 }
  0x60   : > { %377 = sbr.rel (%p5561_p5) target bundleno = 1945 (0x799), region = 64 }
  0x67   : > { %4684 = dma.done.wait (%p5562_p0), [#allocation3], 16384   ;;  %p5563_p6 = pmov %p5562_p0 }
  0x68   : > { %p5564_p9 = pmov %p5562_p0 }
  0x69   : > { %4686 = vsyncadd (%p5563_p6), [#allocation3], 4294950912 }
  0x6a   : > { %4688 = dma.done.wait (%p5564_p9), [#allocation6], 5120   ;;  %p5565_p10 = pmov %p5562_p0 }
  0x6b   : > { %s425_s13 = smul.u32 13, %s4804_s21  ;;  %v4718_v0 = vmov 0.0   ;;  %v446_v1 = vld [vmem:[%s5524_s1] sm:$0xff]  ;;  %vm501_vm0 = vcmask 1043456   ;;  %v3611_v2 = vld [vmem:[%s5524_s1 + $0x8] sm:$0xff]  ;;  %vm461_vm1 = vcmask 31744  }
  0x6c   : > { %4690 = vsyncadd (%p5565_p10), [#allocation6], 4294962176  ;;  %570 = vmatprep.mubr.f32.mxu0 %v4718_v0  ;;  %760 = vmatprep.mubr.f32.mxu1 %v4718_v0  ;;  %v460_v3 = vcombine.high %v446_v1, %v446_v1  ;;  %v691_v4 = vcombine.high %v3611_v2, %v3611_v2  ;;  %v4301_v7 = vld [vmem:[#allocation2 + $0x4] ss:$8 sps:$4 sm:$0xff]   ;;  %v4299_v8 = vld [vmem:[#allocation2] ss:$8 sps:$4 sm:$0xff]  }
  0x6d   : > { %p426_p12 = scmp.lt.s32.totalorder %s425_s13, 25  ;;  %v4304_v9 = vld [vmem:[#allocation2 + $0x104] ss:$8 sps:$4 sm:$0xff]   ;;  %v4302_v10 = vld [vmem:[#allocation2 + $0x100] ss:$8 sps:$4 sm:$0xff]   ;;  %vm4719_vm2 = vmmov 0  }
  0x6e   : > { %3596 = vmatprep.subr.msk.mxu0 %vm501_vm0, %v460_v3  ;;  %3613 = vmatprep.subr.msk.mxu1 %vm501_vm0, %v691_v4  ;;  %v4307_v11 = vld [vmem:[#allocation2 + $0x14] ss:$8 sps:$4 sm:$0xff]   ;;  %v4305_v13 = vld [vmem:[#allocation2 + $0x10] ss:$8 sps:$4 sm:$0xff]   ;;  %v4313_v16 = vld [vmem:[#allocation2 + $0x24] ss:$8 sps:$4 sm:$0xff]  }
  0x6f   : > { %s5577_s13 = smov (!%p426_p12, %s425_s13), 25  ;;  %3597 = vmatpush1.msk.msra.mxu0 %vm501_vm0, %v446_v1  ;;  %3614 = vmatpush1.msk.msra.mxu1 %vm501_vm0, %v3611_v2  ;;  %v4310_v14 = vld [vmem:[#allocation2 + $0x114] ss:$8 sps:$4 sm:$0xff]   ;;  %v4308_v15 = vld [vmem:[#allocation2 + $0x110] ss:$8 sps:$4 sm:$0xff]   ;;  %s422_s14 = sand.u32 1, %s4701_s18  }
  0x70   : > { %s3595_s29 = sshll.u32 %s5577_s13, 3  ;;  %1083 = vmatprep.subr.bf16.mxu0 %v4301_v7  ;;  %1430 = vmatprep.subr.bf16.mxu1 %v4304_v9  ;;  %v4311_v18 = vld [vmem:[#allocation2 + $0x20] ss:$8 sps:$4 sm:$0xff]   ;;  %v4316_v19 = vld [vmem:[#allocation2 + $0x124] ss:$8 sps:$4 sm:$0xff]   ;;  %s4218_s16 = smul.u32 104, %s422_s14 }
  0x71   : > { %s4939_s25 = scalar_lea.vmem %s5523_s0, %s3595_s29  ;;  %v4314_v20 = vld [vmem:[#allocation2 + $0x120] ss:$8 sps:$4 sm:$0xff]   ;;  %v4319_v21 = vld [vmem:[#allocation2 + $0x34] ss:$8 sps:$4 sm:$0xff]   ;;  %v4317_v23 = vld [vmem:[#allocation2 + $0x30] ss:$8 sps:$4 sm:$0xff]  }
  0x72   : > { %v433_v5 = vld [vmem:[%s4939_s25] sm:$0xff]  ;;  %v434_v6 = vld [vmem:[%s4939_s25 + $0x8] sm:$0xff]  ;;  %v435_v12 = vld [vmem:[%s4939_s25 + $0x10] sm:$0xff]  ;;  %s5456_s26 = scalar_lea.vmem [#allocation8], %s4218_s16  ;;  %s3865_s28 = smul.u32 1664, %s4804_s21 }
  0x73   : > { %3598 = vmatmul.mubr.msk.f32.vlgmr.msra.gmra.mrb[0].mxu0 %vm461_vm1, %v433_v5  ;;  %3615 = vmatmul.mubr.msk.f32.vlgmr.msra.gmra.mrb[0].mxu1 %vm461_vm1, %v433_v5  ;;  %v436_v17 = vld [vmem:[%s4939_s25 + $0x18] sm:$0xff]  ;;  %v437_v22 = vld [vmem:[%s4939_s25 + $0x20] sm:$0xff]  ;;  %v4325_v26 = vld [vmem:[#allocation2 + $0x44] ss:$8 sps:$4 sm:$0xff]   ;;  %s3492_s5 = sshll.u32 %s5456_s26, 4  ;;  %s5482_s21 = scalar_lea.sflag [#allocation4], %s422_s14  ;;  %s5477_s5 = int_to_ptr.vmem [resolvable:$true] %s3492_s5 }
  0x74   : > { %576 = vmatprep.mubr.f32.mxu0 %v4718_v0  ;;  %766 = vmatprep.mubr.f32.mxu1 %v4718_v0  ;;  %v4322_v24 = vld [vmem:[#allocation2 + $0x134] ss:$8 sps:$4 sm:$0xff]   ;;  %v4320_v25 = vld [vmem:[#allocation2 + $0x130] ss:$8 sps:$4 sm:$0xff]   ;;  %v438_v27 = vld [vmem:[%s4939_s25 + $0x28] sm:$0xff]  ;;  %s5475_s29 = scalar_lea.hbm %s5534_s11, %s3865_s28  ;;  %s4639_s30 = scalar_lea.vmem %s5477_s5, 1664 }
  0x75   : > { %1084 = vmatpush1.bf16.msra.mxu0 %v4299_v8  ;;  %1431 = vmatpush1.bf16.msra.mxu1 %v4302_v10  ;;  %v4323_v28 = vld [vmem:[#allocation2 + $0x40] ss:$8 sps:$4 sm:$0xff]   ;;  %v4328_v29 = vld [vmem:[#allocation2 + $0x144] ss:$8 sps:$4 sm:$0xff]   ;;  %v4331_v31 = vld [vmem:[#allocation2 + $0x54] ss:$8 sps:$4 sm:$0xff]   ;;  %p4640_p13 = scmp.ne.s32.totalorder %s5477_s5, %s4639_s30 }
  0x76   : > { %1085 = vmatprep.subr.bf16.mxu0 %v4307_v11  ;;  %1432 = vmatprep.subr.bf16.mxu1 %v4310_v14  ;;  %v4326_v30 = vld [vmem:[#allocation2 + $0x140] ss:$8 sps:$4 sm:$0xff]   ;;  %v4329_v33 = vld [vmem:[#allocation2 + $0x50] ss:$8 sps:$4 sm:$0xff]   ;;  %v4334_v34 = vld [vmem:[#allocation2 + $0x154] ss:$8 sps:$4 sm:$0xff]  }
  0x77   : > { %3599 = vmatmul.mubr.msk.f32.gmra.mrb[2].mxu0 %vm461_vm1, %v434_v6  ;;  %3616 = vmatmul.mubr.msk.f32.gmra.mrb[2].mxu1 %vm461_vm1, %v434_v6  ;;  %v439_v32 = vld [vmem:[%s4939_s25 + $0x30] sm:$0xff]  ;;  %v4332_v35 = vld [vmem:[#allocation2 + $0x150] ss:$8 sps:$4 sm:$0xff]   ;;  %v4343_v41 = vld [vmem:[#allocation2 + $0x74] ss:$8 sps:$4 sm:$0xff]   ;;  %p5566_p1 = scmp.ne.s32.totalorder %s5552_s27, 0 }
  0x78   : > { %582 = vmatprep.mubr.f32.mxu0 %v4718_v0  ;;  %772 = vmatprep.mubr.f32.mxu1 %v4718_v0  ;;  %v4337_v36 = vld [vmem:[#allocation2 + $0x64] ss:$8 sps:$4 sm:$0xff]   ;;  %v440_v37 = vld [vmem:[%s4939_s25 + $0x38] sm:$0xff]  ;;  %v4335_v38 = vld [vmem:[#allocation2 + $0x60] ss:$8 sps:$4 sm:$0xff]   ;;  %s4720_s17 = smov [#allocation8]  }
  0x79   : > { %1086 = vmatpush1.bf16.msra.mxu0 %v4305_v13  ;;  %1433 = vmatpush1.bf16.msra.mxu1 %v4308_v15  ;;  %v4340_v39 = vld [vmem:[#allocation2 + $0x164] ss:$8 sps:$4 sm:$0xff]   ;;  %v4338_v40 = vld [vmem:[#allocation2 + $0x160] ss:$8 sps:$4 sm:$0xff]   ;;  %v441_v42 = vld [vmem:[%s4939_s25 + $0x40] sm:$0xff]  ;;  %p4641_p2 = pnand %p4640_p13, %p5566_p1  ;;  %s4643_s20 = sshll.u32 %s4720_s17, 4  ;;  %s4644_s20 = int_to_ptr.vmem [resolvable:$false] %s4643_s20 }
  0x7a   : > { %1087 = vmatprep.subr.bf16.mxu0 %v4313_v16  ;;  %1434 = vmatprep.subr.bf16.mxu1 %v4316_v19  ;;  %v4341_v43 = vld [vmem:[#allocation2 + $0x70] ss:$8 sps:$4 sm:$0xff]   ;;  %v4346_v44 = vld [vmem:[#allocation2 + $0x174] ss:$8 sps:$4 sm:$0xff]   ;;  %v4349_v46 = vld [vmem:[#allocation2 + $0x84] ss:$8 sps:$4 sm:$0xff]   ;;  %p4646_p4 = scmp.lt.s32.totalorder %s5477_s5, %s4644_s20 }
  0x7b   : > { %3600 = vmatmul.mubr.msk.f32.gmra.mrb[4].mxu0 %vm461_vm1, %v435_v12  ;;  %3617 = vmatmul.mubr.msk.f32.gmra.mrb[4].mxu1 %vm461_vm1, %v435_v12  ;;  %v4344_v45 = vld [vmem:[#allocation2 + $0x170] ss:$8 sps:$4 sm:$0xff]   ;;  %v442_v47 = vld [vmem:[%s4939_s25 + $0x48] sm:$0xff]  ;;  %v4355_v51 = vld [vmem:[#allocation2 + $0x94] ss:$8 sps:$4 sm:$0xff]   ;;  %p4642_p3 = pneg %p4641_p2  ;;  %s4645_s23 = scalar_lea.vmem %s4644_s20, 3328 }
  0x7c   : > { %588 = vmatprep.mubr.f32.mxu0 %v4718_v0  ;;  %778 = vmatprep.mubr.f32.mxu1 %v4718_v0  ;;  %v4347_v48 = vld [vmem:[#allocation2 + $0x80] ss:$8 sps:$4 sm:$0xff]   ;;  %v4352_v50 = vld [vmem:[#allocation2 + $0x184] ss:$8 sps:$4 sm:$0xff]   ;;  %v4353_v53 = vld [vmem:[#allocation2 + $0x90] ss:$8 sps:$4 sm:$0xff]   ;;  %p4647_p7 = scmp.lt.s32.totalorder %s4645_s23, %s4639_s30 }
  0x7d   : > { %1088 = vmatpush1.bf16.msra.mxu0 %v4311_v18  ;;  %1435 = vmatpush1.bf16.msra.mxu1 %v4314_v20  ;;  %v4350_v49 = vld [vmem:[#allocation2 + $0x180] ss:$8 sps:$4 sm:$0xff]   ;;  %v4358_v54 = vld [vmem:[#allocation2 + $0x194] ss:$8 sps:$4 sm:$0xff]   ;;  %v4356_v55 = vld [vmem:[#allocation2 + $0x190] ss:$8 sps:$4 sm:$0xff]  }
  0x7e   : > { %1089 = vmatprep.subr.bf16.mxu0 %v4319_v21  ;;  %1436 = vmatprep.subr.bf16.mxu1 %v4322_v24  ;;  %v443_v52 = vld [vmem:[%s4939_s25 + $0x50] sm:$0xff]  ;;  %v444_v57 = vld [vmem:[%s4939_s25 + $0x58] sm:$0xff]  ;;  %v445_v62 = vld [vmem:[%s4939_s25 + $0x60] sm:$0xff]  ;;  %v449_v21 = vlaneseq  ;;  %p4648_p8 = por %p4647_p7, %p4646_p4 }
  0x7f   : > { %3601 = vmatmul.mubr.msk.f32.gmra.mrb[6].mxu0 %vm461_vm1, %v436_v17  ;;  %3618 = vmatmul.mubr.msk.f32.gmra.mrb[6].mxu1 %vm461_vm1, %v436_v17  ;;  %v4361_v56 = vld [vmem:[#allocation2 + $0xa4] ss:$8 sps:$4 sm:$0xff]   ;;  %v4359_v58 = vld [vmem:[#allocation2 + $0xa0] ss:$8 sps:$4 sm:$0xff]   ;;  %v4367_v61 = vld [vmem:[#allocation2 + $0xb4] ss:$8 sps:$4 sm:$0xff]  }
  0x80   : > { %594 = vmatprep.mubr.f32.mxu0 %v4718_v0  ;;  %784 = vmatprep.mubr.f32.mxu1 %v4718_v0  ;;  %v4364_v59 = vld [vmem:[#allocation2 + $0x1a4] ss:$8 sps:$4 sm:$0xff]   ;;  %v4362_v60 = vld [vmem:[#allocation2 + $0x1a0] ss:$8 sps:$4 sm:$0xff]   ;;  %v4370_v63 = vld [vmem:[#allocation2 + $0x1b4] ss:$8 sps:$4 sm:$0xff]   ;;  %p4649_p11 = pnand %p4648_p8, %p4642_p3 }
  0x81   : > { %1090 = vmatpush1.bf16.msra.mxu0 %v4317_v23  ;;  %1437 = vmatpush1.bf16.msra.mxu1 %v4320_v25  ;;  %v4365_v1 = vld [vmem:[#allocation2 + $0xb0] ss:$8 sps:$4 sm:$0xff]   ;;  %v4373_v3 = vld [vmem:[#allocation2 + $0xc4] ss:$8 sps:$4 sm:$0xff]   ;;  %v4371_v5 = vld [vmem:[#allocation2 + $0xc0] ss:$8 sps:$4 sm:$0xff]  }
  0x82   : > { %1091 = vmatprep.subr.bf16.mxu0 %v4325_v26  ;;  %1438 = vmatprep.subr.bf16.mxu1 %v4328_v29  ;;  %v4368_v2 = vld [vmem:[#allocation2 + $0x1b0] ss:$8 sps:$4 sm:$0xff]   ;;  %v4376_v4 = vld [vmem:[#allocation2 + $0x1c4] ss:$8 sps:$4 sm:$0xff]   ;;  %v4374_v6 = vld [vmem:[#allocation2 + $0x1c0] ss:$8 sps:$4 sm:$0xff]  }
  0x83   : > { %3602 = vmatmul.mubr.msk.f32.gmra.mrb[8].mxu0 %vm461_vm1, %v437_v22  ;;  %3619 = vmatmul.mubr.msk.f32.gmra.mrb[8].mxu1 %vm461_vm1, %v437_v22  ;;  %v4379_v7 = vld [vmem:[#allocation2 + $0xd4] ss:$8 sps:$4 sm:$0xff]   ;;  %v4377_v9 = vld [vmem:[#allocation2 + $0xd0] ss:$8 sps:$4 sm:$0xff]   ;;  %v4385_v11 = vld [vmem:[#allocation2 + $0xe4] ss:$8 sps:$4 sm:$0xff]  }
  0x84   : > { %600 = vmatprep.mubr.f32.mxu0 %v4718_v0  ;;  %790 = vmatprep.mubr.f32.mxu1 %v4718_v0  ;;  %v4382_v8 = vld [vmem:[#allocation2 + $0x1d4] ss:$8 sps:$4 sm:$0xff]   ;;  %v4380_v10 = vld [vmem:[#allocation2 + $0x1d0] ss:$8 sps:$4 sm:$0xff]   ;;  %v4388_v12 = vld [vmem:[#allocation2 + $0x1e4] ss:$8 sps:$4 sm:$0xff]  }
  0x85   : > { %1092 = vmatpush1.bf16.msra.mxu0 %v4323_v28  ;;  %1439 = vmatpush1.bf16.msra.mxu1 %v4326_v30  ;;  %v4383_v13 = vld [vmem:[#allocation2 + $0xe0] ss:$8 sps:$4 sm:$0xff]   ;;  %v4391_v15 = vld [vmem:[#allocation2 + $0xf4] ss:$8 sps:$4 sm:$0xff]   ;;  %v4389_v17 = vld [vmem:[#allocation2 + $0xf0] ss:$8 sps:$4 sm:$0xff]  }
  0x86   : > { %1093 = vmatprep.subr.bf16.mxu0 %v4331_v31  ;;  %1440 = vmatprep.subr.bf16.mxu1 %v4334_v34  ;;  %v4386_v14 = vld [vmem:[#allocation2 + $0x1e0] ss:$8 sps:$4 sm:$0xff]   ;;  %v4394_v16 = vld [vmem:[#allocation2 + $0x1f4] ss:$8 sps:$4 sm:$0xff]   ;;  %v4392_v18 = vld [vmem:[#allocation2 + $0x1f0] ss:$8 sps:$4 sm:$0xff]  }
  0x87   : > { %3603 = vmatmul.mubr.msk.f32.gmra.mrb[10].mxu0 %vm461_vm1, %v438_v27  ;;  %3620 = vmatmul.mubr.msk.f32.gmra.mrb[10].mxu1 %vm461_vm1, %v438_v27  ;;  %v4397_v19 = vld [vmem:[#allocation2 + $0x204] ss:$8 sps:$4 sm:$0xff]   ;;  %v450_v22 = vshrl.u32 %v449_v21, 7  ;;  %v447_v24 = vld [vmem:[%s5525_s2] sm:$0x3] }
  0x88   : > { %606 = vmatprep.mubr.f32.mxu0 %v4718_v0  ;;  %796 = vmatprep.mubr.f32.mxu1 %v4718_v0  ;;  %v4400_v20 = vld [vmem:[#allocation2 + $0x304] ss:$8 sps:$4 sm:$0xff]   ;;  %v3612_v26 = vld [vmem:[%s5525_s2 + $0x2] sm:$0x3] }
  0x89   : > { %1094 = vmatpush1.bf16.msra.mxu0 %v4329_v33  ;;  %1441 = vmatpush1.bf16.msra.mxu1 %v4332_v35  ;;  %v5004_v23 = vsub.s32 0, %v450_v22  ;;  %v5009_v25 = vsub.s32 1, %v450_v22  ;;  %v4409_v22 = vld [vmem:[#allocation2 + $0x224] ss:$8 sps:$4 sm:$0xff]  }
  0x8a   : > { %1095 = vmatprep.subr.bf16.mxu0 %v4337_v36  ;;  %1442 = vmatprep.subr.bf16.mxu1 %v4340_v39 }
  0x8b   : > { %3604 = vmatmul.mubr.msk.f32.gmra.mrb[12].mxu0 %vm461_vm1, %v439_v32  ;;  %3621 = vmatmul.mubr.msk.f32.gmra.mrb[12].mxu1 %vm461_vm1, %v439_v32  ;;  %v5015_v27 = vrot.slane %v447_v24, %v5004_v23  ;;  %v5018_v28 = vrot.slane %v3612_v26, %v5004_v23  ;;  %v5021_v30 = vrot.slane %v447_v24, %v5009_v25 }
  0x8c   : > { %612 = vmatprep.mubr.f32.mxu0 %v4718_v0  ;;  %802 = vmatprep.mubr.f32.mxu1 %v4718_v0  ;;  %v5024_v32 = vrot.slane %v3612_v26, %v5009_v25 }
  0x8d   : > { %1096 = vmatpush1.bf16.msra.mxu0 %v4335_v38  ;;  %1443 = vmatpush1.bf16.msra.mxu1 %v4338_v40 }
  0x8e   : > { %1097 = vmatprep.subr.bf16.mxu0 %v4343_v41  ;;  %1444 = vmatprep.subr.bf16.mxu1 %v4346_v44 }
  0x8f   : > { %3605 = vmatmul.mubr.msk.f32.gmra.mrb[14].mxu0 %vm461_vm1, %v440_v37  ;;  %3622 = vmatmul.mubr.msk.f32.gmra.mrb[14].mxu1 %vm461_vm1, %v440_v37 }
  0x90   : > { %618 = vmatprep.mubr.f32.mxu0 %v4718_v0  ;;  %808 = vmatprep.mubr.f32.mxu1 %v4718_v0 }
  0x91   : > { %1098 = vmatpush1.bf16.msra.mxu0 %v4341_v43  ;;  %1445 = vmatpush1.bf16.msra.mxu1 %v4344_v45 }
  0x92   : > { %1099 = vmatprep.subr.bf16.mxu0 %v4349_v46  ;;  %1446 = vmatprep.subr.bf16.mxu1 %v4352_v50 }
  0x93   : > { %3606 = vmatmul.mubr.msk.f32.gmra.mrb[16].mxu0 %vm461_vm1, %v441_v42  ;;  %3623 = vmatmul.mubr.msk.f32.gmra.mrb[16].mxu1 %vm461_vm1, %v441_v42 }
  0x94   : > { %624 = vmatprep.mubr.f32.mxu0 %v4718_v0  ;;  %814 = vmatprep.mubr.f32.mxu1 %v4718_v0 }
  0x95   : > { %1100 = vmatpush1.bf16.msra.mxu0 %v4347_v48  ;;  %1447 = vmatpush1.bf16.msra.mxu1 %v4350_v49 }
  0x96   : > { %1101 = vmatprep.subr.bf16.mxu0 %v4355_v51  ;;  %1448 = vmatprep.subr.bf16.mxu1 %v4358_v54 }
  0x97   : > { %3607 = vmatmul.mubr.msk.f32.gmra.mrb[18].mxu0 %vm461_vm1, %v442_v47  ;;  %3624 = vmatmul.mubr.msk.f32.gmra.mrb[18].mxu1 %vm461_vm1, %v442_v47 }
  0x98   : > { %630 = vmatprep.mubr.f32.mxu0 %v4718_v0  ;;  %820 = vmatprep.mubr.f32.mxu1 %v4718_v0 }
  0x99   : > { %1102 = vmatpush1.bf16.msra.mxu0 %v4353_v53  ;;  %1449 = vmatpush1.bf16.msra.mxu1 %v4356_v55 }
  0x9a   : > { %1103 = vmatprep.subr.bf16.mxu0 %v4361_v56  ;;  %1450 = vmatprep.subr.bf16.mxu1 %v4364_v59 }
  0x9b   : > { %3608 = vmatmul.mubr.msk.f32.gmra.mrb[20].mxu0 %vm461_vm1, %v443_v52  ;;  %3625 = vmatmul.mubr.msk.f32.gmra.mrb[20].mxu1 %vm461_vm1, %v443_v52 }
  0x9c   : > { %636 = vmatprep.mubr.f32.mxu0 %v4718_v0  ;;  %826 = vmatprep.mubr.f32.mxu1 %v4718_v0 }
  0x9d   : > { %1104 = vmatpush1.bf16.msra.mxu0 %v4359_v58  ;;  %1451 = vmatpush1.bf16.msra.mxu1 %v4362_v60 }
  0x9e   : > { %1105 = vmatprep.subr.bf16.mxu0 %v4367_v61  ;;  %1452 = vmatprep.subr.bf16.mxu1 %v4370_v63  ;;  %v4395_v63 = vld [vmem:[#allocation2 + $0x200] ss:$8 sps:$4 sm:$0xff]  }
  0x9f   : > { %3609 = vmatmul.mubr.msk.f32.gmra.mrb[22].mxu0 %vm461_vm1, %v444_v57  ;;  %3626 = vmatmul.mubr.msk.f32.gmra.mrb[22].mxu1 %vm461_vm1, %v444_v57 }
  0xa0   : > { %642 = vmatprep.mubr.f32.mxu0 %v4718_v0  ;;  %832 = vmatprep.mubr.f32.mxu1 %v4718_v0 }
  0xa1   : > { %1106 = vmatpush1.bf16.msra.mxu0 %v4365_v1  ;;  %1453 = vmatpush1.bf16.msra.mxu1 %v4368_v2  ;;  %v4398_v1 = vld [vmem:[#allocation2 + $0x300] ss:$8 sps:$4 sm:$0xff]  }
  0xa2   : > { %1107 = vmatprep.subr.bf16.mxu0 %v4373_v3  ;;  %1454 = vmatprep.subr.bf16.mxu1 %v4376_v4  ;;  %v4403_v4 = vld [vmem:[#allocation2 + $0x214] ss:$8 sps:$4 sm:$0xff]  }
  0xa3   : > { %3610 = vmatmul.mubr.msk.f32.gmra.mrb[24].mxu0 %vm461_vm1, %v445_v62  ;;  %3627 = vmatmul.mubr.msk.f32.gmra.mrb[24].mxu1 %vm461_vm1, %v445_v62 }
  0xa5   : > { %1108 = vmatpush1.bf16.msra.mxu0 %v4371_v5  ;;  %1455 = vmatpush1.bf16.msra.mxu1 %v4374_v6  ;;  %v4406_v5 = vld [vmem:[#allocation2 + $0x314] ss:$8 sps:$4 sm:$0xff]  }
  0xa6   : > { %1109 = vmatprep.subr.bf16.mxu0 %v4379_v7  ;;  %1456 = vmatprep.subr.bf16.mxu1 %v4382_v8 }
  0xa9   : > { %1110 = vmatpush1.bf16.msra.mxu0 %v4377_v9  ;;  %1457 = vmatpush1.bf16.msra.mxu1 %v4380_v10 }
  0xaa   : > { %1111 = vmatprep.subr.bf16.mxu0 %v4385_v11  ;;  %1458 = vmatprep.subr.bf16.mxu1 %v4388_v12 }
  0xad   : > { %1112 = vmatpush1.bf16.msra.mxu0 %v4383_v13  ;;  %1459 = vmatpush1.bf16.msra.mxu1 %v4386_v14 }
  0xae   : > { %1113 = vmatprep.subr.bf16.mxu0 %v4391_v15  ;;  %1460 = vmatprep.subr.bf16.mxu1 %v4394_v16  ;;  %v4401_v16 = vld [vmem:[#allocation2 + $0x210] ss:$8 sps:$4 sm:$0xff]  }
  0xb1   : > { %1114 = vmatpush1.bf16.msra.mxu0 %v4389_v17  ;;  %1461 = vmatpush1.bf16.msra.mxu1 %v4392_v18  ;;  %v4404_v17 = vld [vmem:[#allocation2 + $0x310] ss:$8 sps:$4 sm:$0xff]  }
  0xb2   : > { %1777 = vmatprep.subr.bf16.mxu0 %v4397_v19  ;;  %2124 = vmatprep.subr.bf16.mxu1 %v4400_v20 }
 0x146   : > { %v572_v29 = vpop.f32.mrb[0].mxu0  ;;  %v762_v31 = vpop.f32.mrb[0].mxu1 }
 0x147   : > { %v574_v33 = vpop.f32.mrb[1].mxu0  ;;  %v764_v34 = vpop.f32.mrb[1].mxu1  ;;  %v573_v35 = vadd.f32 %v572_v29, %v5015_v27  ;;  %v763_v36 = vadd.f32 %v762_v31, %v5018_v28 }
 0x148   : > { %v575_v37 = vadd.f32 %v574_v33, %v5021_v30  ;;  %v765_v38 = vadd.f32 %v764_v34, %v5024_v32 }
 0x149   : > { %v649_v47 = vmax.f32 %v573_v35, 0.0  ;;  %v839_v48 = vmax.f32 %v763_v36, 0.0 }
 0x14a   : > { %v578_v39 = vpop.f32.mrb[2].mxu0  ;;  %v768_v40 = vpop.f32.mrb[2].mxu1  ;;  %v650_v51 = vmax.f32 %v575_v37, 0.0  ;;  %v840_v52 = vmax.f32 %v765_v38, 0.0 }
 0x14b   : > { %v579_v41 = vadd.f32 %v578_v39, %v5015_v27  ;;  %v769_v42 = vadd.f32 %v768_v40, %v5018_v28  ;;  %v580_v43 = vpop.f32.mrb[3].mxu0  ;;  %v770_v44 = vpop.f32.mrb[3].mxu1 }
 0x14c   : > { %v581_v45 = vadd.f32 %v580_v43, %v5021_v30  ;;  %v771_v46 = vadd.f32 %v770_v44, %v5024_v32 }
 0x14d   : > { %v651_v49 = vmax.f32 %v579_v41, 0.0  ;;  %v841_v50 = vmax.f32 %v769_v42, 0.0  ;;  %v4407_v41 = vld [vmem:[#allocation2 + $0x220] ss:$8 sps:$4 sm:$0xff]   ;;  %v4412_v42 = vld [vmem:[#allocation2 + $0x324] ss:$8 sps:$4 sm:$0xff]  }
 0x14e   : > { %v652_v53 = vmax.f32 %v581_v45, 0.0  ;;  %v842_v54 = vmax.f32 %v771_v46, 0.0  ;;  %v584_v55 = vpop.f32.mrb[4].mxu0  ;;  %v774_v56 = vpop.f32.mrb[4].mxu1  ;;  %v4410_v45 = vld [vmem:[#allocation2 + $0x320] ss:$8 sps:$4 sm:$0xff]  }
 0x14f   : > { %v865_v57 = vpack.c.bf16 %v651_v49, %v649_v47  ;;  %v1210_v58 = vpack.c.bf16 %v841_v50, %v839_v48  ;;  %v586_v59 = vpop.f32.mrb[5].mxu0  ;;  %v776_v60 = vpop.f32.mrb[5].mxu1  ;;  %v585_v2 = vadd.f32 %v584_v55, %v5015_v27  ;;  %v775_v3 = vadd.f32 %v774_v56, %v5018_v28  ;;  %v4415_v46 = vld [vmem:[#allocation2 + $0x234] ss:$8 sps:$4 sm:$0xff]  }
 0x150   : > { %v866_v61 = vpack.c.bf16 %v652_v53, %v650_v51  ;;  %v1211_v62 = vpack.c.bf16 %v842_v54, %v840_v52  ;;  %v587_v6 = vadd.f32 %v586_v59, %v5021_v30  ;;  %v777_v7 = vadd.f32 %v776_v60, %v5024_v32  ;;  %v4418_v51 = vld [vmem:[#allocation2 + $0x334] ss:$8 sps:$4 sm:$0xff]   ;;  %v4416_v59 = vld [vmem:[#allocation2 + $0x330] ss:$8 sps:$4 sm:$0xff]  }
 0x151   : > { %v653_v18 = vmax.f32 %v585_v2, 0.0  ;;  %v843_v19 = vmax.f32 %v775_v3, 0.0 }
 0x152   : > { %v590_v8 = vpop.f32.mrb[6].mxu0  ;;  %v780_v9 = vpop.f32.mrb[6].mxu1  ;;  %1115 = vmatprep.mubr.bf16.mxu0 %v866_v61  ;;  %1462 = vmatprep.mubr.bf16.mxu1 %v1211_v62  ;;  %v654_v24 = vmax.f32 %v587_v6, 0.0  ;;  %v844_v26 = vmax.f32 %v777_v7, 0.0 }
 0x153   : > { %v591_v10 = vadd.f32 %v590_v8, %v5015_v27  ;;  %v781_v11 = vadd.f32 %v780_v9, %v5018_v28  ;;  %v592_v12 = vpop.f32.mrb[7].mxu0  ;;  %v782_v13 = vpop.f32.mrb[7].mxu1  ;;  %1116 = vmatmul.mubr.bf16.vlgmr.msra.gmra.mrb[28].mxu0 %v865_v57  ;;  %1463 = vmatmul.mubr.bf16.vlgmr.msra.gmra.mrb[28].mxu1 %v1210_v58  ;;  %v4413_v58 = vld [vmem:[#allocation2 + $0x230] ss:$8 sps:$4 sm:$0xff]  }
 0x154   : > { %v593_v14 = vadd.f32 %v592_v12, %v5021_v30  ;;  %v783_v15 = vadd.f32 %v782_v13, %v5024_v32  ;;  %1778 = vmatpush1.bf16.msra.mxu0 %v4395_v63  ;;  %2125 = vmatpush1.bf16.msra.mxu1 %v4398_v1  ;;  %v4421_v1 = vld [vmem:[#allocation2 + $0x244] ss:$8 sps:$4 sm:$0xff]  }
 0x155   : > { %v655_v20 = vmax.f32 %v591_v10, 0.0  ;;  %v845_v21 = vmax.f32 %v781_v11, 0.0  ;;  %1779 = vmatprep.subr.bf16.mxu0 %v4403_v4  ;;  %2126 = vmatprep.subr.bf16.mxu1 %v4406_v5 }
 0x156   : > { %v656_v29 = vmax.f32 %v593_v14, 0.0  ;;  %v846_v31 = vmax.f32 %v783_v15, 0.0  ;;  %v596_v33 = vpop.f32.mrb[8].mxu0  ;;  %v786_v34 = vpop.f32.mrb[8].mxu1  ;;  %v4419_v14 = vld [vmem:[#allocation2 + $0x240] ss:$8 sps:$4 sm:$0xff]  }
 0x157   : > { %v867_v35 = vpack.c.bf16 %v655_v20, %v653_v18  ;;  %v1212_v36 = vpack.c.bf16 %v845_v21, %v843_v19  ;;  %v598_v37 = vpop.f32.mrb[9].mxu0  ;;  %v788_v38 = vpop.f32.mrb[9].mxu1  ;;  %v597_v43 = vadd.f32 %v596_v33, %v5015_v27  ;;  %v787_v44 = vadd.f32 %v786_v34, %v5018_v28  ;;  %v4424_v15 = vld [vmem:[#allocation2 + $0x344] ss:$8 sps:$4 sm:$0xff]   ;;  %v4422_v18 = vld [vmem:[#allocation2 + $0x340] ss:$8 sps:$4 sm:$0xff]  }
 0x158   : > { %v868_v39 = vpack.c.bf16 %v656_v29, %v654_v24  ;;  %v1213_v40 = vpack.c.bf16 %v846_v31, %v844_v26  ;;  %1780 = vmatpush1.bf16.msra.mxu0 %v4401_v16  ;;  %2127 = vmatpush1.bf16.msra.mxu1 %v4404_v17  ;;  %v599_v47 = vadd.f32 %v598_v37, %v5021_v30  ;;  %v4427_v19 = vld [vmem:[#allocation2 + $0x254] ss:$8 sps:$4 sm:$0xff]   ;;  %v4425_v37 = vld [vmem:[#allocation2 + $0x250] ss:$8 sps:$4 sm:$0xff]  }
 0x159   : > { %1781 = vmatprep.subr.bf16.mxu0 %v4409_v22  ;;  %v789_v48 = vadd.f32 %v788_v38, %v5024_v32  ;;  %2128 = vmatprep.subr.bf16.mxu1 %v4412_v42  ;;  %v657_v60 = vmax.f32 %v597_v43, 0.0  ;;  %v847_v61 = vmax.f32 %v787_v44, 0.0  ;;  %v4430_v26 = vld [vmem:[#allocation2 + $0x354] ss:$8 sps:$4 sm:$0xff]   ;;  %v4428_v38 = vld [vmem:[#allocation2 + $0x350] ss:$8 sps:$4 sm:$0xff]  }
 0x15a   : > { %v602_v49 = vpop.f32.mrb[10].mxu0  ;;  %v792_v50 = vpop.f32.mrb[10].mxu1  ;;  %1125 = vmatprep.mubr.bf16.mxu0 %v868_v39  ;;  %1472 = vmatprep.mubr.bf16.mxu1 %v1213_v40  ;;  %v658_v2 = vmax.f32 %v599_v47, 0.0  ;;  %v4433_v43 = vld [vmem:[#allocation2 + $0x264] ss:$8 sps:$4 sm:$0xff]  }
 0x15b   : > { %v603_v52 = vadd.f32 %v602_v49, %v5015_v27  ;;  %v793_v53 = vadd.f32 %v792_v50, %v5018_v28  ;;  %v604_v54 = vpop.f32.mrb[11].mxu0  ;;  %v794_v55 = vpop.f32.mrb[11].mxu1  ;;  %1126 = vmatmul.mubr.bf16.gmra.mrb[32].mxu0 %v867_v35  ;;  %1473 = vmatmul.mubr.bf16.gmra.mrb[32].mxu1 %v1212_v36  ;;  %v848_v3 = vmax.f32 %v789_v48, 0.0 }
 0x15c   : > { %v605_v56 = vadd.f32 %v604_v54, %v5021_v30  ;;  %v795_v57 = vadd.f32 %v794_v55, %v5024_v32  ;;  %1782 = vmatpush1.bf16.msra.mxu0 %v4407_v41  ;;  %2129 = vmatpush1.bf16.msra.mxu1 %v4410_v45 }
 0x15d   : > { %v659_v62 = vmax.f32 %v603_v52, 0.0  ;;  %v849_v63 = vmax.f32 %v793_v53, 0.0  ;;  %1783 = vmatprep.subr.bf16.mxu0 %v4415_v46  ;;  %2130 = vmatprep.subr.bf16.mxu1 %v4418_v51 }
 0x15e   : > { %v660_v4 = vmax.f32 %v605_v56, 0.0  ;;  %v850_v5 = vmax.f32 %v795_v57, 0.0  ;;  %v608_v6 = vpop.f32.mrb[12].mxu0  ;;  %v798_v7 = vpop.f32.mrb[12].mxu1  ;;  %v4431_v56 = vld [vmem:[#allocation2 + $0x260] ss:$8 sps:$4 sm:$0xff]  }
 0x15f   : > { %v869_v8 = vpack.c.bf16 %v659_v62, %v657_v60  ;;  %v1214_v9 = vpack.c.bf16 %v849_v63, %v847_v61  ;;  %v610_v10 = vpop.f32.mrb[13].mxu0  ;;  %v800_v11 = vpop.f32.mrb[13].mxu1  ;;  %v609_v16 = vadd.f32 %v608_v6, %v5015_v27  ;;  %v799_v17 = vadd.f32 %v798_v7, %v5018_v28  ;;  %v4436_v57 = vld [vmem:[#allocation2 + $0x364] ss:$8 sps:$4 sm:$0xff]   ;;  %v4434_v60 = vld [vmem:[#allocation2 + $0x360] ss:$8 sps:$4 sm:$0xff]  }
 0x160   : > { %v870_v12 = vpack.c.bf16 %v660_v4, %v658_v2  ;;  %v1215_v13 = vpack.c.bf16 %v850_v5, %v848_v3  ;;  %1784 = vmatpush1.bf16.msra.mxu0 %v4413_v58  ;;  %2131 = vmatpush1.bf16.msra.mxu1 %v4416_v59  ;;  %v611_v20 = vadd.f32 %v610_v10, %v5021_v30  ;;  %v4439_v61 = vld [vmem:[#allocation2 + $0x274] ss:$8 sps:$4 sm:$0xff]   ;;  %v4437_v10 = vld [vmem:[#allocation2 + $0x270] ss:$8 sps:$4 sm:$0xff]  }
 0x161   : > { %1785 = vmatprep.subr.bf16.mxu0 %v4421_v1  ;;  %v801_v21 = vadd.f32 %v800_v11, %v5024_v32  ;;  %2132 = vmatprep.subr.bf16.mxu1 %v4424_v15  ;;  %v661_v39 = vmax.f32 %v609_v16, 0.0  ;;  %v851_v40 = vmax.f32 %v799_v17, 0.0  ;;  %v4442_v3 = vld [vmem:[#allocation2 + $0x374] ss:$8 sps:$4 sm:$0xff]   ;;  %v4440_v11 = vld [vmem:[#allocation2 + $0x370] ss:$8 sps:$4 sm:$0xff]  }
 0x162   : > { %v614_v22 = vpop.f32.mrb[14].mxu0  ;;  %v804_v24 = vpop.f32.mrb[14].mxu1  ;;  %1135 = vmatprep.mubr.bf16.mxu0 %v870_v12  ;;  %1482 = vmatprep.mubr.bf16.mxu1 %v1215_v13  ;;  %v662_v44 = vmax.f32 %v611_v20, 0.0  ;;  %v4445_v16 = vld [vmem:[#allocation2 + $0x284] ss:$8 sps:$4 sm:$0xff]  }
 0x163   : > { %v615_v29 = vadd.f32 %v614_v22, %v5015_v27  ;;  %v805_v31 = vadd.f32 %v804_v24, %v5018_v28  ;;  %v616_v33 = vpop.f32.mrb[15].mxu0  ;;  %v806_v34 = vpop.f32.mrb[15].mxu1  ;;  %1136 = vmatmul.mubr.bf16.gmra.mrb[36].mxu0 %v869_v8  ;;  %1483 = vmatmul.mubr.bf16.gmra.mrb[36].mxu1 %v1214_v9  ;;  %v852_v45 = vmax.f32 %v801_v21, 0.0 }
 0x164   : > { %v617_v35 = vadd.f32 %v616_v33, %v5021_v30  ;;  %v807_v36 = vadd.f32 %v806_v34, %v5024_v32  ;;  %1786 = vmatpush1.bf16.msra.mxu0 %v4419_v14  ;;  %2133 = vmatpush1.bf16.msra.mxu1 %v4422_v18 }
 0x165   : > { %v663_v41 = vmax.f32 %v615_v29, 0.0  ;;  %v853_v42 = vmax.f32 %v805_v31, 0.0  ;;  %1787 = vmatprep.subr.bf16.mxu0 %v4427_v19  ;;  %2134 = vmatprep.subr.bf16.mxu1 %v4430_v26 }
 0x166   : > { %v664_v46 = vmax.f32 %v617_v35, 0.0  ;;  %v854_v47 = vmax.f32 %v807_v36, 0.0  ;;  %v620_v48 = vpop.f32.mrb[16].mxu0  ;;  %v810_v49 = vpop.f32.mrb[16].mxu1  ;;  %v4443_v35 = vld [vmem:[#allocation2 + $0x280] ss:$8 sps:$4 sm:$0xff]  }
 0x167   : > { %v871_v50 = vpack.c.bf16 %v663_v41, %v661_v39  ;;  %v1216_v51 = vpack.c.bf16 %v853_v42, %v851_v40  ;;  %v622_v52 = vpop.f32.mrb[17].mxu0  ;;  %v812_v53 = vpop.f32.mrb[17].mxu1  ;;  %v621_v58 = vadd.f32 %v620_v48, %v5015_v27  ;;  %v811_v59 = vadd.f32 %v810_v49, %v5018_v28  ;;  %v4448_v36 = vld [vmem:[#allocation2 + $0x384] ss:$8 sps:$4 sm:$0xff]   ;;  %v4446_v39 = vld [vmem:[#allocation2 + $0x380] ss:$8 sps:$4 sm:$0xff]  }
 0x168   : > { %v872_v54 = vpack.c.bf16 %v664_v46, %v662_v44  ;;  %v1217_v55 = vpack.c.bf16 %v854_v47, %v852_v45  ;;  %1788 = vmatpush1.bf16.msra.mxu0 %v4425_v37  ;;  %2135 = vmatpush1.bf16.msra.mxu1 %v4428_v38  ;;  %v623_v62 = vadd.f32 %v622_v52, %v5021_v30  ;;  %v4451_v40 = vld [vmem:[#allocation2 + $0x294] ss:$8 sps:$4 sm:$0xff]   ;;  %v4449_v52 = vld [vmem:[#allocation2 + $0x290] ss:$8 sps:$4 sm:$0xff]  }
 0x169   : > { %1789 = vmatprep.subr.bf16.mxu0 %v4433_v43  ;;  %v813_v63 = vadd.f32 %v812_v53, %v5024_v32  ;;  %2136 = vmatprep.subr.bf16.mxu1 %v4436_v57  ;;  %v665_v12 = vmax.f32 %v621_v58, 0.0  ;;  %v855_v13 = vmax.f32 %v811_v59, 0.0  ;;  %v4454_v45 = vld [vmem:[#allocation2 + $0x394] ss:$8 sps:$4 sm:$0xff]   ;;  %v4452_v53 = vld [vmem:[#allocation2 + $0x390] ss:$8 sps:$4 sm:$0xff]  }
 0x16a   : > { %v626_v1 = vpop.f32.mrb[18].mxu0  ;;  %v816_v2 = vpop.f32.mrb[18].mxu1  ;;  %1145 = vmatprep.mubr.bf16.mxu0 %v872_v54  ;;  %1492 = vmatprep.mubr.bf16.mxu1 %v1217_v55  ;;  %v666_v17 = vmax.f32 %v623_v62, 0.0  ;;  %v4457_v58 = vld [vmem:[#allocation2 + $0x2a4] ss:$8 sps:$4 sm:$0xff]  }
 0x16b   : > { %v627_v4 = vadd.f32 %v626_v1, %v5015_v27  ;;  %v817_v5 = vadd.f32 %v816_v2, %v5018_v28  ;;  %v628_v6 = vpop.f32.mrb[19].mxu0  ;;  %v818_v7 = vpop.f32.mrb[19].mxu1  ;;  %1146 = vmatmul.mubr.bf16.gmra.mrb[40].mxu0 %v871_v50  ;;  %1493 = vmatmul.mubr.bf16.gmra.mrb[40].mxu1 %v1216_v51  ;;  %v856_v18 = vmax.f32 %v813_v63, 0.0 }
 0x16c   : > { %v629_v8 = vadd.f32 %v628_v6, %v5021_v30  ;;  %v819_v9 = vadd.f32 %v818_v7, %v5024_v32  ;;  %1790 = vmatpush1.bf16.msra.mxu0 %v4431_v56  ;;  %2137 = vmatpush1.bf16.msra.mxu1 %v4434_v60 }
 0x16d   : > { %v667_v14 = vmax.f32 %v627_v4, 0.0  ;;  %v857_v15 = vmax.f32 %v817_v5, 0.0  ;;  %1791 = vmatprep.subr.bf16.mxu0 %v4439_v61  ;;  %2138 = vmatprep.subr.bf16.mxu1 %v4442_v3 }
 0x16e   : > { %v668_v19 = vmax.f32 %v629_v8, 0.0  ;;  %v858_v20 = vmax.f32 %v819_v9, 0.0  ;;  %v632_v21 = vpop.f32.mrb[20].mxu0  ;;  %v822_v22 = vpop.f32.mrb[20].mxu1 }
 0x16f   : > { %v873_v24 = vpack.c.bf16 %v667_v14, %v665_v12  ;;  %v1218_v26 = vpack.c.bf16 %v857_v15, %v855_v13  ;;  %v634_v29 = vpop.f32.mrb[21].mxu0  ;;  %v824_v31 = vpop.f32.mrb[21].mxu1  ;;  %v633_v37 = vadd.f32 %v632_v21, %v5015_v27  ;;  %v823_v38 = vadd.f32 %v822_v22, %v5018_v28  ;;  %v4455_v12 = vld [vmem:[#allocation2 + $0x2a0] ss:$8 sps:$4 sm:$0xff]   ;;  %v4460_v13 = vld [vmem:[#allocation2 + $0x3a4] ss:$8 sps:$4 sm:$0xff]  }
 0x170   : > { %v874_v33 = vpack.c.bf16 %v668_v19, %v666_v17  ;;  %v1219_v34 = vpack.c.bf16 %v858_v20, %v856_v18  ;;  %1792 = vmatpush1.bf16.msra.mxu0 %v4437_v10  ;;  %2139 = vmatpush1.bf16.msra.mxu1 %v4440_v11  ;;  %v635_v41 = vadd.f32 %v634_v29, %v5021_v30  ;;  %v4458_v14 = vld [vmem:[#allocation2 + $0x3a0] ss:$8 sps:$4 sm:$0xff]   ;;  %v4463_v15 = vld [vmem:[#allocation2 + $0x2b4] ss:$8 sps:$4 sm:$0xff]   ;;  %v4464_v20 = vld [vmem:[#allocation2 + $0x3b0] ss:$8 sps:$4 sm:$0xff]  }
 0x171   : > { %1793 = vmatprep.subr.bf16.mxu0 %v4445_v16  ;;  %v825_v42 = vadd.f32 %v824_v31, %v5024_v32  ;;  %2140 = vmatprep.subr.bf16.mxu1 %v4448_v36  ;;  %v669_v54 = vmax.f32 %v633_v37, 0.0  ;;  %v859_v55 = vmax.f32 %v823_v38, 0.0  ;;  %v4466_v18 = vld [vmem:[#allocation2 + $0x3b4] ss:$8 sps:$4 sm:$0xff]   ;;  %v4469_v21 = vld [vmem:[#allocation2 + $0x2c4] ss:$8 sps:$4 sm:$0xff]  }
 0x172   : > { %v638_v43 = vpop.f32.mrb[22].mxu0  ;;  %v828_v44 = vpop.f32.mrb[22].mxu1  ;;  %1155 = vmatprep.mubr.bf16.mxu0 %v874_v33  ;;  %1502 = vmatprep.mubr.bf16.mxu1 %v1219_v34  ;;  %v670_v59 = vmax.f32 %v635_v41, 0.0  ;;  %v4472_v22 = vld [vmem:[#allocation2 + $0x3c4] ss:$8 sps:$4 sm:$0xff]  }
 0x173   : > { %v639_v46 = vadd.f32 %v638_v43, %v5015_v27  ;;  %v829_v47 = vadd.f32 %v828_v44, %v5018_v28  ;;  %v640_v48 = vpop.f32.mrb[23].mxu0  ;;  %v830_v49 = vpop.f32.mrb[23].mxu1  ;;  %1156 = vmatmul.mubr.bf16.gmra.mrb[44].mxu0 %v873_v24  ;;  %1503 = vmatmul.mubr.bf16.gmra.mrb[44].mxu1 %v1218_v26  ;;  %v860_v60 = vmax.f32 %v825_v42, 0.0  ;;  %v4467_v29 = vld [vmem:[#allocation2 + $0x2c0] ss:$8 sps:$4 sm:$0xff]  }
 0x174   : > { %v641_v50 = vadd.f32 %v640_v48, %v5021_v30  ;;  %v831_v51 = vadd.f32 %v830_v49, %v5024_v32  ;;  %1794 = vmatpush1.bf16.msra.mxu0 %v4443_v35  ;;  %2141 = vmatpush1.bf16.msra.mxu1 %v4446_v39  ;;  %v4470_v31 = vld [vmem:[#allocation2 + $0x3c0] ss:$8 sps:$4 sm:$0xff]   ;;  %v4475_v33 = vld [vmem:[#allocation2 + $0x2d4] ss:$8 sps:$4 sm:$0xff]   ;;  %v4473_v35 = vld [vmem:[#allocation2 + $0x2d0] ss:$8 sps:$4 sm:$0xff]  }
 0x175   : > { %v671_v56 = vmax.f32 %v639_v46, 0.0  ;;  %v861_v57 = vmax.f32 %v829_v47, 0.0  ;;  %1795 = vmatprep.subr.bf16.mxu0 %v4451_v40  ;;  %2142 = vmatprep.subr.bf16.mxu1 %v4454_v45  ;;  %v4478_v34 = vld [vmem:[#allocation2 + $0x3d4] ss:$8 sps:$4 sm:$0xff]   ;;  %v4476_v36 = vld [vmem:[#allocation2 + $0x3d0] ss:$8 sps:$4 sm:$0xff]  }
 0x176   : > { %v672_v61 = vmax.f32 %v641_v50, 0.0  ;;  %v862_v62 = vmax.f32 %v831_v51, 0.0  ;;  %v644_v63 = vpop.f32.mrb[24].mxu0  ;;  %v834_v1 = vpop.f32.mrb[24].mxu1  ;;  %v4481_v37 = vld [vmem:[#allocation2 + $0x2e4] ss:$8 sps:$4 sm:$0xff]  }
 0x177   : > { %v875_v2 = vpack.c.bf16 %v671_v56, %v669_v54  ;;  %v1220_v3 = vpack.c.bf16 %v861_v57, %v859_v55  ;;  %v645_v4 = vadd.f32 %v644_v63, %v5015_v27  ;;  %v646_v5 = vpop.f32.mrb[25].mxu0  ;;  %v835_v6 = vadd.f32 %v834_v1, %v5018_v28  ;;  %v836_v7 = vpop.f32.mrb[25].mxu1  ;;  %v4484_v38 = vld [vmem:[#allocation2 + $0x3e4] ss:$8 sps:$4 sm:$0xff]   ;;  %v4479_v39 = vld [vmem:[#allocation2 + $0x2e0] ss:$8 sps:$4 sm:$0xff]  }
 0x178   : > { %v876_v8 = vpack.c.bf16 %v672_v61, %v670_v59  ;;  %v1221_v9 = vpack.c.bf16 %v862_v62, %v860_v60  ;;  %v647_v10 = vadd.f32 %v646_v5, %v5021_v30  ;;  %v837_v11 = vadd.f32 %v836_v7, %v5024_v32  ;;  %1796 = vmatpush1.bf16.msra.mxu0 %v4449_v52  ;;  %v4461_v32 = vld [vmem:[#allocation2 + $0x2b0] ss:$8 sps:$4 sm:$0xff]   ;;  %v4482_v40 = vld [vmem:[#allocation2 + $0x3e0] ss:$8 sps:$4 sm:$0xff]   ;;  %v4487_v41 = vld [vmem:[#allocation2 + $0x2f4] ss:$8 sps:$4 sm:$0xff]  }
 0x179   : > { %2143 = vmatpush1.bf16.msra.mxu1 %v4452_v53  ;;  %1797 = vmatprep.subr.bf16.mxu0 %v4457_v58  ;;  %v673_v28 = vmax.f32 %v645_v4, 0.0  ;;  %v863_v17 = vmax.f32 %v835_v6, 0.0  ;;  %v4490_v42 = vld [vmem:[#allocation2 + $0x3f4] ss:$8 sps:$4 sm:$0xff]   ;;  %v4485_v43 = vld [vmem:[#allocation2 + $0x2f0] ss:$8 sps:$4 sm:$0xff]  }
 0x17a   : > { %1165 = vmatprep.mubr.bf16.mxu0 %v876_v8  ;;  %1512 = vmatprep.mubr.bf16.mxu1 %v1221_v9  ;;  %v674_v27 = vmax.f32 %v647_v10, 0.0  ;;  %v864_v16 = vmax.f32 %v837_v11, 0.0  ;;  %v4488_v44 = vld [vmem:[#allocation2 + $0x3f0] ss:$8 sps:$4 sm:$0xff]   ;;  %v4491_v45 = vld [vmem:[#allocation5 + $0x40] sm:$0xff]  }
 0x17b   : > { %1166 = vmatmul.mubr.bf16.gmra.mrb[48].mxu0 %v875_v2  ;;  %1513 = vmatmul.mubr.bf16.gmra.mrb[48].mxu1 %v1220_v3  ;;  %v877_v24 = vpack.c.bf16 %v673_v28, %v673_v28  ;;  %v1222_v26 = vpack.c.bf16 %v863_v17, %v863_v17  ;;  %v4493_v46 = vld [vmem:[#allocation5 + $0xc0] sm:$0xff]   ;;  %v911_v47 = vld [vmem:[%s5527_s4] sm:$0x3]  ;;  %v3660_v48 = vld [vmem:[%s5527_s4 + $0x2] sm:$0x3] }
 0x17c   : > { %v878_v19 = vpack.c.bf16 %v674_v27, %v674_v27  ;;  %v1223_v30 = vpack.c.bf16 %v864_v16, %v864_v16  ;;  %2144 = vmatprep.subr.bf16.mxu1 %v4460_v13  ;;  %1798 = vmatpush1.bf16.msra.mxu0 %v4455_v12  ;;  %v5085_v49 = vrot.slane %v911_v47, %v5004_v23 }
 0x17d   : > { %2145 = vmatpush1.bf16.msra.mxu1 %v4458_v14  ;;  %1799 = vmatprep.subr.bf16.mxu0 %v4463_v15  ;;  %v5088_v50 = vrot.slane %v3660_v48, %v5004_v23  ;;  %v5091_v51 = vrot.slane %v911_v47, %v5009_v25  ;;  %v5094_v52 = vrot.slane %v3660_v48, %v5009_v25  ;;  %v4501_v47 = vld [vmem:[#allocation5 + $0xd0] sm:$0xff]  }
 0x17e   : > { %1175 = vmatprep.mubr.bf16.mxu0 %v878_v19  ;;  %1522 = vmatprep.mubr.bf16.mxu1 %v1223_v30  ;;  %v4494_v19 = vld [vmem:[#allocation5 + $0x80] sm:$0xff]  }
 0x17f   : > { %2146 = vmatprep.subr.bf16.mxu1 %v4466_v18  ;;  %v4492_v18 = vld [vmem:[#allocation5] sm:$0xff]  }
 0x180   : > { %1800 = vmatpush1.bf16.msra.mxu0 %v4461_v32 }
 0x181   : > { %2147 = vmatpush1.bf16.msra.mxu1 %v4464_v20  ;;  %1801 = vmatprep.subr.bf16.mxu0 %v4469_v21 }
 0x182   : > { %2148 = vmatprep.subr.bf16.mxu1 %v4472_v22  ;;  %v4495_v22 = vld [vmem:[#allocation5 + $0x48] sm:$0xff]  }
 0x183   : > { %1176 = vmatmul.mubr.bf16.gmra.mrb[52].mxu0 %v877_v24  ;;  %1523 = vmatmul.mubr.bf16.gmra.mrb[52].mxu1 %v1222_v26  ;;  %v4497_v24 = vld [vmem:[#allocation5 + $0xc8] sm:$0xff]  }
 0x184   : > { %1802 = vmatpush1.bf16.msra.mxu0 %v4467_v29 }
 0x185   : > { %2149 = vmatpush1.bf16.msra.mxu1 %v4470_v31  ;;  %1803 = vmatprep.subr.bf16.mxu0 %v4475_v33 }
 0x186   : > { %2150 = vmatprep.subr.bf16.mxu1 %v4478_v34 }
 0x188   : > { %1804 = vmatpush1.bf16.msra.mxu0 %v4473_v35 }
 0x189   : > { %2151 = vmatpush1.bf16.msra.mxu1 %v4476_v36  ;;  %1805 = vmatprep.subr.bf16.mxu0 %v4481_v37 }
 0x18a   : > { %2152 = vmatprep.subr.bf16.mxu1 %v4484_v38 }
 0x18c   : > { %1806 = vmatpush1.bf16.msra.mxu0 %v4479_v39 }
 0x18d   : > { %2153 = vmatpush1.bf16.msra.mxu1 %v4482_v40  ;;  %1807 = vmatprep.subr.bf16.mxu0 %v4487_v41  ;;  %v4496_v40 = vld [vmem:[#allocation5 + $0x8] sm:$0xff]  }
 0x18e   : > { %2154 = vmatprep.subr.bf16.mxu1 %v4490_v42  ;;  %v4498_v41 = vld [vmem:[#allocation5 + $0x88] sm:$0xff]  }
 0x190   : > { %1808 = vmatpush1.bf16.msra.mxu0 %v4485_v43 }
 0x191   : > { %2155 = vmatpush1.bf16.msra.mxu1 %v4488_v44  ;;  %3866 = vmatprep.subr.bf16.mxu0 %v4491_v45 }
 0x192   : > { %3924 = vmatprep.subr.bf16.mxu1 %v4493_v46  ;;  %v4499_v46 = vld [vmem:[#allocation5 + $0x50] sm:$0xff]  }
 0x226   : > { %v1117_v53 = vpop.f32.mrb[28].mxu0  ;;  %v1464_v54 = vpop.f32.mrb[28].mxu1 }
 0x227   : > { %v1118_v55 = vadd.f32 %v1117_v53, %v5085_v49  ;;  %v1465_v56 = vadd.f32 %v1464_v54, %v5088_v50  ;;  %v1119_v57 = vpop.f32.mrb[29].mxu0  ;;  %v1466_v58 = vpop.f32.mrb[29].mxu1 }
 0x228   : > { %v1120_v59 = vadd.f32 %v1119_v57, %v5091_v51  ;;  %v1467_v60 = vadd.f32 %v1466_v58, %v5094_v52  ;;  %v1121_v61 = vpop.f32.mrb[30].mxu0  ;;  %v1468_v62 = vpop.f32.mrb[30].mxu1 }
 0x229   : > { %v1122_v63 = vadd.f32 %v1121_v61, %v5085_v49  ;;  %v1469_v1 = vadd.f32 %v1468_v62, %v5088_v50  ;;  %v1123_v2 = vpop.f32.mrb[31].mxu0  ;;  %v1470_v3 = vpop.f32.mrb[31].mxu1  ;;  %v1184_v6 = vmax.f32 %v1118_v55, 0.0  ;;  %v1531_v7 = vmax.f32 %v1465_v56, 0.0  ;;  %v4500_v62 = vld [vmem:[#allocation5 + $0x10] sm:$0xff]  }
 0x22a   : > { %v1124_v4 = vadd.f32 %v1123_v2, %v5091_v51  ;;  %v1471_v5 = vadd.f32 %v1470_v3, %v5094_v52  ;;  %v1185_v10 = vmax.f32 %v1120_v59, 0.0  ;;  %v1532_v11 = vmax.f32 %v1467_v60, 0.0 }
 0x22b   : > { %v1186_v8 = vmax.f32 %v1122_v63, 0.0  ;;  %v1533_v9 = vmax.f32 %v1469_v1, 0.0  ;;  %v4502_v63 = vld [vmem:[#allocation5 + $0x90] sm:$0xff]  }
 0x22c   : > { %v1187_v12 = vmax.f32 %v1124_v4, 0.0  ;;  %v1534_v13 = vmax.f32 %v1471_v5, 0.0  ;;  %v4503_v5 = vld [vmem:[#allocation5 + $0x58] sm:$0xff]  }
 0x22d   : > { %v1557_v14 = vpack.c.bf16 %v1186_v8, %v1184_v6  ;;  %v1904_v15 = vpack.c.bf16 %v1533_v9, %v1531_v7  ;;  %v4505_v6 = vld [vmem:[#allocation5 + $0xd8] sm:$0xff]  }
 0x22e   : > { %v1558_v27 = vpack.c.bf16 %v1187_v12, %v1185_v10  ;;  %v1905_v16 = vpack.c.bf16 %v1534_v13, %v1532_v11  ;;  %v1127_v28 = vpop.f32.mrb[32].mxu0  ;;  %v1474_v17 = vpop.f32.mrb[32].mxu1 }
 0x22f   : > { %v1128_v30 = vadd.f32 %v1127_v28, %v5085_v49  ;;  %v1475_v32 = vadd.f32 %v1474_v17, %v5088_v50  ;;  %v1129_v20 = vpop.f32.mrb[33].mxu0  ;;  %v1476_v21 = vpop.f32.mrb[33].mxu1  ;;  %v4506_v28 = vld [vmem:[#allocation5 + $0x98] sm:$0xff]  }
 0x230   : > { %v1130_v26 = vadd.f32 %v1129_v20, %v5091_v51  ;;  %v1477_v29 = vadd.f32 %v1476_v21, %v5094_v52  ;;  %v1131_v31 = vpop.f32.mrb[34].mxu0  ;;  %v1478_v33 = vpop.f32.mrb[34].mxu1  ;;  %1809 = vmatprep.mubr.bf16.mxu0 %v1558_v27  ;;  %2156 = vmatprep.mubr.bf16.mxu1 %v1905_v16  ;;  %v4504_v16 = vld [vmem:[#allocation5 + $0x18] sm:$0xff]   ;;  %v4509_v20 = vld [vmem:[#allocation5 + $0xe0] sm:$0xff]  }
 0x231   : > { %v1132_v34 = vadd.f32 %v1131_v31, %v5085_v49  ;;  %v1479_v35 = vadd.f32 %v1478_v33, %v5088_v50  ;;  %v1133_v36 = vpop.f32.mrb[35].mxu0  ;;  %v1480_v37 = vpop.f32.mrb[35].mxu1  ;;  %1810 = vmatmul.mubr.bf16.vlgmr.msra.gmra.mrb[56].mxu0 %v1557_v14  ;;  %2157 = vmatmul.mubr.bf16.vlgmr.msra.gmra.mrb[56].mxu1 %v1904_v15  ;;  %v1188_v42 = vmax.f32 %v1128_v30, 0.0  ;;  %v1535_v43 = vmax.f32 %v1475_v32, 0.0  ;;  %v4507_v32 = vld [vmem:[#allocation5 + $0x60] sm:$0xff]  }
 0x232   : > { %v1134_v38 = vadd.f32 %v1133_v36, %v5091_v51  ;;  %v1481_v39 = vadd.f32 %v1480_v37, %v5094_v52  ;;  %3867 = vmatpush3.bf16.msra.mxu0 %v4492_v18  ;;  %3925 = vmatpush3.bf16.msra.mxu1 %v4494_v19  ;;  %v1189_v48 = vmax.f32 %v1130_v26, 0.0  ;;  %v1536_v53 = vmax.f32 %v1477_v29, 0.0  ;;  %v4508_v37 = vld [vmem:[#allocation5 + $0x20] sm:$0xff]  }
 0x233   : > { %v1190_v44 = vmax.f32 %v1132_v34, 0.0  ;;  %v1537_v45 = vmax.f32 %v1479_v35, 0.0  ;;  %3868 = vmatprep.subr.bf16.mxu0 %v4495_v22  ;;  %3926 = vmatprep.subr.bf16.mxu1 %v4497_v24 }
 0x234   : > { %v1191_v54 = vmax.f32 %v1134_v38, 0.0  ;;  %v1538_v55 = vmax.f32 %v1481_v39, 0.0  ;;  %v4510_v38 = vld [vmem:[#allocation5 + $0xa0] sm:$0xff]  }
 0x235   : > { %v1559_v56 = vpack.c.bf16 %v1190_v44, %v1188_v42  ;;  %v1906_v57 = vpack.c.bf16 %v1537_v45, %v1535_v43  ;;  %v4511_v43 = vld [vmem:[#allocation5 + $0x68] sm:$0xff]  }
 0x236   : > { %v1560_v58 = vpack.c.bf16 %v1191_v54, %v1189_v48  ;;  %v1907_v59 = vpack.c.bf16 %v1538_v55, %v1536_v53  ;;  %v1137_v60 = vpop.f32.mrb[36].mxu0  ;;  %v1484_v61 = vpop.f32.mrb[36].mxu1  ;;  %3869 = vmatpush3.bf16.msra.mxu0 %v4496_v40  ;;  %3927 = vmatpush3.bf16.msra.mxu1 %v4498_v41  ;;  %v4513_v44 = vld [vmem:[#allocation5 + $0xe8] sm:$0xff]  }
 0x237   : > { %v1138_v1 = vadd.f32 %v1137_v60, %v5085_v49  ;;  %v1485_v2 = vadd.f32 %v1484_v61, %v5088_v50  ;;  %v1139_v3 = vpop.f32.mrb[37].mxu0  ;;  %v1486_v4 = vpop.f32.mrb[37].mxu1  ;;  %3870 = vmatprep.subr.bf16.mxu0 %v4499_v46  ;;  %3928 = vmatprep.subr.bf16.mxu1 %v4501_v47  ;;  %v4514_v60 = vld [vmem:[#allocation5 + $0xa8] sm:$0xff]  }
 0x238   : > { %v1140_v7 = vadd.f32 %v1139_v3, %v5091_v51  ;;  %v1487_v8 = vadd.f32 %v1486_v4, %v5094_v52  ;;  %v1141_v9 = vpop.f32.mrb[38].mxu0  ;;  %v1488_v10 = vpop.f32.mrb[38].mxu1  ;;  %1819 = vmatprep.mubr.bf16.mxu0 %v1560_v58  ;;  %2166 = vmatprep.mubr.bf16.mxu1 %v1907_v59  ;;  %v4512_v59 = vld [vmem:[#allocation5 + $0x28] sm:$0xff]   ;;  %v4517_v3 = vld [vmem:[#allocation5 + $0xf0] sm:$0xff]  }
 0x239   : > { %v1142_v11 = vadd.f32 %v1141_v9, %v5085_v49  ;;  %v1489_v12 = vadd.f32 %v1488_v10, %v5088_v50  ;;  %v1143_v13 = vpop.f32.mrb[39].mxu0  ;;  %v1490_v14 = vpop.f32.mrb[39].mxu1  ;;  %1820 = vmatmul.mubr.bf16.gmra.mrb[60].mxu0 %v1559_v56  ;;  %2167 = vmatmul.mubr.bf16.gmra.mrb[60].mxu1 %v1906_v57  ;;  %v1192_v17 = vmax.f32 %v1138_v1, 0.0  ;;  %v1539_v18 = vmax.f32 %v1485_v2, 0.0  ;;  %v4515_v2 = vld [vmem:[#allocation5 + $0x70] sm:$0xff]  }
 0x23a   : > { %v1144_v15 = vadd.f32 %v1143_v13, %v5091_v51  ;;  %v1491_v27 = vadd.f32 %v1490_v14, %v5094_v52  ;;  %3871 = vmatpush3.bf16.msra.mxu0 %v4500_v62  ;;  %3929 = vmatpush3.bf16.msra.mxu1 %v4502_v63  ;;  %v1193_v21 = vmax.f32 %v1140_v7, 0.0  ;;  %v1540_v22 = vmax.f32 %v1487_v8, 0.0  ;;  %v4516_v14 = vld [vmem:[#allocation5 + $0x30] sm:$0xff]  }
 0x23b   : > { %v1194_v19 = vmax.f32 %v1142_v11, 0.0  ;;  %v1541_v30 = vmax.f32 %v1489_v12, 0.0  ;;  %3872 = vmatprep.subr.bf16.mxu0 %v4503_v5  ;;  %3930 = vmatprep.subr.bf16.mxu1 %v4505_v6 }
 0x23c   : > { %v1195_v24 = vmax.f32 %v1144_v15, 0.0  ;;  %v1542_v26 = vmax.f32 %v1491_v27, 0.0  ;;  %v4518_v15 = vld [vmem:[#allocation5 + $0xb0] sm:$0xff]  }
 0x23d   : > { %v1561_v29 = vpack.c.bf16 %v1194_v19, %v1192_v17  ;;  %v1908_v31 = vpack.c.bf16 %v1541_v30, %v1539_v18 }
 0x23e   : > { %v1562_v33 = vpack.c.bf16 %v1195_v24, %v1193_v21  ;;  %v1909_v34 = vpack.c.bf16 %v1542_v26, %v1540_v22  ;;  %v1147_v35 = vpop.f32.mrb[40].mxu0  ;;  %v1494_v36 = vpop.f32.mrb[40].mxu1  ;;  %3873 = vmatpush3.bf16.msra.mxu0 %v4504_v16  ;;  %3931 = vmatpush3.bf16.msra.mxu1 %v4506_v28 }
 0x23f   : > { %v1148_v39 = vadd.f32 %v1147_v35, %v5085_v49  ;;  %v1495_v40 = vadd.f32 %v1494_v36, %v5088_v50  ;;  %v1149_v41 = vpop.f32.mrb[41].mxu0  ;;  %v1496_v42 = vpop.f32.mrb[41].mxu1  ;;  %3874 = vmatprep.subr.bf16.mxu0 %v4507_v32  ;;  %3932 = vmatprep.subr.bf16.mxu1 %v4509_v20 }
 0x240   : > { %v1150_v45 = vadd.f32 %v1149_v41, %v5091_v51  ;;  %v1497_v46 = vadd.f32 %v1496_v42, %v5094_v52  ;;  %v1151_v47 = vpop.f32.mrb[42].mxu0  ;;  %v1498_v48 = vpop.f32.mrb[42].mxu1  ;;  %1829 = vmatprep.mubr.bf16.mxu0 %v1562_v33  ;;  %2176 = vmatprep.mubr.bf16.mxu1 %v1909_v34 }
 0x241   : > { %v1152_v53 = vadd.f32 %v1151_v47, %v5085_v49  ;;  %v1499_v54 = vadd.f32 %v1498_v48, %v5088_v50  ;;  %v1153_v55 = vpop.f32.mrb[43].mxu0  ;;  %v1500_v56 = vpop.f32.mrb[43].mxu1  ;;  %1830 = vmatmul.mubr.bf16.gmra.mrb[64].mxu0 %v1561_v29  ;;  %2177 = vmatmul.mubr.bf16.gmra.mrb[64].mxu1 %v1908_v31  ;;  %v1196_v61 = vmax.f32 %v1148_v39, 0.0  ;;  %v1543_v62 = vmax.f32 %v1495_v40, 0.0 }
 0x242   : > { %v1154_v57 = vadd.f32 %v1153_v55, %v5091_v51  ;;  %v1501_v58 = vadd.f32 %v1500_v56, %v5094_v52  ;;  %3875 = vmatpush3.bf16.msra.mxu0 %v4508_v37  ;;  %3933 = vmatpush3.bf16.msra.mxu1 %v4510_v38  ;;  %v1197_v4 = vmax.f32 %v1150_v45, 0.0  ;;  %v1544_v5 = vmax.f32 %v1497_v46, 0.0 }
 0x243   : > { %v1198_v63 = vmax.f32 %v1152_v53, 0.0  ;;  %v1545_v1 = vmax.f32 %v1499_v54, 0.0  ;;  %3876 = vmatprep.subr.bf16.mxu0 %v4511_v43  ;;  %3934 = vmatprep.subr.bf16.mxu1 %v4513_v44 }
 0x244   : > { %v1199_v6 = vmax.f32 %v1154_v57, 0.0  ;;  %v1546_v7 = vmax.f32 %v1501_v58, 0.0 }
 0x245   : > { %v1563_v8 = vpack.c.bf16 %v1198_v63, %v1196_v61  ;;  %v1910_v9 = vpack.c.bf16 %v1545_v1, %v1543_v62 }
 0x246   : > { %v1564_v10 = vpack.c.bf16 %v1199_v6, %v1197_v4  ;;  %v1911_v11 = vpack.c.bf16 %v1546_v7, %v1544_v5  ;;  %v1157_v12 = vpop.f32.mrb[44].mxu0  ;;  %v1504_v13 = vpop.f32.mrb[44].mxu1  ;;  %3877 = vmatpush3.bf16.msra.mxu0 %v4512_v59  ;;  %3935 = vmatpush3.bf16.msra.mxu1 %v4514_v60 }
 0x247   : > { %v1158_v27 = vadd.f32 %v1157_v12, %v5085_v49  ;;  %v1505_v16 = vadd.f32 %v1504_v13, %v5088_v50  ;;  %v1159_v28 = vpop.f32.mrb[45].mxu0  ;;  %v1506_v17 = vpop.f32.mrb[45].mxu1  ;;  %3878 = vmatprep.subr.bf16.mxu0 %v4515_v2  ;;  %3936 = vmatprep.subr.bf16.mxu1 %v4517_v3 }
 0x248   : > { %v1160_v18 = vadd.f32 %v1159_v28, %v5091_v51  ;;  %v1507_v19 = vadd.f32 %v1506_v17, %v5094_v52  ;;  %v1161_v30 = vpop.f32.mrb[46].mxu0  ;;  %v1508_v32 = vpop.f32.mrb[46].mxu1  ;;  %1839 = vmatprep.mubr.bf16.mxu0 %v1564_v10  ;;  %2186 = vmatprep.mubr.bf16.mxu1 %v1911_v11 }
 0x249   : > { %v1162_v20 = vadd.f32 %v1161_v30, %v5085_v49  ;;  %v1509_v21 = vadd.f32 %v1508_v32, %v5088_v50  ;;  %v1163_v22 = vpop.f32.mrb[47].mxu0  ;;  %v1510_v24 = vpop.f32.mrb[47].mxu1  ;;  %1840 = vmatmul.mubr.bf16.gmra.mrb[68].mxu0 %v1563_v8  ;;  %2187 = vmatmul.mubr.bf16.gmra.mrb[68].mxu1 %v1910_v9  ;;  %v1200_v31 = vmax.f32 %v1158_v27, 0.0  ;;  %v1547_v33 = vmax.f32 %v1505_v16, 0.0 }
 0x24a   : > { %v1164_v26 = vadd.f32 %v1163_v22, %v5091_v51  ;;  %v1511_v29 = vadd.f32 %v1510_v24, %v5094_v52  ;;  %3879 = vmatpush3.bf16.msra.mxu0 %v4516_v14  ;;  %3937 = vmatpush3.bf16.msra.mxu1 %v4518_v15  ;;  %v1201_v36 = vmax.f32 %v1160_v18, 0.0  ;;  %v1548_v37 = vmax.f32 %v1507_v19, 0.0 }
 0x24b   : > { %v1202_v34 = vmax.f32 %v1162_v20, 0.0  ;;  %v1549_v35 = vmax.f32 %v1509_v21, 0.0 }
 0x24c   : > { %v1203_v38 = vmax.f32 %v1164_v26, 0.0  ;;  %v1550_v39 = vmax.f32 %v1511_v29, 0.0 }
 0x24d   : > { %v1565_v40 = vpack.c.bf16 %v1202_v34, %v1200_v31  ;;  %v1912_v41 = vpack.c.bf16 %v1549_v35, %v1547_v33  ;;  %v4520_v33 = vld [vmem:[#allocation5 + $0x38] sm:$0xff]  }
 0x24e   : > { %v1566_v42 = vpack.c.bf16 %v1203_v38, %v1201_v36  ;;  %v1913_v43 = vpack.c.bf16 %v1550_v39, %v1548_v37  ;;  %v1167_v44 = vpop.f32.mrb[48].mxu0  ;;  %v1514_v45 = vpop.f32.mrb[48].mxu1  ;;  %v4522_v34 = vld [vmem:[#allocation5 + $0xb8] sm:$0xff]  }
 0x24f   : > { %v1168_v46 = vadd.f32 %v1167_v44, %v5085_v49  ;;  %v1515_v47 = vadd.f32 %v1514_v45, %v5088_v50  ;;  %v1169_v48 = vpop.f32.mrb[49].mxu0  ;;  %v1516_v53 = vpop.f32.mrb[49].mxu1  ;;  %v3693_v35 = vld [vmem:[%s5527_s4 + $0x4] sm:$0x3]  ;;  %v3726_v36 = vld [vmem:[%s5527_s4 + $0x6] sm:$0x3] }
 0x250   : > { %v1170_v54 = vadd.f32 %v1169_v48, %v5091_v51  ;;  %v1517_v55 = vadd.f32 %v1516_v53, %v5094_v52  ;;  %v1171_v56 = vpop.f32.mrb[50].mxu0  ;;  %v1518_v57 = vpop.f32.mrb[50].mxu1  ;;  %1849 = vmatprep.mubr.bf16.mxu0 %v1566_v42  ;;  %2196 = vmatprep.mubr.bf16.mxu1 %v1913_v43  ;;  %v5157_v37 = vrot.slane %v3693_v35, %v5004_v23 }
 0x251   : > { %v1172_v58 = vadd.f32 %v1171_v56, %v5085_v49  ;;  %v1519_v59 = vadd.f32 %v1518_v57, %v5088_v50  ;;  %v1173_v60 = vpop.f32.mrb[51].mxu0  ;;  %v1520_v61 = vpop.f32.mrb[51].mxu1  ;;  %1850 = vmatmul.mubr.bf16.gmra.mrb[72].mxu0 %v1565_v40  ;;  %2197 = vmatmul.mubr.bf16.gmra.mrb[72].mxu1 %v1912_v41  ;;  %v1204_v1 = vmax.f32 %v1168_v46, 0.0  ;;  %v1551_v2 = vmax.f32 %v1515_v47, 0.0 }
 0x252   : > { %v1174_v62 = vadd.f32 %v1173_v60, %v5091_v51  ;;  %v1521_v63 = vadd.f32 %v1520_v61, %v5094_v52  ;;  %v1205_v5 = vmax.f32 %v1170_v54, 0.0  ;;  %v1552_v6 = vmax.f32 %v1517_v55, 0.0 }
 0x253   : > { %v1206_v3 = vmax.f32 %v1172_v58, 0.0  ;;  %v1553_v4 = vmax.f32 %v1519_v59, 0.0  ;;  %v5160_v38 = vrot.slane %v3726_v36, %v5004_v23  ;;  %v5163_v39 = vrot.slane %v3693_v35, %v5009_v25 }
 0x254   : > { %v1207_v7 = vmax.f32 %v1174_v62, 0.0  ;;  %v1554_v8 = vmax.f32 %v1521_v63, 0.0  ;;  %v5166_v40 = vrot.slane %v3726_v36, %v5009_v25 }
 0x255   : > { %v1567_v9 = vpack.c.bf16 %v1206_v3, %v1204_v1  ;;  %v1914_v10 = vpack.c.bf16 %v1553_v4, %v1551_v2 }
 0x256   : > { %v1568_v11 = vpack.c.bf16 %v1207_v7, %v1205_v5  ;;  %v1915_v12 = vpack.c.bf16 %v1554_v8, %v1552_v6  ;;  %v1177_v13 = vpop.f32.mrb[52].mxu0  ;;  %v1524_v14 = vpop.f32.mrb[52].mxu1 }
 0x257   : > { %v1178_v15 = vadd.f32 %v1177_v13, %v5085_v49  ;;  %v1179_v27 = vpop.f32.mrb[53].mxu0  ;;  %v1525_v16 = vadd.f32 %v1524_v14, %v5088_v50  ;;  %v1526_v28 = vpop.f32.mrb[53].mxu1 }
 0x258   : > { %1859 = vmatprep.mubr.bf16.mxu0 %v1568_v11  ;;  %2206 = vmatprep.mubr.bf16.mxu1 %v1915_v12  ;;  %v1180_v17 = vadd.f32 %v1179_v27, %v5091_v51  ;;  %v1527_v18 = vadd.f32 %v1526_v28, %v5094_v52  ;;  %v1181_v19 = vpop.f32.mrb[54].mxu0  ;;  %v1528_v30 = vpop.f32.mrb[54].mxu1  ;;  %v4519_v51 = vld [vmem:[#allocation5 + $0x78] sm:$0xff]  }
 0x259   : > { %1860 = vmatmul.mubr.bf16.gmra.mrb[76].mxu0 %v1567_v9  ;;  %2207 = vmatmul.mubr.bf16.gmra.mrb[76].mxu1 %v1914_v10  ;;  %v1208_v32 = vmax.f32 %v1178_v15, 0.0  ;;  %v1555_v20 = vmax.f32 %v1525_v16, 0.0  ;;  %v1182_v21 = vpop.f32.mrb[55].mxu0  ;;  %v1529_v22 = vpop.f32.mrb[55].mxu1  ;;  %v4521_v52 = vld [vmem:[#allocation5 + $0xf8] sm:$0xff]  }
 0x25a   : > { %v1209_v24 = vmax.f32 %v1180_v17, 0.0  ;;  %v1556_v49 = vmax.f32 %v1527_v18, 0.0  ;;  %3880 = vmatprep.subr.bf16.mxu0 %v4519_v51  ;;  %3938 = vmatprep.subr.bf16.mxu1 %v4521_v52  ;;  %v4523_v10 = vld [vmem:[%s5530_s7] sm:$0xff]   ;;  %v4524_v21 = vld [vmem:[%s5530_s7 + $0x8] sm:$0xff]  }
 0x25b   : > { %v1569_v50 = vpack.c.bf16 %v1208_v32, %v1208_v32  ;;  %v1916_v31 = vpack.c.bf16 %v1555_v20, %v1555_v20  ;;  %3881 = vmatpush3.bf16.msra.mxu0 %v4520_v33  ;;  %3939 = vmatpush3.bf16.msra.mxu1 %v4522_v34 }
 0x25c   : > { %v1570_v26 = vpack.c.bf16 %v1209_v24, %v1209_v24  ;;  %v1917_v29 = vpack.c.bf16 %v1556_v49, %v1556_v49  ;;  %4042 = vmatprep.subr.bf16.mxu0 %v4718_v0  ;;  %4086 = vmatprep.subr.bf16.mxu1 %v4718_v0 }
 0x25e   : > { %1869 = vmatprep.mubr.bf16.mxu0 %v1570_v26  ;;  %2216 = vmatprep.mubr.bf16.mxu1 %v1917_v29 }
 0x261   : > { %1870 = vmatmul.mubr.bf16.gmra.mrb[80].mxu0 %v1569_v50  ;;  %2217 = vmatmul.mubr.bf16.gmra.mrb[80].mxu1 %v1916_v31 }
 0x304   : > { %v1811_v41 = vpop.f32.mrb[56].mxu0  ;;  %v2158_v42 = vpop.f32.mrb[56].mxu1 }
 0x305   : > { %v1812_v43 = vadd.f32 %v1811_v41, %v5157_v37  ;;  %v2159_v44 = vadd.f32 %v2158_v42, %v5160_v38  ;;  %v1813_v45 = vpop.f32.mrb[57].mxu0  ;;  %v2160_v46 = vpop.f32.mrb[57].mxu1  ;;  %v4525_v42 = vld [vmem:[%s5530_s7 + $0x10] sm:$0xff]  }
 0x306   : > { %v1814_v47 = vadd.f32 %v1813_v45, %v5163_v39  ;;  %v2161_v48 = vadd.f32 %v2160_v46, %v5166_v40  ;;  %v1815_v23 = vpop.f32.mrb[58].mxu0  ;;  %v2162_v53 = vpop.f32.mrb[58].mxu1 }
 0x307   : > { %v1816_v54 = vadd.f32 %v1815_v23, %v5157_v37  ;;  %v2163_v55 = vadd.f32 %v2162_v53, %v5160_v38  ;;  %v1817_v25 = vpop.f32.mrb[59].mxu0  ;;  %v2164_v56 = vpop.f32.mrb[59].mxu1  ;;  %v1878_v59 = vmax.f32 %v1812_v43, 0.0  ;;  %v2225_v60 = vmax.f32 %v2159_v44, 0.0 }
 0x308   : > { %v1818_v57 = vadd.f32 %v1817_v25, %v5163_v39  ;;  %v2165_v58 = vadd.f32 %v2164_v56, %v5166_v40  ;;  %v1879_v63 = vmax.f32 %v1814_v47, 0.0  ;;  %v2226_v1 = vmax.f32 %v2161_v48, 0.0 }
 0x309   : > { %v1880_v61 = vmax.f32 %v1816_v54, 0.0  ;;  %v2227_v62 = vmax.f32 %v2163_v55, 0.0 }
 0x30a   : > { %v1881_v2 = vmax.f32 %v1818_v57, 0.0  ;;  %v2228_v3 = vmax.f32 %v2165_v58, 0.0 }
 0x30b   : > { %v2252_v4 = vpack.c.bf16 %v1880_v61, %v1878_v59  ;;  %v2501_v5 = vpack.c.bf16 %v2227_v62, %v2225_v60  ;;  %v4526_v59 = vld [vmem:[%s5530_s7 + $0x18] sm:$0xff]  }
 0x30c   : > { %v2253_v6 = vpack.c.bf16 %v1881_v2, %v1879_v63  ;;  %v2502_v7 = vpack.c.bf16 %v2228_v3, %v2226_v1  ;;  %v1821_v8 = vpop.f32.mrb[60].mxu0  ;;  %v2168_v9 = vpop.f32.mrb[60].mxu1 }
 0x30d   : > { %v1822_v11 = vadd.f32 %v1821_v8, %v5157_v37  ;;  %v2169_v12 = vadd.f32 %v2168_v9, %v5160_v38  ;;  %v1823_v13 = vpop.f32.mrb[61].mxu0  ;;  %v2170_v14 = vpop.f32.mrb[61].mxu1 }
 0x30e   : > { %v1824_v15 = vadd.f32 %v1823_v13, %v5163_v39  ;;  %v2171_v27 = vadd.f32 %v2170_v14, %v5166_v40  ;;  %v1825_v16 = vpop.f32.mrb[62].mxu0  ;;  %v2172_v28 = vpop.f32.mrb[62].mxu1  ;;  %2426 = vmatprep.mubr.bf16.mxu0 %v2253_v6  ;;  %2676 = vmatprep.mubr.bf16.mxu1 %v2502_v7 }
 0x30f   : > { %v1826_v17 = vadd.f32 %v1825_v16, %v5157_v37  ;;  %v2173_v18 = vadd.f32 %v2172_v28, %v5160_v38  ;;  %v1827_v19 = vpop.f32.mrb[63].mxu0  ;;  %v2174_v30 = vpop.f32.mrb[63].mxu1  ;;  %2427 = vmatmul.mubr.bf16.vlgmr.msra.gmra.mrb[84].mxu0 %v2252_v4  ;;  %2677 = vmatmul.mubr.bf16.vlgmr.msra.gmra.mrb[84].mxu1 %v2501_v5  ;;  %v1882_v22 = vmax.f32 %v1822_v11, 0.0  ;;  %v2229_v24 = vmax.f32 %v2169_v12, 0.0  ;;  %v4527_v11 = vld [vmem:[%s5530_s7 + $0x20] sm:$0xff]  }
 0x310   : > { %v1828_v32 = vadd.f32 %v1827_v19, %v5163_v39  ;;  %v2175_v20 = vadd.f32 %v2174_v30, %v5166_v40  ;;  %4043 = vmatpush3.bf16.msra.mxu0 %v4523_v10  ;;  %v1883_v29 = vmax.f32 %v1824_v15, 0.0  ;;  %v2230_v50 = vmax.f32 %v2171_v27, 0.0 }
 0x311   : > { %v1884_v49 = vmax.f32 %v1826_v17, 0.0  ;;  %v2231_v26 = vmax.f32 %v2173_v18, 0.0  ;;  %4044 = vmatprep.subr.bf16.mxu0 %v4718_v0 }
 0x312   : > { %v1885_v31 = vmax.f32 %v1828_v32, 0.0  ;;  %v2232_v51 = vmax.f32 %v2175_v20, 0.0 }
 0x313   : > { %v2254_v52 = vpack.c.bf16 %v1884_v49, %v1882_v22  ;;  %v2503_v33 = vpack.c.bf16 %v2231_v26, %v2229_v24  ;;  %v4528_v22 = vld [vmem:[%s5530_s7 + $0x28] sm:$0xff]  }
 0x314   : > { %v2255_v34 = vpack.c.bf16 %v1885_v31, %v1883_v29  ;;  %v2504_v35 = vpack.c.bf16 %v2232_v51, %v2230_v50  ;;  %v1831_v36 = vpop.f32.mrb[64].mxu0  ;;  %v2178_v41 = vpop.f32.mrb[64].mxu1  ;;  %4045 = vmatpush3.bf16.msra.mxu0 %v4524_v21 }
 0x315   : > { %v1832_v43 = vadd.f32 %v1831_v36, %v5157_v37  ;;  %v2179_v44 = vadd.f32 %v2178_v41, %v5160_v38  ;;  %v1833_v45 = vpop.f32.mrb[65].mxu0  ;;  %v2180_v46 = vpop.f32.mrb[65].mxu1  ;;  %4046 = vmatprep.subr.bf16.mxu0 %v4718_v0 }
 0x316   : > { %v1834_v47 = vadd.f32 %v1833_v45, %v5163_v39  ;;  %v2181_v48 = vadd.f32 %v2180_v46, %v5166_v40  ;;  %v1835_v23 = vpop.f32.mrb[66].mxu0  ;;  %v2182_v53 = vpop.f32.mrb[66].mxu1  ;;  %2434 = vmatprep.mubr.bf16.mxu0 %v2255_v34  ;;  %2684 = vmatprep.mubr.bf16.mxu1 %v2504_v35 }
 0x317   : > { %v1836_v54 = vadd.f32 %v1835_v23, %v5157_v37  ;;  %v2183_v55 = vadd.f32 %v2182_v53, %v5160_v38  ;;  %v1837_v25 = vpop.f32.mrb[67].mxu0  ;;  %v2184_v56 = vpop.f32.mrb[67].mxu1  ;;  %2435 = vmatmul.mubr.bf16.gmra.mrb[88].mxu0 %v2254_v52  ;;  %2685 = vmatmul.mubr.bf16.gmra.mrb[88].mxu1 %v2503_v33  ;;  %v1886_v60 = vmax.f32 %v1832_v43, 0.0  ;;  %v2233_v61 = vmax.f32 %v2179_v44, 0.0 }
 0x318   : > { %v1838_v57 = vadd.f32 %v1837_v25, %v5163_v39  ;;  %v2185_v58 = vadd.f32 %v2184_v56, %v5166_v40  ;;  %4047 = vmatpush3.bf16.msra.mxu0 %v4525_v42  ;;  %v1887_v1 = vmax.f32 %v1834_v47, 0.0  ;;  %v2234_v2 = vmax.f32 %v2181_v48, 0.0 }
 0x319   : > { %v1888_v62 = vmax.f32 %v1836_v54, 0.0  ;;  %v2235_v63 = vmax.f32 %v2183_v55, 0.0  ;;  %4048 = vmatprep.subr.bf16.mxu0 %v4718_v0 }
 0x31a   : > { %v1889_v3 = vmax.f32 %v1838_v57, 0.0  ;;  %v2236_v4 = vmax.f32 %v2185_v58, 0.0 }
 0x31b   : > { %v2256_v5 = vpack.c.bf16 %v1888_v62, %v1886_v60  ;;  %v2505_v6 = vpack.c.bf16 %v2235_v63, %v2233_v61 }
 0x31c   : > { %v2257_v7 = vpack.c.bf16 %v1889_v3, %v1887_v1  ;;  %v2506_v8 = vpack.c.bf16 %v2236_v4, %v2234_v2  ;;  %v1841_v9 = vpop.f32.mrb[68].mxu0  ;;  %v2188_v10 = vpop.f32.mrb[68].mxu1  ;;  %4049 = vmatpush3.bf16.msra.mxu0 %v4526_v59 }
 0x31d   : > { %v1842_v12 = vadd.f32 %v1841_v9, %v5157_v37  ;;  %v2189_v13 = vadd.f32 %v2188_v10, %v5160_v38  ;;  %v1843_v14 = vpop.f32.mrb[69].mxu0  ;;  %v2190_v15 = vpop.f32.mrb[69].mxu1  ;;  %4050 = vmatprep.subr.bf16.mxu0 %v4718_v0 }
 0x31e   : > { %v1844_v27 = vadd.f32 %v1843_v14, %v5163_v39  ;;  %v2191_v16 = vadd.f32 %v2190_v15, %v5166_v40  ;;  %v1845_v28 = vpop.f32.mrb[70].mxu0  ;;  %v2192_v17 = vpop.f32.mrb[70].mxu1  ;;  %2442 = vmatprep.mubr.bf16.mxu0 %v2257_v7  ;;  %2692 = vmatprep.mubr.bf16.mxu1 %v2506_v8 }
 0x31f   : > { %v1846_v18 = vadd.f32 %v1845_v28, %v5157_v37  ;;  %v2193_v19 = vadd.f32 %v2192_v17, %v5160_v38  ;;  %v1847_v30 = vpop.f32.mrb[71].mxu0  ;;  %v2194_v32 = vpop.f32.mrb[71].mxu1  ;;  %2443 = vmatmul.mubr.bf16.gmra.mrb[92].mxu0 %v2256_v5  ;;  %2693 = vmatmul.mubr.bf16.gmra.mrb[92].mxu1 %v2505_v6  ;;  %v1890_v24 = vmax.f32 %v1842_v12, 0.0  ;;  %v2237_v49 = vmax.f32 %v2189_v13, 0.0 }
 0x320   : > { %v1848_v20 = vadd.f32 %v1847_v30, %v5163_v39  ;;  %v2195_v21 = vadd.f32 %v2194_v32, %v5166_v40  ;;  %4051 = vmatpush3.bf16.msra.mxu0 %v4527_v11  ;;  %v1891_v50 = vmax.f32 %v1844_v27, 0.0  ;;  %v2238_v31 = vmax.f32 %v2191_v16, 0.0 }
 0x321   : > { %v1892_v26 = vmax.f32 %v1846_v18, 0.0  ;;  %v2239_v29 = vmax.f32 %v2193_v19, 0.0  ;;  %4052 = vmatprep.subr.bf16.mxu0 %v4718_v0 }
 0x322   : > { %v1893_v51 = vmax.f32 %v1848_v20, 0.0  ;;  %v2240_v52 = vmax.f32 %v2195_v21, 0.0 }
 0x323   : > { %v2258_v33 = vpack.c.bf16 %v1892_v26, %v1890_v24  ;;  %v2507_v34 = vpack.c.bf16 %v2239_v29, %v2237_v49 }
 0x324   : > { %v2259_v35 = vpack.c.bf16 %v1893_v51, %v1891_v50  ;;  %v2508_v36 = vpack.c.bf16 %v2240_v52, %v2238_v31  ;;  %v1851_v41 = vpop.f32.mrb[72].mxu0  ;;  %v2198_v42 = vpop.f32.mrb[72].mxu1  ;;  %4053 = vmatpush3.bf16.msra.mxu0 %v4528_v22 }
 0x325   : > { %v1852_v43 = vadd.f32 %v1851_v41, %v5157_v37  ;;  %v2199_v44 = vadd.f32 %v2198_v42, %v5160_v38  ;;  %v1853_v45 = vpop.f32.mrb[73].mxu0  ;;  %v2200_v46 = vpop.f32.mrb[73].mxu1  ;;  %4054 = vmatprep.subr.bf16.mxu0 %v4718_v0 }
 0x326   : > { %v1854_v47 = vadd.f32 %v1853_v45, %v5163_v39  ;;  %v2201_v48 = vadd.f32 %v2200_v46, %v5166_v40  ;;  %v1855_v23 = vpop.f32.mrb[74].mxu0  ;;  %v2202_v53 = vpop.f32.mrb[74].mxu1  ;;  %2450 = vmatprep.mubr.bf16.mxu0 %v2259_v35  ;;  %2700 = vmatprep.mubr.bf16.mxu1 %v2508_v36 }
 0x327   : > { %v1856_v54 = vadd.f32 %v1855_v23, %v5157_v37  ;;  %v2203_v55 = vadd.f32 %v2202_v53, %v5160_v38  ;;  %v1857_v25 = vpop.f32.mrb[75].mxu0  ;;  %v2204_v56 = vpop.f32.mrb[75].mxu1  ;;  %2451 = vmatmul.mubr.bf16.gmra.mrb[96].mxu0 %v2258_v33  ;;  %2701 = vmatmul.mubr.bf16.gmra.mrb[96].mxu1 %v2507_v34  ;;  %v1894_v59 = vmax.f32 %v1852_v43, 0.0  ;;  %v2241_v60 = vmax.f32 %v2199_v44, 0.0 }
 0x328   : > { %v1858_v57 = vadd.f32 %v1857_v25, %v5163_v39  ;;  %v2205_v58 = vadd.f32 %v2204_v56, %v5166_v40  ;;  %v1895_v63 = vmax.f32 %v1854_v47, 0.0  ;;  %v2242_v1 = vmax.f32 %v2201_v48, 0.0 }
 0x329   : > { %v1896_v61 = vmax.f32 %v1856_v54, 0.0  ;;  %v2243_v62 = vmax.f32 %v2203_v55, 0.0 }
 0x32a   : > { %v1897_v2 = vmax.f32 %v1858_v57, 0.0  ;;  %v2244_v3 = vmax.f32 %v2205_v58, 0.0  ;;  %v4531_v58 = vld [vmem:[%s5530_s7 + $0x40] sm:$0xff]  }
 0x32b   : > { %v2260_v4 = vpack.c.bf16 %v1896_v61, %v1894_v59  ;;  %v2509_v5 = vpack.c.bf16 %v2243_v62, %v2241_v60  ;;  %4087 = vmatpush3.bf16.msra.mxu1 %v4531_v58  ;;  %v4532_v59 = vld [vmem:[%s5530_s7 + $0x48] sm:$0xff]   ;;  %v4533_v60 = vld [vmem:[%s5530_s7 + $0x50] sm:$0xff]   ;;  %v4534_v61 = vld [vmem:[%s5530_s7 + $0x58] sm:$0xff]  }
 0x32c   : > { %v2261_v6 = vpack.c.bf16 %v1897_v2, %v1895_v63  ;;  %v2510_v7 = vpack.c.bf16 %v2244_v3, %v2242_v1  ;;  %v1861_v8 = vpop.f32.mrb[76].mxu0  ;;  %v2208_v9 = vpop.f32.mrb[76].mxu1  ;;  %4088 = vmatprep.subr.bf16.mxu1 %v4718_v0  ;;  %v4535_v62 = vld [vmem:[%s5530_s7 + $0x60] sm:$0xff]   ;;  %v4536_v63 = vld [vmem:[%s5530_s7 + $0x68] sm:$0xff]   ;;  %v4537_v1 = vld [vmem:[%s5530_s7 + $0x70] sm:$0xff]  }
 0x32d   : > { %v1862_v10 = vadd.f32 %v1861_v8, %v5157_v37  ;;  %v2209_v11 = vadd.f32 %v2208_v9, %v5160_v38  ;;  %v1863_v12 = vpop.f32.mrb[77].mxu0  ;;  %v2210_v13 = vpop.f32.mrb[77].mxu1 }
 0x32e   : > { %v1864_v14 = vadd.f32 %v1863_v12, %v5163_v39  ;;  %v2211_v15 = vadd.f32 %v2210_v13, %v5166_v40  ;;  %v1865_v27 = vpop.f32.mrb[78].mxu0  ;;  %v2212_v16 = vpop.f32.mrb[78].mxu1  ;;  %2458 = vmatprep.mubr.bf16.mxu0 %v2261_v6  ;;  %2708 = vmatprep.mubr.bf16.mxu1 %v2510_v7 }
 0x32f   : > { %v1866_v28 = vadd.f32 %v1865_v27, %v5157_v37  ;;  %v2213_v17 = vadd.f32 %v2212_v16, %v5160_v38  ;;  %v1867_v18 = vpop.f32.mrb[79].mxu0  ;;  %v2214_v19 = vpop.f32.mrb[79].mxu1  ;;  %2459 = vmatmul.mubr.bf16.gmra.mrb[100].mxu0 %v2260_v4  ;;  %2709 = vmatmul.mubr.bf16.gmra.mrb[100].mxu1 %v2509_v5  ;;  %v1898_v20 = vmax.f32 %v1862_v10, 0.0  ;;  %v2245_v21 = vmax.f32 %v2209_v11, 0.0  ;;  %v5287_v4 = vld [vmem:[%s5529_s6] ss:$0 sm:$0xff] }
 0x330   : > { %v1868_v30 = vadd.f32 %v1867_v18, %v5163_v39  ;;  %v2215_v32 = vadd.f32 %v2214_v19, %v5166_v40  ;;  %v1899_v49 = vmax.f32 %v1864_v14, 0.0  ;;  %v2246_v26 = vmax.f32 %v2211_v15, 0.0  ;;  %4089 = vmatpush3.bf16.msra.mxu1 %v4532_v59 }
 0x331   : > { %v1900_v22 = vmax.f32 %v1866_v28, 0.0  ;;  %v2247_v24 = vmax.f32 %v2213_v17, 0.0  ;;  %4090 = vmatprep.subr.bf16.mxu1 %v4718_v0 }
 0x332   : > { %v1901_v29 = vmax.f32 %v1868_v30, 0.0  ;;  %v2248_v50 = vmax.f32 %v2215_v32, 0.0 }
 0x333   : > { %v2262_v31 = vpack.c.bf16 %v1900_v22, %v1898_v20  ;;  %v2511_v51 = vpack.c.bf16 %v2247_v24, %v2245_v21 }
 0x334   : > { %v2263_v52 = vpack.c.bf16 %v1901_v29, %v1899_v49  ;;  %v2512_v33 = vpack.c.bf16 %v2248_v50, %v2246_v26  ;;  %v1871_v34 = vpop.f32.mrb[80].mxu0  ;;  %v2218_v35 = vpop.f32.mrb[80].mxu1  ;;  %4091 = vmatpush3.bf16.msra.mxu1 %v4533_v60 }
 0x335   : > { %v1872_v36 = vadd.f32 %v1871_v34, %v5157_v37  ;;  %v1873_v41 = vpop.f32.mrb[81].mxu0  ;;  %v2219_v42 = vadd.f32 %v2218_v35, %v5160_v38  ;;  %v2220_v43 = vpop.f32.mrb[81].mxu1  ;;  %4092 = vmatprep.subr.bf16.mxu1 %v4718_v0 }
 0x336   : > { %2466 = vmatprep.mubr.bf16.mxu0 %v2263_v52  ;;  %2716 = vmatprep.mubr.bf16.mxu1 %v2512_v33  ;;  %v1874_v44 = vadd.f32 %v1873_v41, %v5163_v39  ;;  %v2221_v45 = vadd.f32 %v2220_v43, %v5166_v40  ;;  %v1875_v46 = vpop.f32.mrb[82].mxu0  ;;  %v2222_v47 = vpop.f32.mrb[82].mxu1  ;;  %v4529_v39 = vld [vmem:[%s5530_s7 + $0x30] sm:$0xff]   ;;  %v4530_v40 = vld [vmem:[%s5530_s7 + $0x38] sm:$0xff]  }
 0x337   : > { %v1902_v48 = vmax.f32 %v1872_v36, 0.0  ;;  %v2249_v23 = vmax.f32 %v2219_v42, 0.0  ;;  %2467 = vmatmul.mubr.bf16.gmra.mrb[104].mxu0 %v2262_v31  ;;  %2717 = vmatmul.mubr.bf16.gmra.mrb[104].mxu1 %v2511_v51  ;;  %v1876_v53 = vpop.f32.mrb[83].mxu0  ;;  %v2223_v54 = vpop.f32.mrb[83].mxu1 }
 0x338   : > { %v1903_v55 = vmax.f32 %v1874_v44, 0.0  ;;  %v2250_v37 = vmax.f32 %v2221_v45, 0.0  ;;  %4055 = vmatpush3.bf16.msra.mxu0 %v4529_v39  ;;  %4093 = vmatpush3.bf16.msra.mxu1 %v4534_v61 }
 0x339   : > { %v2264_v38 = vpack.c.bf16 %v1902_v48, %v1902_v48  ;;  %v2513_v57 = vpack.c.bf16 %v2249_v23, %v2249_v23  ;;  %4056 = vmatprep.subr.bf16.mxu0 %v4718_v0  ;;  %4094 = vmatprep.subr.bf16.mxu1 %v4718_v0 }
 0x33a   : > { %v2265_v25 = vpack.c.bf16 %v1903_v55, %v1903_v55  ;;  %v2514_v56 = vpack.c.bf16 %v2250_v37, %v2250_v37 }
 0x33c   : > { %2474 = vmatprep.mubr.bf16.mxu0 %v2265_v25  ;;  %2724 = vmatprep.mubr.bf16.mxu1 %v2514_v56 }
 0x33d   : > { %4057 = vmatpush3.bf16.msra.mxu0 %v4530_v40  ;;  %4095 = vmatpush3.bf16.msra.mxu1 %v4535_v62 }
 0x33e   : > { %4130 = vmatprep.subr.bf16.mxu0 %v4718_v0  ;;  %4096 = vmatprep.subr.bf16.mxu1 %v4718_v0 }
 0x33f   : > { %2475 = vmatmul.mubr.bf16.gmra.mrb[108].mxu0 %v2264_v38  ;;  %2725 = vmatmul.mubr.bf16.gmra.mrb[108].mxu1 %v2513_v57 }
 0x340   : > { %4058 = vmatprep.mubr.msk.bf16.mxu0 %vm4719_vm2, %v4718_v0  ;;  %4102 = vmatprep.mubr.msk.bf16.mxu1 %vm4719_vm2, %v4718_v0 }
 0x341   : > { %4097 = vmatpush3.bf16.msra.mxu1 %v4536_v63 }
 0x342   : > { %4098 = vmatprep.subr.bf16.mxu1 %v4718_v0 }
 0x345   : > { %4099 = vmatpush3.bf16.msra.mxu1 %v4537_v1 }
 0x346   : > { %4100 = vmatprep.subr.bf16.mxu1 %v4718_v0 }
 0x3e2   : > { %v3882_v2 = vpop.f32.mrb[84].mxu0  ;;  %v3940_v3 = vpop.f32.mrb[84].mxu1 }
 0x3e3   : > { %v3883_v5 = vpop.f32.mrb[85].mxu0  ;;  %v3941_v6 = vpop.f32.mrb[85].mxu1 }
 0x3e4   : > { %v3884_v7 = vadd.f32 %v3883_v5, %v3882_v2  ;;  %v3942_v8 = vadd.f32 %v3941_v6, %v3940_v3  ;;  %v3885_v9 = vpop.f32.mrb[86].mxu0  ;;  %v3943_v10 = vpop.f32.mrb[86].mxu1 }
 0x3e5   : > { %v3886_v11 = vpop.f32.mrb[87].mxu0  ;;  %v3944_v12 = vpop.f32.mrb[87].mxu1 }
 0x3e6   : > { %v2488_v13 = vadd.f32 %v3884_v7, %v5287_v4  ;;  %v3887_v14 = vadd.f32 %v3886_v11, %v3885_v9  ;;  %v3945_v15 = vadd.f32 %v3944_v12, %v3943_v10 }
 0x3e8   : > { %v2732_v27 = vadd.f32 %v3942_v8, %v2488_v13  ;;  %v2489_v16 = vadd.f32 %v3887_v14, %v5287_v4 }
 0x3ea   : > { %v2733_v28 = vadd.f32 %v3945_v15, %v2489_v16  ;;  %v3888_v17 = vpop.f32.mrb[88].mxu0  ;;  %v3946_v18 = vpop.f32.mrb[88].mxu1  ;;  %v2745_v32 = vmax.f32 %v2732_v27, 0.0 }
 0x3eb   : > { %v3889_v19 = vpop.f32.mrb[89].mxu0  ;;  %v3947_v30 = vpop.f32.mrb[89].mxu1 }
 0x3ec   : > { %v2746_v20 = vmax.f32 %v2733_v28, 0.0  ;;  %v3890_v21 = vadd.f32 %v3889_v19, %v3888_v17  ;;  %v3948_v22 = vadd.f32 %v3947_v30, %v3946_v18  ;;  %v3891_v24 = vpop.f32.mrb[90].mxu0  ;;  %v3949_v49 = vpop.f32.mrb[90].mxu1 }
 0x3ed   : > { %v3892_v26 = vpop.f32.mrb[91].mxu0  ;;  %v3950_v29 = vpop.f32.mrb[91].mxu1 }
 0x3ee   : > { %v2758_v50 = vpack.c.bf16 %v2746_v20, %v2745_v32  ;;  %v2490_v31 = vadd.f32 %v3890_v21, %v5287_v4  ;;  %v3893_v51 = vadd.f32 %v3892_v26, %v3891_v24  ;;  %v3951_v52 = vadd.f32 %v3950_v29, %v3949_v49 }
 0x3f0   : > { %v2734_v33 = vadd.f32 %v3948_v22, %v2490_v31  ;;  %v2491_v34 = vadd.f32 %v3893_v51, %v5287_v4  ;;  %4059 = vmatmul.mubr.bf16.vlgmr.msra.gmra.mrb[112].mxu0 %v2758_v50 }
 0x3f1   : > { %4062 = vmatprep.mubr.msk.bf16.mxu0 %vm4719_vm2, %v4718_v0 }
 0x3f2   : > { %v2735_v35 = vadd.f32 %v3951_v52, %v2491_v34  ;;  %v3894_v36 = vpop.f32.mrb[92].mxu0  ;;  %v3952_v41 = vpop.f32.mrb[92].mxu1  ;;  %v2747_v44 = vmax.f32 %v2734_v33, 0.0 }
 0x3f3   : > { %v3895_v42 = vpop.f32.mrb[93].mxu0  ;;  %v3953_v43 = vpop.f32.mrb[93].mxu1 }
 0x3f4   : > { %v2748_v45 = vmax.f32 %v2735_v35, 0.0  ;;  %v3896_v46 = vadd.f32 %v3895_v42, %v3894_v36  ;;  %v3954_v47 = vadd.f32 %v3953_v43, %v3952_v41  ;;  %v3897_v48 = vpop.f32.mrb[94].mxu0  ;;  %v3955_v23 = vpop.f32.mrb[94].mxu1 }
 0x3f5   : > { %v3898_v53 = vpop.f32.mrb[95].mxu0  ;;  %v3956_v54 = vpop.f32.mrb[95].mxu1 }
 0x3f6   : > { %v2492_v55 = vadd.f32 %v3896_v46, %v5287_v4  ;;  %v3899_v37 = vadd.f32 %v3898_v53, %v3897_v48  ;;  %v3957_v25 = vadd.f32 %v3956_v54, %v3955_v23  ;;  %v2759_v56 = vpack.c.bf16 %v2748_v45, %v2747_v44 }
 0x3f8   : > { %v2736_v38 = vadd.f32 %v3954_v47, %v2492_v55  ;;  %v2493_v57 = vadd.f32 %v3899_v37, %v5287_v4  ;;  %4063 = vmatmul.mubr.bf16.gmra.mrb[116].mxu0 %v2759_v56 }
 0x3f9   : > { %4066 = vmatprep.mubr.msk.bf16.mxu0 %vm4719_vm2, %v4718_v0 }
 0x3fa   : > { %v2737_v39 = vadd.f32 %v3957_v25, %v2493_v57  ;;  %v3900_v40 = vpop.f32.mrb[96].mxu0  ;;  %v3958_v58 = vpop.f32.mrb[96].mxu1  ;;  %v2749_v61 = vmax.f32 %v2736_v38, 0.0 }
 0x3fb   : > { %v3901_v59 = vpop.f32.mrb[97].mxu0  ;;  %v3959_v60 = vpop.f32.mrb[97].mxu1 }
 0x3fc   : > { %v2750_v62 = vmax.f32 %v2737_v39, 0.0  ;;  %v3902_v63 = vadd.f32 %v3901_v59, %v3900_v40  ;;  %v3960_v1 = vadd.f32 %v3959_v60, %v3958_v58  ;;  %v3903_v2 = vpop.f32.mrb[98].mxu0  ;;  %v3961_v3 = vpop.f32.mrb[98].mxu1 }
 0x3fd   : > { %v3904_v5 = vpop.f32.mrb[99].mxu0  ;;  %v3962_v6 = vpop.f32.mrb[99].mxu1 }
 0x3fe   : > { %v2494_v7 = vadd.f32 %v3902_v63, %v5287_v4  ;;  %v3905_v8 = vadd.f32 %v3904_v5, %v3903_v2  ;;  %v3963_v9 = vadd.f32 %v3962_v6, %v3961_v3  ;;  %v2760_v10 = vpack.c.bf16 %v2750_v62, %v2749_v61 }
 0x400   : > { %v2738_v11 = vadd.f32 %v3960_v1, %v2494_v7  ;;  %v2495_v12 = vadd.f32 %v3905_v8, %v5287_v4  ;;  %4067 = vmatmul.mubr.bf16.gmra.mrb[120].mxu0 %v2760_v10  ;;  %v4538_v7 = vld [vmem:[%s5530_s7 + $0x78] sm:$0xff]   ;;  %v4540_v8 = vld [vmem:[%s5530_s7 + $0x88] sm:$0xff]  }
 0x401   : > { %4070 = vmatprep.mubr.msk.bf16.mxu0 %vm4719_vm2, %v4718_v0  ;;  %4101 = vmatpush3.bf16.msra.mxu1 %v4538_v7  ;;  %v4542_v10 = vld [vmem:[%s5530_s7 + $0x98] sm:$0xff]  }
 0x402   : > { %v2739_v13 = vadd.f32 %v3963_v9, %v2495_v12  ;;  %v3906_v14 = vpop.f32.mrb[100].mxu0  ;;  %v3964_v15 = vpop.f32.mrb[100].mxu1  ;;  %v2751_v28 = vmax.f32 %v2738_v11, 0.0  ;;  %4174 = vmatprep.subr.bf16.mxu1 %v4718_v0  ;;  %v4541_v9 = vld [vmem:[%s5530_s7 + $0x90] sm:$0xff]   ;;  %v4543_v11 = vld [vmem:[%s5530_s7 + $0xa0] sm:$0xff]   ;;  %v4544_v12 = vld [vmem:[%s5530_s7 + $0xa8] sm:$0xff]  }
 0x403   : > { %v3907_v27 = vpop.f32.mrb[101].mxu0  ;;  %v3965_v16 = vpop.f32.mrb[101].mxu1 }
 0x404   : > { %v2752_v17 = vmax.f32 %v2739_v13, 0.0  ;;  %v3908_v18 = vadd.f32 %v3907_v27, %v3906_v14  ;;  %v3966_v19 = vadd.f32 %v3965_v16, %v3964_v15  ;;  %v3909_v30 = vpop.f32.mrb[102].mxu0  ;;  %v3967_v32 = vpop.f32.mrb[102].mxu1  ;;  %v4545_v13 = vld [vmem:[%s5530_s7 + $0xb0] sm:$0xff]   ;;  %v5351_v14 = vld [vmem:[%s5531_s8] ss:$0 sm:$0xff] }
 0x405   : > { %v3910_v20 = vpop.f32.mrb[103].mxu0  ;;  %v3968_v21 = vpop.f32.mrb[103].mxu1 }
 0x406   : > { %v2496_v22 = vadd.f32 %v3908_v18, %v5287_v4  ;;  %v3911_v24 = vadd.f32 %v3910_v20, %v3909_v30  ;;  %v3969_v49 = vadd.f32 %v3968_v21, %v3967_v32  ;;  %v2761_v26 = vpack.c.bf16 %v2752_v17, %v2751_v28 }
 0x408   : > { %v2740_v29 = vadd.f32 %v3966_v19, %v2496_v22  ;;  %v2497_v50 = vadd.f32 %v3911_v24, %v5287_v4  ;;  %4071 = vmatmul.mubr.bf16.gmra.mrb[124].mxu0 %v2761_v26 }
 0x409   : > { %4074 = vmatprep.mubr.msk.bf16.mxu0 %vm4719_vm2, %v4718_v0 }
 0x40a   : > { %v2741_v31 = vadd.f32 %v3969_v49, %v2497_v50  ;;  %v3912_v51 = vpop.f32.mrb[104].mxu0  ;;  %v3970_v52 = vpop.f32.mrb[104].mxu1  ;;  %v2753_v35 = vmax.f32 %v2740_v29, 0.0 }
 0x40b   : > { %v3913_v33 = vpop.f32.mrb[105].mxu0  ;;  %v3971_v34 = vpop.f32.mrb[105].mxu1 }
 0x40c   : > { %v2754_v36 = vmax.f32 %v2741_v31, 0.0  ;;  %v3914_v41 = vadd.f32 %v3913_v33, %v3912_v51  ;;  %v3972_v42 = vadd.f32 %v3971_v34, %v3970_v52  ;;  %v3915_v43 = vpop.f32.mrb[106].mxu0  ;;  %v3973_v44 = vpop.f32.mrb[106].mxu1 }
 0x40d   : > { %v3916_v45 = vpop.f32.mrb[107].mxu0  ;;  %v3974_v46 = vpop.f32.mrb[107].mxu1 }
 0x40e   : > { %v2498_v47 = vadd.f32 %v3914_v41, %v5287_v4  ;;  %v3917_v48 = vadd.f32 %v3916_v45, %v3915_v43  ;;  %v3975_v23 = vadd.f32 %v3974_v46, %v3973_v44  ;;  %v2762_v53 = vpack.c.bf16 %v2754_v36, %v2753_v35 }
 0x410   : > { %v2742_v54 = vadd.f32 %v3972_v42, %v2498_v47  ;;  %v2499_v55 = vadd.f32 %v3917_v48, %v5287_v4  ;;  %4075 = vmatmul.mubr.bf16.gmra.mrb[128].mxu0 %v2762_v53 }
 0x411   : > { %4078 = vmatprep.mubr.msk.bf16.mxu0 %vm4719_vm2, %v4718_v0 }
 0x412   : > { %v2743_v37 = vadd.f32 %v3975_v23, %v2499_v55  ;;  %v3918_v25 = vpop.f32.mrb[108].mxu0  ;;  %v3976_v56 = vpop.f32.mrb[108].mxu1  ;;  %v2755_v39 = vmax.f32 %v2742_v54, 0.0 }
 0x413   : > { %v3919_v38 = vpop.f32.mrb[109].mxu0  ;;  %v3977_v57 = vpop.f32.mrb[109].mxu1 }
 0x414   : > { %v2756_v40 = vmax.f32 %v2743_v37, 0.0  ;;  %v3920_v58 = vadd.f32 %v3919_v38, %v3918_v25  ;;  %v3921_v59 = vpop.f32.mrb[110].mxu0  ;;  %v3978_v60 = vadd.f32 %v3977_v57, %v3976_v56  ;;  %v3979_v61 = vpop.f32.mrb[110].mxu1 }
 0x415   : > { %v3922_v62 = vpop.f32.mrb[111].mxu0  ;;  %v3980_v63 = vpop.f32.mrb[111].mxu1 }
 0x416   : > { %v2500_v1 = vadd.f32 %v3920_v58, %v5287_v4  ;;  %v2763_v2 = vpack.c.bf16 %v2756_v40, %v2755_v39  ;;  %v4539_v4 = vld [vmem:[%s5530_s7 + $0x80] sm:$0xff]  }
 0x417   : > { %4131 = vmatpush3.bf16.msra.mxu0 %v4539_v4 }
 0x418   : > { %v2744_v3 = vadd.f32 %v3978_v60, %v2500_v1  ;;  %4079 = vmatmul.mubr.bf16.gmra.mrb[132].mxu0 %v2763_v2  ;;  %4132 = vmatprep.subr.bf16.mxu0 %v4718_v0 }
 0x419   : > { %4082 = vmatprep.mubr.msk.bf16.mxu0 %vm4719_vm2, %v4718_v0 }
 0x41a   : > { %v2757_v5 = vmax.f32 %v2744_v3, 0.0 }
 0x41b   : > { %4133 = vmatpush3.bf16.msra.mxu0 %v4540_v8 }
 0x41c   : > { %v2764_v6 = vpack.c.bf16 %v2757_v5, %v2757_v5  ;;  %4134 = vmatprep.subr.bf16.mxu0 %v4718_v0 }
 0x41f   : > { %4135 = vmatpush3.bf16.msra.mxu0 %v4541_v9 }
 0x420   : > { %4083 = vmatmul.mubr.bf16.gmra.mrb[136].mxu0 %v2764_v6  ;;  %4136 = vmatprep.subr.bf16.mxu0 %v4718_v0 }
 0x421   : > { %4146 = vmatprep.mubr.msk.bf16.mxu0 %vm4719_vm2, %v4718_v0 }
 0x423   : > { %4137 = vmatpush3.bf16.msra.mxu0 %v4542_v10 }
 0x424   : > { %4138 = vmatprep.subr.bf16.mxu0 %v4718_v0 }
 0x427   : > { %4139 = vmatpush3.bf16.msra.mxu0 %v4543_v11 }
 0x428   : > { %4140 = vmatprep.subr.bf16.mxu0 %v4718_v0 }
 0x42b   : > { %4141 = vmatpush3.bf16.msra.mxu0 %v4544_v12 }
 0x42c   : > { %4142 = vmatprep.subr.bf16.mxu0 %v4718_v0 }
 0x42f   : > { %4143 = vmatpush3.bf16.msra.mxu0 %v4545_v13  ;;  %v4546_v13 = vld [vmem:[%s5530_s7 + $0xb8] sm:$0xff]  }
 0x430   : > { %4144 = vmatprep.subr.bf16.mxu0 %v4718_v0 }
 0x433   : > { %4145 = vmatpush3.bf16.msra.mxu0 %v4546_v13 }
 0x4c3   : > { %v2870_v15 = vpop.f32.mrb[112].mxu0 }
 0x4c4   : > { %v2871_v27 = vadd.f32 %v5351_v14, %v2870_v15  ;;  %v4060_v16 = vpop.f32.mrb[113].mxu0  ;;  %v4547_v15 = vld [vmem:[#allocation7] sm:$0xff]  }
 0x4c5   : > { %v2873_v28 = vpop.f32.mrb[114].mxu0  ;;  %v4550_v16 = vld [vmem:[#allocation7 + $0x18] sm:$0xff]  }
 0x4c6   : > { %v2874_v17 = vadd.f32 %v5351_v14, %v2873_v28  ;;  %v4061_v18 = vpop.f32.mrb[115].mxu0  ;;  %v2924_v19 = vmax.f32 %v2871_v27, 0.0  ;;  %v4549_v27 = vld [vmem:[#allocation7 + $0x10] sm:$0xff]   ;;  %v4551_v28 = vld [vmem:[#allocation7 + $0x20] sm:$0xff]  }
 0x4c7   : > { %v4553_v18 = vld [vmem:[#allocation7 + $0x30] sm:$0xff]  }
 0x4c8   : > { %v2925_v30 = vmax.f32 %v2874_v17, 0.0  ;;  %v4552_v17 = vld [vmem:[#allocation7 + $0x28] sm:$0xff]  }
 0x4ca   : > { %v2937_v32 = vpack.c.bf16 %v2925_v30, %v2924_v19  ;;  %v5393_v19 = vld [vmem:[%s5531_s8 + $0x1] ss:$0 sm:$0xff] }
 0x4cb   : > { %v2878_v20 = vpop.f32.mrb[116].mxu0 }
 0x4cc   : > { %v2879_v21 = vadd.f32 %v5351_v14, %v2878_v20  ;;  %v4064_v22 = vpop.f32.mrb[117].mxu0  ;;  %4103 = vmatmul.mubr.bf16.vlgmr.msra.gmra.mrb[112].mxu1 %v2937_v32 }
 0x4cd   : > { %v2881_v24 = vpop.f32.mrb[118].mxu0  ;;  %4106 = vmatprep.mubr.msk.bf16.mxu1 %vm4719_vm2, %v4718_v0  ;;  %4175 = vmatpush3.bf16.msra.mxu1 %v4547_v15 }
 0x4ce   : > { %v2882_v49 = vadd.f32 %v5351_v14, %v2881_v24  ;;  %v4065_v26 = vpop.f32.mrb[119].mxu0  ;;  %v2926_v29 = vmax.f32 %v2879_v21, 0.0  ;;  %4176 = vmatprep.subr.bf16.mxu1 %v4718_v0 }
 0x4d0   : > { %v2927_v50 = vmax.f32 %v2882_v49, 0.0 }
 0x4d2   : > { %v2938_v31 = vpack.c.bf16 %v2927_v50, %v2926_v29 }
 0x4d3   : > { %v2886_v51 = vpop.f32.mrb[120].mxu0 }
 0x4d4   : > { %v2887_v52 = vadd.f32 %v5351_v14, %v2886_v51  ;;  %v4068_v33 = vpop.f32.mrb[121].mxu0  ;;  %4107 = vmatmul.mubr.bf16.gmra.mrb[116].mxu1 %v2938_v31 }
 0x4d5   : > { %v2889_v34 = vpop.f32.mrb[122].mxu0  ;;  %4110 = vmatprep.mubr.msk.bf16.mxu1 %vm4719_vm2, %v4718_v0 }
 0x4d6   : > { %v2890_v35 = vadd.f32 %v5351_v14, %v2889_v34  ;;  %v4069_v36 = vpop.f32.mrb[123].mxu0  ;;  %v2928_v41 = vmax.f32 %v2887_v52, 0.0 }
 0x4d8   : > { %v2929_v42 = vmax.f32 %v2890_v35, 0.0 }
 0x4da   : > { %v2939_v43 = vpack.c.bf16 %v2929_v42, %v2928_v41 }
 0x4db   : > { %v2894_v44 = vpop.f32.mrb[124].mxu0 }
 0x4dc   : > { %v2895_v45 = vadd.f32 %v5351_v14, %v2894_v44  ;;  %v4072_v46 = vpop.f32.mrb[125].mxu0  ;;  %4111 = vmatmul.mubr.bf16.gmra.mrb[120].mxu1 %v2939_v43 }
 0x4dd   : > { %v2897_v47 = vpop.f32.mrb[126].mxu0  ;;  %4114 = vmatprep.mubr.msk.bf16.mxu1 %vm4719_vm2, %v4718_v0 }
 0x4de   : > { %v2898_v48 = vadd.f32 %v5351_v14, %v2897_v47  ;;  %v4073_v23 = vpop.f32.mrb[127].mxu0  ;;  %v2930_v53 = vmax.f32 %v2895_v45, 0.0 }
 0x4e0   : > { %v2931_v54 = vmax.f32 %v2898_v48, 0.0 }
 0x4e2   : > { %v2940_v55 = vpack.c.bf16 %v2931_v54, %v2930_v53 }
 0x4e3   : > { %v2902_v37 = vpop.f32.mrb[128].mxu0 }
 0x4e4   : > { %v2903_v25 = vadd.f32 %v5351_v14, %v2902_v37  ;;  %v4076_v56 = vpop.f32.mrb[129].mxu0  ;;  %4115 = vmatmul.mubr.bf16.gmra.mrb[124].mxu1 %v2940_v55 }
 0x4e5   : > { %v2905_v38 = vpop.f32.mrb[130].mxu0  ;;  %4118 = vmatprep.mubr.msk.bf16.mxu1 %vm4719_vm2, %v4718_v0 }
 0x4e6   : > { %v2906_v57 = vadd.f32 %v5351_v14, %v2905_v38  ;;  %v4077_v39 = vpop.f32.mrb[131].mxu0  ;;  %v2932_v40 = vmax.f32 %v2903_v25, 0.0 }
 0x4e8   : > { %v2933_v58 = vmax.f32 %v2906_v57, 0.0 }
 0x4ea   : > { %v2941_v59 = vpack.c.bf16 %v2933_v58, %v2932_v40 }
 0x4eb   : > { %v2910_v60 = vpop.f32.mrb[132].mxu0 }
 0x4ec   : > { %v2911_v61 = vadd.f32 %v5351_v14, %v2910_v60  ;;  %v4080_v62 = vpop.f32.mrb[133].mxu0  ;;  %4119 = vmatmul.mubr.bf16.gmra.mrb[128].mxu1 %v2941_v59 }
 0x4ed   : > { %v2913_v63 = vpop.f32.mrb[134].mxu0  ;;  %4122 = vmatprep.mubr.msk.bf16.mxu1 %vm4719_vm2, %v4718_v0 }
 0x4ee   : > { %v2914_v1 = vadd.f32 %v5351_v14, %v2913_v63  ;;  %v4081_v2 = vpop.f32.mrb[135].mxu0  ;;  %v2934_v3 = vmax.f32 %v2911_v61, 0.0 }
 0x4f0   : > { %v2935_v5 = vmax.f32 %v2914_v1, 0.0 }
 0x4f2   : > { %v2942_v6 = vpack.c.bf16 %v2935_v5, %v2934_v3 }
 0x4f3   : > { %v2918_v7 = vpop.f32.mrb[136].mxu0 }
 0x4f4   : > { %v2919_v4 = vadd.f32 %v5351_v14, %v2918_v7  ;;  %v4084_v8 = vpop.f32.mrb[137].mxu0  ;;  %4123 = vmatmul.mubr.bf16.gmra.mrb[132].mxu1 %v2942_v6  ;;  %v4548_v14 = vld [vmem:[#allocation7 + $0x8] sm:$0xff]  }
 0x4f5   : > { %v2921_v9 = vpop.f32.mrb[138].mxu0  ;;  %4126 = vmatprep.mubr.msk.bf16.mxu1 %vm4719_vm2, %v4718_v0  ;;  %4177 = vmatpush3.bf16.msra.mxu1 %v4548_v14 }
 0x4f6   : > { %v2936_v10 = vmax.f32 %v2919_v4, 0.0  ;;  %v4085_v11 = vpop.f32.mrb[139].mxu0  ;;  %4178 = vmatprep.subr.bf16.mxu1 %v4718_v0 }
 0x4f8   : > { %v2943_v12 = vpack.c.bf16 %v2936_v10, %v2936_v10 }
 0x4f9   : > { %4179 = vmatpush3.bf16.msra.mxu1 %v4549_v27 }
 0x4fa   : > { %4180 = vmatprep.subr.bf16.mxu1 %v4718_v0 }
 0x4fc   : > { %4127 = vmatmul.mubr.bf16.gmra.mrb[136].mxu1 %v2943_v12 }
 0x4fd   : > { %4190 = vmatprep.mubr.msk.bf16.mxu1 %vm4719_vm2, %v4718_v0  ;;  %4181 = vmatpush3.bf16.msra.mxu1 %v4550_v16 }
 0x4fe   : > { %4182 = vmatprep.subr.bf16.mxu1 %v4718_v0 }
 0x501   : > { %4183 = vmatpush3.bf16.msra.mxu1 %v4551_v28 }
 0x502   : > { %4184 = vmatprep.subr.bf16.mxu1 %v4718_v0 }
 0x505   : > { %4185 = vmatpush3.bf16.msra.mxu1 %v4552_v17 }
 0x506   : > { %4186 = vmatprep.subr.bf16.mxu1 %v4718_v0 }
 0x509   : > { %4187 = vmatpush3.bf16.msra.mxu1 %v4553_v18  ;;  %v4554_v18 = vld [vmem:[#allocation7 + $0x38] sm:$0xff]  }
 0x50a   : > { %4188 = vmatprep.subr.bf16.mxu1 %v4718_v0 }
 0x50d   : > { %4189 = vmatpush3.bf16.msra.mxu1 %v4554_v18  ;;  %v3853_v18 = vld [vmem:[%s5533_s10] ss:$0 sm:$0xff] }
 0x59f   : > { %v3051_v30 = vpop.f32.mrb[112].mxu1 }
 0x5a0   : > { %v3052_v32 = vadd.f32 %v5393_v19, %v3051_v30  ;;  %v4104_v20 = vpop.f32.mrb[113].mxu1  ;;  %v5423_v30 = vld [vmem:[%s5531_s8 + $0x2] ss:$0 sm:$0xff] }
 0x5a1   : > { %v3054_v21 = vpop.f32.mrb[114].mxu1 }
 0x5a2   : > { %v3055_v22 = vadd.f32 %v5393_v19, %v3054_v21  ;;  %v4105_v24 = vpop.f32.mrb[115].mxu1  ;;  %v3105_v49 = vmax.f32 %v3052_v32, 0.0 }
 0x5a4   : > { %v3106_v26 = vmax.f32 %v3055_v22, 0.0 }
 0x5a6   : > { %v3118_v29 = vpack.c.bf16 %v3106_v26, %v3105_v49 }
 0x5a7   : > { %v3059_v50 = vpop.f32.mrb[116].mxu1 }
 0x5a8   : > { %v3060_v31 = vadd.f32 %v5393_v19, %v3059_v50  ;;  %v4108_v51 = vpop.f32.mrb[117].mxu1  ;;  %4147 = vmatmul.mubr.bf16.vlgmr.msra.gmra.mrb[140].mxu0 %v3118_v29 }
 0x5a9   : > { %v3062_v52 = vpop.f32.mrb[118].mxu1  ;;  %4150 = vmatprep.mubr.msk.bf16.mxu0 %vm4719_vm2, %v4718_v0 }
 0x5aa   : > { %v3063_v33 = vadd.f32 %v5393_v19, %v3062_v52  ;;  %v4109_v34 = vpop.f32.mrb[119].mxu1  ;;  %v3107_v35 = vmax.f32 %v3060_v31, 0.0 }
 0x5ac   : > { %v3108_v36 = vmax.f32 %v3063_v33, 0.0 }
 0x5ae   : > { %v3119_v41 = vpack.c.bf16 %v3108_v36, %v3107_v35 }
 0x5af   : > { %v3067_v42 = vpop.f32.mrb[120].mxu1 }
 0x5b0   : > { %v3068_v43 = vadd.f32 %v5393_v19, %v3067_v42  ;;  %v4112_v44 = vpop.f32.mrb[121].mxu1  ;;  %4151 = vmatmul.mubr.bf16.gmra.mrb[144].mxu0 %v3119_v41 }
 0x5b1   : > { %v3070_v45 = vpop.f32.mrb[122].mxu1  ;;  %4154 = vmatprep.mubr.msk.bf16.mxu0 %vm4719_vm2, %v4718_v0 }
 0x5b2   : > { %v3071_v46 = vadd.f32 %v5393_v19, %v3070_v45  ;;  %v4113_v47 = vpop.f32.mrb[123].mxu1  ;;  %v3109_v48 = vmax.f32 %v3068_v43, 0.0 }
 0x5b4   : > { %v3110_v23 = vmax.f32 %v3071_v46, 0.0 }
 0x5b6   : > { %v3120_v53 = vpack.c.bf16 %v3110_v23, %v3109_v48 }
 0x5b7   : > { %v3075_v54 = vpop.f32.mrb[124].mxu1 }
 0x5b8   : > { %v3076_v55 = vadd.f32 %v5393_v19, %v3075_v54  ;;  %v4116_v37 = vpop.f32.mrb[125].mxu1  ;;  %4155 = vmatmul.mubr.bf16.gmra.mrb[148].mxu0 %v3120_v53 }
 0x5b9   : > { %v3078_v25 = vpop.f32.mrb[126].mxu1  ;;  %4158 = vmatprep.mubr.msk.bf16.mxu0 %vm4719_vm2, %v4718_v0 }
 0x5ba   : > { %v3079_v56 = vadd.f32 %v5393_v19, %v3078_v25  ;;  %v4117_v38 = vpop.f32.mrb[127].mxu1  ;;  %v3111_v57 = vmax.f32 %v3076_v55, 0.0 }
 0x5bc   : > { %v3112_v39 = vmax.f32 %v3079_v56, 0.0 }
 0x5be   : > { %v3121_v40 = vpack.c.bf16 %v3112_v39, %v3111_v57 }
 0x5bf   : > { %v3083_v58 = vpop.f32.mrb[128].mxu1 }
 0x5c0   : > { %v3084_v59 = vadd.f32 %v5393_v19, %v3083_v58  ;;  %v4120_v60 = vpop.f32.mrb[129].mxu1  ;;  %4159 = vmatmul.mubr.bf16.gmra.mrb[152].mxu0 %v3121_v40 }
 0x5c1   : > { %v3086_v61 = vpop.f32.mrb[130].mxu1  ;;  %4162 = vmatprep.mubr.msk.bf16.mxu0 %vm4719_vm2, %v4718_v0 }
 0x5c2   : > { %v3087_v62 = vadd.f32 %v5393_v19, %v3086_v61  ;;  %v4121_v63 = vpop.f32.mrb[131].mxu1  ;;  %v3113_v1 = vmax.f32 %v3084_v59, 0.0 }
 0x5c4   : > { %v3114_v2 = vmax.f32 %v3087_v62, 0.0 }
 0x5c6   : > { %v3122_v3 = vpack.c.bf16 %v3114_v2, %v3113_v1 }
 0x5c7   : > { %v3091_v5 = vpop.f32.mrb[132].mxu1 }
 0x5c8   : > { %v3092_v6 = vadd.f32 %v5393_v19, %v3091_v5  ;;  %v4124_v7 = vpop.f32.mrb[133].mxu1  ;;  %4163 = vmatmul.mubr.bf16.gmra.mrb[156].mxu0 %v3122_v3 }
 0x5c9   : > { %v3094_v4 = vpop.f32.mrb[134].mxu1  ;;  %4166 = vmatprep.mubr.msk.bf16.mxu0 %vm4719_vm2, %v4718_v0 }
 0x5ca   : > { %v3095_v8 = vadd.f32 %v5393_v19, %v3094_v4  ;;  %v4125_v9 = vpop.f32.mrb[135].mxu1  ;;  %v3115_v10 = vmax.f32 %v3092_v6, 0.0 }
 0x5cc   : > { %v3116_v11 = vmax.f32 %v3095_v8, 0.0 }
 0x5ce   : > { %v3123_v12 = vpack.c.bf16 %v3116_v11, %v3115_v10 }
 0x5cf   : > { %v3099_v13 = vpop.f32.mrb[136].mxu1 }
 0x5d0   : > { %v3100_v15 = vadd.f32 %v5393_v19, %v3099_v13  ;;  %v4128_v14 = vpop.f32.mrb[137].mxu1  ;;  %4167 = vmatmul.mubr.bf16.gmra.mrb[160].mxu0 %v3123_v12 }
 0x5d1   : > { %v3102_v27 = vpop.f32.mrb[138].mxu1  ;;  %4170 = vmatprep.mubr.msk.bf16.mxu0 %vm4719_vm2, %v4718_v0 }
 0x5d2   : > { %v3117_v16 = vmax.f32 %v3100_v15, 0.0  ;;  %v4129_v28 = vpop.f32.mrb[139].mxu1 }
 0x5d4   : > { %v3124_v17 = vpack.c.bf16 %v3117_v16, %v3117_v16 }
 0x5d8   : > { %4171 = vmatmul.mubr.bf16.gmra.mrb[164].mxu0 %v3124_v17 }
 0x67b   : > { %v3232_v32 = vpop.f32.mrb[140].mxu0 }
 0x67c   : > { %v3233_v19 = vadd.f32 %v5423_v30, %v3232_v32  ;;  %v4148_v20 = vpop.f32.mrb[141].mxu0 }
 0x67d   : > { %v3235_v21 = vpop.f32.mrb[142].mxu0 }
 0x67e   : > { %v3236_v22 = vadd.f32 %v5423_v30, %v3235_v21  ;;  %v4149_v24 = vpop.f32.mrb[143].mxu0  ;;  %v3286_v49 = vmax.f32 %v3233_v19, 0.0 }
 0x680   : > { %v3287_v26 = vmax.f32 %v3236_v22, 0.0 }
 0x682   : > { %v3299_v29 = vpack.c.bf16 %v3287_v26, %v3286_v49 }
 0x683   : > { %v3240_v50 = vpop.f32.mrb[144].mxu0 }
 0x684   : > { %v3241_v31 = vadd.f32 %v5423_v30, %v3240_v50  ;;  %v4152_v51 = vpop.f32.mrb[145].mxu0  ;;  %4191 = vmatmul.mubr.bf16.vlgmr.msra.gmra.mrb[140].mxu1 %v3299_v29 }
 0x685   : > { %v3243_v52 = vpop.f32.mrb[146].mxu0  ;;  %4194 = vmatprep.mubr.msk.bf16.mxu1 %vm4719_vm2, %v4718_v0 }
 0x686   : > { %v3244_v33 = vadd.f32 %v5423_v30, %v3243_v52  ;;  %v4153_v34 = vpop.f32.mrb[147].mxu0  ;;  %v3288_v35 = vmax.f32 %v3241_v31, 0.0 }
 0x688   : > { %v3289_v36 = vmax.f32 %v3244_v33, 0.0 }
 0x68a   : > { %v3300_v41 = vpack.c.bf16 %v3289_v36, %v3288_v35 }
 0x68b   : > { %v3248_v42 = vpop.f32.mrb[148].mxu0 }
 0x68c   : > { %v3249_v43 = vadd.f32 %v5423_v30, %v3248_v42  ;;  %v4156_v44 = vpop.f32.mrb[149].mxu0  ;;  %4195 = vmatmul.mubr.bf16.gmra.mrb[144].mxu1 %v3300_v41 }
 0x68d   : > { %v3251_v45 = vpop.f32.mrb[150].mxu0  ;;  %4198 = vmatprep.mubr.msk.bf16.mxu1 %vm4719_vm2, %v4718_v0 }
 0x68e   : > { %v3252_v46 = vadd.f32 %v5423_v30, %v3251_v45  ;;  %v4157_v47 = vpop.f32.mrb[151].mxu0  ;;  %v3290_v48 = vmax.f32 %v3249_v43, 0.0 }
 0x690   : > { %v3291_v23 = vmax.f32 %v3252_v46, 0.0 }
 0x692   : > { %v3301_v53 = vpack.c.bf16 %v3291_v23, %v3290_v48 }
 0x693   : > { %v3256_v54 = vpop.f32.mrb[152].mxu0 }
 0x694   : > { %v3257_v55 = vadd.f32 %v5423_v30, %v3256_v54  ;;  %v4160_v37 = vpop.f32.mrb[153].mxu0  ;;  %4199 = vmatmul.mubr.bf16.gmra.mrb[148].mxu1 %v3301_v53 }
 0x695   : > { %v3259_v25 = vpop.f32.mrb[154].mxu0  ;;  %4202 = vmatprep.mubr.msk.bf16.mxu1 %vm4719_vm2, %v4718_v0 }
 0x696   : > { %v3260_v56 = vadd.f32 %v5423_v30, %v3259_v25  ;;  %v4161_v38 = vpop.f32.mrb[155].mxu0  ;;  %v3292_v57 = vmax.f32 %v3257_v55, 0.0 }
 0x698   : > { %v3293_v39 = vmax.f32 %v3260_v56, 0.0 }
 0x69a   : > { %v3302_v40 = vpack.c.bf16 %v3293_v39, %v3292_v57 }
 0x69b   : > { %v3264_v58 = vpop.f32.mrb[156].mxu0 }
 0x69c   : > { %v3265_v59 = vadd.f32 %v5423_v30, %v3264_v58  ;;  %v4164_v60 = vpop.f32.mrb[157].mxu0  ;;  %4203 = vmatmul.mubr.bf16.gmra.mrb[152].mxu1 %v3302_v40 }
 0x69d   : > { %v3267_v61 = vpop.f32.mrb[158].mxu0  ;;  %4206 = vmatprep.mubr.msk.bf16.mxu1 %vm4719_vm2, %v4718_v0 }
 0x69e   : > { %v3268_v62 = vadd.f32 %v5423_v30, %v3267_v61  ;;  %v4165_v63 = vpop.f32.mrb[159].mxu0  ;;  %v3294_v1 = vmax.f32 %v3265_v59, 0.0 }
 0x6a0   : > { %v3295_v2 = vmax.f32 %v3268_v62, 0.0 }
 0x6a2   : > { %v3303_v3 = vpack.c.bf16 %v3295_v2, %v3294_v1 }
 0x6a3   : > { %v3272_v5 = vpop.f32.mrb[160].mxu0 }
 0x6a4   : > { %v3273_v6 = vadd.f32 %v5423_v30, %v3272_v5  ;;  %v4168_v7 = vpop.f32.mrb[161].mxu0  ;;  %4207 = vmatmul.mubr.bf16.gmra.mrb[156].mxu1 %v3303_v3 }
 0x6a5   : > { %v3275_v4 = vpop.f32.mrb[162].mxu0  ;;  %4210 = vmatprep.mubr.msk.bf16.mxu1 %vm4719_vm2, %v4718_v0 }
 0x6a6   : > { %v3276_v8 = vadd.f32 %v5423_v30, %v3275_v4  ;;  %v4169_v9 = vpop.f32.mrb[163].mxu0  ;;  %v3296_v10 = vmax.f32 %v3273_v6, 0.0 }
 0x6a8   : > { %v3297_v11 = vmax.f32 %v3276_v8, 0.0 }
 0x6aa   : > { %v3304_v12 = vpack.c.bf16 %v3297_v11, %v3296_v10 }
 0x6ab   : > { %v3280_v13 = vpop.f32.mrb[164].mxu0 }
 0x6ac   : > { %v3281_v15 = vadd.f32 %v5423_v30, %v3280_v13  ;;  %v4172_v14 = vpop.f32.mrb[165].mxu0  ;;  %4211 = vmatmul.mubr.bf16.gmra.mrb[160].mxu1 %v3304_v12 }
 0x6ad   : > { %v3283_v27 = vpop.f32.mrb[166].mxu0  ;;  %4214 = vmatprep.mubr.msk.bf16.mxu1 %vm4719_vm2, %v4718_v0 }
 0x6ae   : > { %v3298_v16 = vmax.f32 %v3281_v15, 0.0  ;;  %v4173_v28 = vpop.f32.mrb[167].mxu0 }
 0x6b0   : > { %v3305_v17 = vpack.c.bf16 %v3298_v16, %v3298_v16 }
 0x6b4   : > { %4215 = vmatmul.mubr.bf16.gmra.mrb[164].mxu1 %v3305_v17 }
 0x757   : > { %v3411_v32 = vpop.f32.mrb[140].mxu1 }
 0x758   : > { %v3412_v19 = vadd.f32 %v3853_v18, %v3411_v32  ;;  %v4192_v30 = vpop.f32.mrb[141].mxu1 }
 0x759   : > { %v3414_v20 = vpop.f32.mrb[142].mxu1 }
 0x75a   : > { %3465 = vst [vmem:[%s5456_s26] sm:$0xff] %v3412_v19  ;;  %v3415_v0 = vadd.f32 %v3853_v18, %v3414_v20  ;;  %v4193_v21 = vpop.f32.mrb[143].mxu1 }
 0x75c   : > { %3466 = vst [vmem:[%s5456_s26 + $0x8] sm:$0xff] %v3415_v0 }
 0x75f   : > { %v3419_v22 = vpop.f32.mrb[144].mxu1 }
 0x760   : > { %v3420_v24 = vadd.f32 %v3853_v18, %v3419_v22  ;;  %v4196_v49 = vpop.f32.mrb[145].mxu1 }
 0x761   : > { %v3422_v26 = vpop.f32.mrb[146].mxu1 }
 0x762   : > { %3467 = vst [vmem:[%s5456_s26 + $0x10] sm:$0xff] %v3420_v24  ;;  %v3423_v29 = vadd.f32 %v3853_v18, %v3422_v26  ;;  %v4197_v50 = vpop.f32.mrb[147].mxu1 }
 0x764   : > { %3468 = vst [vmem:[%s5456_s26 + $0x18] sm:$0xff] %v3423_v29 }
 0x767   : > { %v3427_v31 = vpop.f32.mrb[148].mxu1 }
 0x768   : > { %v3428_v51 = vadd.f32 %v3853_v18, %v3427_v31  ;;  %v4200_v52 = vpop.f32.mrb[149].mxu1 }
 0x769   : > { %v3430_v33 = vpop.f32.mrb[150].mxu1 }
 0x76a   : > { %3469 = vst [vmem:[%s5456_s26 + $0x20] sm:$0xff] %v3428_v51  ;;  %v3431_v34 = vadd.f32 %v3853_v18, %v3430_v33  ;;  %v4201_v35 = vpop.f32.mrb[151].mxu1 }
 0x76c   : > { %3470 = vst [vmem:[%s5456_s26 + $0x28] sm:$0xff] %v3431_v34 }
 0x76f   : > { %v3435_v36 = vpop.f32.mrb[152].mxu1 }
 0x770   : > { %v3436_v41 = vadd.f32 %v3853_v18, %v3435_v36  ;;  %v4204_v42 = vpop.f32.mrb[153].mxu1 }
 0x771   : > { %v3438_v43 = vpop.f32.mrb[154].mxu1 }
 0x772   : > { %3471 = vst [vmem:[%s5456_s26 + $0x30] sm:$0xff] %v3436_v41  ;;  %v3439_v44 = vadd.f32 %v3853_v18, %v3438_v43  ;;  %v4205_v45 = vpop.f32.mrb[155].mxu1 }
 0x774   : > { %3472 = vst [vmem:[%s5456_s26 + $0x38] sm:$0xff] %v3439_v44 }
 0x777   : > { %v3443_v46 = vpop.f32.mrb[156].mxu1 }
 0x778   : > { %v3444_v47 = vadd.f32 %v3853_v18, %v3443_v46  ;;  %v4208_v48 = vpop.f32.mrb[157].mxu1 }
 0x779   : > { %v3446_v23 = vpop.f32.mrb[158].mxu1 }
 0x77a   : > { %3473 = vst [vmem:[%s5456_s26 + $0x40] sm:$0xff] %v3444_v47  ;;  %v3447_v53 = vadd.f32 %v3853_v18, %v3446_v23  ;;  %v4209_v54 = vpop.f32.mrb[159].mxu1 }
 0x77c   : > { %3474 = vst [vmem:[%s5456_s26 + $0x48] sm:$0xff] %v3447_v53 }
 0x77f   : > { %v3451_v55 = vpop.f32.mrb[160].mxu1 }
 0x780   : > { %v3452_v37 = vadd.f32 %v3853_v18, %v3451_v55  ;;  %v4212_v25 = vpop.f32.mrb[161].mxu1 }
 0x781   : > { %v3454_v56 = vpop.f32.mrb[162].mxu1 }
 0x782   : > { %3475 = vst [vmem:[%s5456_s26 + $0x50] sm:$0xff] %v3452_v37  ;;  %v3455_v38 = vadd.f32 %v3853_v18, %v3454_v56  ;;  %v4213_v57 = vpop.f32.mrb[163].mxu1 }
 0x784   : > { %3476 = vst [vmem:[%s5456_s26 + $0x58] sm:$0xff] %v3455_v38 }
 0x787   : > { %v3459_v39 = vpop.f32.mrb[164].mxu1 }
 0x788   : > { %v3460_v40 = vadd.f32 %v3853_v18, %v3459_v39  ;;  %v4216_v58 = vpop.f32.mrb[165].mxu1 }
 0x789   : > { %v3462_v59 = vpop.f32.mrb[166].mxu1 }
 0x78a   : > { %3477 = vst [vmem:[%s5456_s26 + $0x60] sm:$0xff] %v3460_v40  ;;  %v4217_v60 = vpop.f32.mrb[167].mxu1 }
 0x78b   : > { %4652 = shalt.err (!%p4649_p11)
}
 0x78c   : > { %s4653_s19 = scalar_lea.hbm %s5475_s29, 1664  ;;  %s4657_s14 = scalar_lea.hbm %s5534_s11, 3328 }
 0x78d   : > { %p4654_p5 = scmp.ne.s32.totalorder %s5475_s29, %s4653_s19  ;;  %p4658_p9 = scmp.lt.u32.totalorder %s5475_s29, %s5534_s11 }
 0x78e   : > { %p4659_p10 = scmp.lt.u32.totalorder %s4657_s14, %s4653_s19  ;;  %p4661_p13 = scmp.lt.u32.totalorder %s4653_s19, %s5475_s29 }
 0x78f   : > { %p4655_p0 = pnand %p4654_p5, %p5566_p1 }
 0x790   : > { %p4660_p12 = por %p4659_p10, %p4658_p9 }
 0x791   : > { %p4656_p6 = pneg %p4655_p0 }
 0x792   : > { %p4662_p2 = por %p4661_p13, %p4660_p12 }
 0x794   : > { %p4663_p3 = pnand %p4662_p2, %p4656_p6 }
 0x796   : > { %4666 = shalt.err (!%p4663_p3)
}
 0x797   : > { %s4721_s15 = smov 128   ;;  %s4722_s26 = smov 8  }
 0x798   : > { %4231 = dma.vmem_to_hbm [thread:$0]  (%p5566_p1), %s5477_s5, 1664, %s5475_s29, %s5482_s21, %s4721_s15, %s4721_s15, %s4722_s26  }
 0x799 PF: > { %s5567_s28 = sld [smem:[#allocation14_spill]]  ;;  %s5568_s22 = sld [smem:[#allocation12_spill]] }
 0x79a   : > { %s5569_s13 = sld [smem:[#allocation17_spill]] }
 0x79f   : > { %p4253_p4 = scmp.ge.s32.totalorder %s5567_s28, 2  ;;  %s3507_s30 = sand.u32 1, %s5568_s22  }
 0x7a0   : > { %p5570_p7 = scmp.ne.s32.totalorder %s5569_s13, 0  ;;  %s3508_s17 = scalar_lea.sflag [#allocation4], %s3507_s30 }
 0x7a2   : > { %p4244_p8 = pnand %p4253_p4, %p5570_p7 }
 0x7a4   : > { %4692 = dma.done.wait (!%p4244_p8), %s3508_s17, 1664  }
 0x7a5   : > { %4694 = vsyncadd (!%p4244_p8), %s3508_s17, 4294965632  ;;  %s5571_s20 = sld [smem:[#allocation15_spill]]  ;;  %s5572_s23 = sld [smem:[#allocation13_spill]] }
 0x7a6   : > { %s5573_s19 = sld [smem:[#allocation16_spill]]  ;;  %s5574_s17 = smov %s4701_s18 }
 0x7ab   : > { %p23_p11 = scmp.ge.s32.totalorder %s5571_s20, 4   ;;  %s5575_s18 = smov %s5572_s23 }
 0x7ad   :  { %25 = sbr.rel (!%p23_p11) target bundleno = 7 (0x7), region = 125 }
 0x7b4   :  { %3513 = vsyncpa [#allocation3], 1 }
 0x7b5   :  { %3515 = vsyncpa [#allocation3 + $0x1], 1 }
 0x7b6   :  { %3516 = vsyncpa [#allocation6], 1 }
 0x7b7   :  { %3517 = vsyncpa [#allocation4], 1 }
 0x7b8   :  { %3519 = vsyncpa [#allocation4 + $0x1], 1 }

</bundles_post_ra>
